<compile_context>
chip_gen: v5e
topology: v5e:2x2
jax: 0.10.0
libtpu: 0.0.40
codegen_flags: <defaults>
</compile_context>

<pallas_src>
import jax
import jax.numpy as jnp
import numpy as np
from jax.experimental import pallas as pl
from jax.experimental.pallas import tpu as pltpu


B_TILE = 8   # images per grid step (sublane-aligned output block)


# ----------------------------------------------------------------------------
# Wrapper-side construction of the structured operands (XLA / trace-time numpy)
# ----------------------------------------------------------------------------

def _banded_conv_weight(w_hwio, width):
    """Banded (Toeplitz-in-W) weights for a 3x3 / stride-1 / pad-1 conv.

    T[dh, wi*Cin + ci, wo*Cout + co] = w[dh, wi - wo + 1, ci, co] (taps outside
    [0, 3) are zero), so conv_row[h] = sum_dh p[h + dh] @ T[dh], where p is the
    per-image H-padded merged-lane activation (rows = h, lanes = w*Cin + ci).
    W-direction zero padding is implicit (out-of-range taps have no band entry).
    """
    kh, kw, cin, cout = w_hwio.shape
    assert kh == 3 and kw == 3, "built for 3x3 convs with padding=1, stride=1"
    wi = np.arange(width)[None, :, None]
    wo = np.arange(width)[None, None, :]
    dw = np.arange(kw)[:, None, None]
    sel = jnp.asarray((wi == wo + dw - 1).astype(np.float32))       # (3, W, W)
    t = jnp.einsum("awq,hacd->hwcqd", sel, w_hwio)                  # (3, W, Cin, W, Cout)
    return t.reshape(kh, width * cin, width * cout)


def _row_pool_selector(b_tile, h_in, h_out, last):
    """One-hot H-pool selectors, shape (2, rows_out, b_tile*(h_in+2)).

    SH[k] picks conv-output rows 2*ho + k of every image and simultaneously
    scatters them into the next stage's per-image H-padded row layout (halo rows
    are all-zero selector rows -> zero output rows) or, for the last stage, into an
    (ho-major, image-minor) dense layout that feeds the flatten dots.  For the
    non-last stages two trailing all-zero rows keep the downstream contraction dims
    8/16-row aligned.
    """
    rz = b_tile * (h_in + 2)            # conv-output row count of this stage
    if last:
        rows_out = h_out * b_tile

        def out_row(b, ho):
            return ho * b_tile + b
    else:
        rows_out = b_tile * (h_out + 2) + 2

        def out_row(b, ho):
            return b * (h_out + 2) + 1 + ho

    sh = np.zeros((2, rows_out, rz), np.float32)
    for k in range(2):
        for b in range(b_tile):
            for ho in range(h_out):
                sh[k, out_row(b, ho), b * (h_in + 2) + 2 * ho + k] = 1.0
    return sh


def _col_pool_selector(w_in, cout):
    """One-hot W-pool selector (w_in*cout, (w_in//2)*cout): keep even lane groups."""
    w_out = w_in // 2
    sw = np.zeros((w_in * cout, w_out * cout), np.float32)
    for wo in range(w_out):
        for c in range(cout):
            sw[2 * wo * cout + c, wo * cout + c] = 1.0
    return sw


def _flatten_perm(h_out, w_out, cout):
    """P[ho, wo*C + c, c*(H*W) + ho*W + wo] = 1: torch NCHW flatten order."""
    feat = cout * h_out * w_out
    pm = np.zeros((h_out, w_out * cout, feat), np.float32)
    for ho in range(h_out):
        for wo in range(w_out):
            for c in range(cout):
                pm[ho, wo * cout + c, c * (h_out * w_out) + ho * w_out + wo] = 1.0
    return pm


def _inv_spec(shape):
    """Grid-invariant full-array BlockSpec (weights / selectors).

    Note: pl.Buffered(1) pipeline_mode would drop the redundant second buffer for
    these grid-invariant operands (v7x VMEM headroom); left at the default since the
    whole operand set is ~1 MB and lowering portability matters more here.
    """
    rank = len(shape)
    return pl.BlockSpec(shape, lambda i, _r=rank: (0,) * _r)


# ----------------------------------------------------------------------------
# Forward pass: one fused pallas_call, one B_TILE batch block per grid step
# ----------------------------------------------------------------------------

def cnn_feature_extractor(x_nchw, params):
    """Equivalent to CNNFeatureExtractor.forward: NCHW float32 in, (N, F) float32 out."""
    n, cin, h, w = x_nchw.shape
    assert h % 8 == 0 and w % 8 == 0, "three 2x2 pools need H, W divisible by 8"
    bt = B_TILE
    chans = [cin] + [wt.shape[-1] for wt, _ in params]               # e.g. [4, 16, 32, 64]
    hs = [h, h // 2, h // 4, h // 8]
    ws = [w, w // 2, w // 4, w // 8]
    feat = chans[3] * hs[3] * ws[3]
    c1, c2, c3 = chans[1], chans[2], chans[3]
    h3 = hs[3]

    bf16 = jnp.bfloat16
    f32 = jnp.float32

    # --- batch padding + NCHW -> merged-lane (rows=h, lanes=w*Cin+c), zero halos ---
    n_pad = -(-n // bt) * bt
    n_blocks = n_pad // bt
    xt = jnp.transpose(x_nchw, (0, 2, 3, 1)).reshape(n, h, w * cin)
    xt = jnp.pad(xt, ((0, n_pad - n), (1, 1), (0, 0)))               # per-image halo rows
    xt = xt.reshape(n_blocks, bt * (h + 2), w * cin)
    xt = jnp.pad(xt, ((0, 0), (0, 2), (0, 0)))                       # 2 alignment rows/block
    x_packed = xt.astype(f32)                # (n_blocks, bt*(h+2)+2, W*Cin)

    # --- structured operands (bf16 for all matmul RHS, f32 biases) ---
    operands = [x_packed]
    for i, (wt, b) in enumerate(params):
        operands.append(_banded_conv_weight(wt, ws[i]).astype(bf16))          # (3, Wi*Ci, Wi*Ci+1)
        operands.append(jnp.tile(b.astype(f32), (1, ws[i])))                  # (1, Wi*Ci+1)
        operands.append(jnp.asarray(
            _row_pool_selector(bt, hs[i], hs[i + 1], last=(i == 2)), bf16))   # (2, rows_out, rz)
        operands.append(jnp.asarray(_col_pool_selector(ws[i], chans[i + 1]), bf16))
    operands.append(jnp.asarray(_flatten_perm(hs[3], ws[3], chans[3]), bf16))  # (h3, W3*C3, F)

    # --- the fused kernel ---
    def kernel(x_ref,
               t1_ref, b1_ref, sh1_ref, sw1_ref,
               t2_ref, b2_ref, sh2_ref, sw2_ref,
               t3_ref, b3_ref, sh3_ref, sw3_ref,
               perm_ref, o_ref):

        def stage(p, t_ref, b_ref, sh_ref, sw_ref, cout):
            # p: (rows, Win*Cin) f32, per-image H-padded; halo + trailing rows are zero.
            rz = p.shape[0] - 2
            # 3x3 conv (pad=1, stride=1) as 3 banded bf16 matmuls, f32 accumulation.
            z = jnp.dot(p[0:rz].astype(bf16), t_ref[0], preferred_element_type=f32)
            z = z + jnp.dot(p[1:rz + 1].astype(bf16), t_ref[1], preferred_element_type=f32)
            z = z + jnp.dot(p[2:rz + 2].astype(bf16), t_ref[2], preferred_element_type=f32)
            z = jnp.maximum(z + b_ref[...], 0.0)                     # bias + ReLU in f32
            zb = z.astype(bf16)
            # 2x2 max pool, H direction: two one-hot row-select dots + max.
            # (These dots also scatter into the next stage's padded / flatten layout.)
            zh = jnp.maximum(
                jnp.dot(sh_ref[0], zb, preferred_element_type=f32),
                jnp.dot(sh_ref[1], zb, preferred_element_type=f32))
            # 2x2 max pool, W direction: XLU lane roll + max + one even-group selector dot.
            lanes = zh.shape[1]
            zc = jnp.maximum(zh, pltpu.roll(zh, shift=lanes - cout, axis=1))
            return jnp.dot(zc.astype(bf16), sw_ref[...], preferred_element_type=f32)

        p = x_ref[0]                                                 # (bt*(H+2)+2, W*Cin) f32
        p = stage(p, t1_ref, b1_ref, sh1_ref, sw1_ref, c1)           # (bt*(H/2+2)+2, W/2*C1)
        p = stage(p, t2_ref, b2_ref, sh2_ref, sw2_ref, c2)           # (bt*(H/4+2)+2, W/4*C2)
        p = stage(p, t3_ref, b3_ref, sh3_ref, sw3_ref, c3)           # (h3*bt, W/8*C3), ho-major
        # Torch NCHW flatten via permutation dots with a real M = B_TILE dimension.
        out = jnp.dot(p[0:bt].astype(bf16), perm_ref[0], preferred_element_type=f32)
        for ho in range(1, h3):
            out = out + jnp.dot(p[ho * bt:(ho + 1) * bt].astype(bf16), perm_ref[ho],
                                preferred_element_type=f32)
        o_ref[...] = out                                             # aligned (8, F) store

    in_specs = [pl.BlockSpec((1, bt * (h + 2) + 2, w * cin), lambda i: (i, 0, 0))]
    in_specs += [_inv_spec(op.shape) for op in operands[1:]]

    out = pl.pallas_call(
        kernel,
        out_shape=jax.ShapeDtypeStruct((n_pad, feat), jnp.float32),
        grid_spec=pltpu.PrefetchScalarGridSpec(
            num_scalar_prefetch=0,
            grid=(n_blocks,),
            in_specs=in_specs,
            out_specs=pl.BlockSpec((bt, feat), lambda i: (i, 0)),
        ),
        compiler_params=pltpu.CompilerParams(
            dimension_semantics=("parallel",),      # batch-block axis -> 2 TCs on v7x
        ),
    )(*operands)
    return out[:n]


def get_output_size(state_dim, c3=64):
    _, h, w = state_dim
    return c3 * (h // 8) * (w // 8)


# ----------------------------------------------------------------------------
# Params, pure-JAX reference, and self-check
# ----------------------------------------------------------------------------

def init_params(key, state_dim, c1=16, c2=32, c3=64):
    """PyTorch-default-like uniform init; conv weights in HWIO layout."""
    in_ch, _, _ = state_dim
    ks = jax.random.split(key, 6)

    def conv_init(kw_, kb_, cin, cout):
        fan_in = cin * 3 * 3
        bound = 1.0 / np.sqrt(fan_in)
        wgt = jax.random.uniform(kw_, (3, 3, cin, cout), jnp.float32, -bound, bound)
        bias = jax.random.uniform(kb_, (1, cout), jnp.float32, -bound, bound)
        return wgt, bias

    return (
        conv_init(ks[0], ks[1], in_ch, c1),
        conv_init(ks[2], ks[3], c1, c2),
        conv_init(ks[4], ks[5], c2, c3),
    )


def ref_forward(x_nchw, params):
    """Pure-JAX/XLA reference for correctness checking."""
    x = jnp.transpose(x_nchw, (0, 2, 3, 1))
    for wgt, b in params:
        y = jax.lax.conv_general_dilated(
            x, wgt, window_strides=(1, 1), padding=((1, 1), (1, 1)),
            dimension_numbers=("NHWC", "HWIO", "NHWC"))
        y = jnp.maximum(y + b.reshape(1, 1, 1, -1), 0.0)
        x = jax.lax.reduce_window(y, -jnp.inf, jax.lax.max,
                                  (1, 2, 2, 1), (1, 2, 2, 1), "VALID")
    x = jnp.transpose(x, (0, 3, 1, 2))
    return x.reshape(x.shape[0], -1)


if __name__ == "__main__":
    key = jax.random.PRNGKey(0)
    kx, kp = jax.random.split(key)

    state_dim = (4, 16, 16)            # (C, H, W)
    batch = 2
    x = jax.random.normal(kx, (batch,) + state_dim, dtype=jnp.float32)
    params = init_params(kp, state_dim)

    out = jax.jit(cnn_feature_extractor)(x, params)
    out = jax.block_until_ready(out)

    # 16x16 -> 8 -> 4 -> 2 spatial, 64 channels => 64*2*2 = 256 features
    assert out.shape == (batch, get_output_size(state_dim)), out.shape

    ref = ref_forward(x, params)
    # bf16 MXU inputs with f32 accumulation -> slightly looser tolerance than pure f32.
    np.testing.assert_allclose(np.asarray(out), np.asarray(ref), rtol=5e-2, atol=5e-2)

    print("KERNEL_OK")
</pallas_src>

<mosaic_0001>
module attributes {stable_mosaic.version = 11 : i64} {
  func.func @kernel(%arg0: i32, %arg1: memref<1x146x64xf32, #tpu.memory_space<vmem>>, %arg2: memref<3x64x256xbf16, #tpu.memory_space<vmem>>, %arg3: memref<1x256xf32, #tpu.memory_space<vmem>>, %arg4: memref<2x82x144xbf16, #tpu.memory_space<vmem>>, %arg5: memref<256x128xbf16, #tpu.memory_space<vmem>>, %arg6: memref<3x128x256xbf16, #tpu.memory_space<vmem>>, %arg7: memref<1x256xf32, #tpu.memory_space<vmem>>, %arg8: memref<2x50x80xbf16, #tpu.memory_space<vmem>>, %arg9: memref<256x128xbf16, #tpu.memory_space<vmem>>, %arg10: memref<3x128x256xbf16, #tpu.memory_space<vmem>>, %arg11: memref<1x256xf32, #tpu.memory_space<vmem>>, %arg12: memref<2x16x48xbf16, #tpu.memory_space<vmem>>, %arg13: memref<256x128xbf16, #tpu.memory_space<vmem>>, %arg14: memref<2x128x256xbf16, #tpu.memory_space<vmem>>, %arg15: memref<8x256xf32, #tpu.memory_space<vmem>>) attributes {dimension_semantics = [#tpu.dimension_semantics<parallel>], iteration_bounds = array<i64: 1>, scalar_prefetch = 0 : i64, scratch_operands = 0 : i64, tpu.core_type = #tpu.core_type<tc>, window_params = [{transform_indices = @transform_0, window_bounds = array<i64: 1, 146, 64>}, {pipeline_mode = #tpu.pipeline_mode<synchronous>, transform_indices = @transform_1, window_bounds = array<i64: 3, 64, 256>}, {pipeline_mode = #tpu.pipeline_mode<synchronous>, transform_indices = @transform_2, window_bounds = array<i64: 1, 256>}, {pipeline_mode = #tpu.pipeline_mode<synchronous>, transform_indices = @transform_3, window_bounds = array<i64: 2, 82, 144>}, {pipeline_mode = #tpu.pipeline_mode<synchronous>, transform_indices = @transform_4, window_bounds = array<i64: 256, 128>}, {pipeline_mode = #tpu.pipeline_mode<synchronous>, transform_indices = @transform_5, window_bounds = array<i64: 3, 128, 256>}, {pipeline_mode = #tpu.pipeline_mode<synchronous>, transform_indices = @transform_6, window_bounds = array<i64: 1, 256>}, {pipeline_mode = #tpu.pipeline_mode<synchronous>, transform_indices = @transform_7, window_bounds = array<i64: 2, 50, 80>}, {pipeline_mode = #tpu.pipeline_mode<synchronous>, transform_indices = @transform_8, window_bounds = array<i64: 256, 128>}, {pipeline_mode = #tpu.pipeline_mode<synchronous>, transform_indices = @transform_9, window_bounds = array<i64: 3, 128, 256>}, {pipeline_mode = #tpu.pipeline_mode<synchronous>, transform_indices = @transform_10, window_bounds = array<i64: 1, 256>}, {pipeline_mode = #tpu.pipeline_mode<synchronous>, transform_indices = @transform_11, window_bounds = array<i64: 2, 16, 48>}, {pipeline_mode = #tpu.pipeline_mode<synchronous>, transform_indices = @transform_12, window_bounds = array<i64: 256, 128>}, {pipeline_mode = #tpu.pipeline_mode<synchronous>, transform_indices = @transform_13, window_bounds = array<i64: 2, 128, 256>}, {transform_indices = @transform_14, window_bounds = array<i64: 8, 256>}]} {
    %c0 = arith.constant 0 : index
    %c0_0 = arith.constant 0 : index
    %c0_1 = arith.constant 0 : index
    %0 = vector.load %arg1[%c0, %c0_0, %c0_1] : memref<1x146x64xf32, #tpu.memory_space<vmem>>, vector<1x146x64xf32>
    %1 = vector.shape_cast %0 : vector<1x146x64xf32> to vector<146x64xf32>
    %2 = vector.extract_strided_slice %1 {offsets = [0, 0], sizes = [144, 64], strides = [1, 1]} : vector<146x64xf32> to vector<144x64xf32>
    %3 = arith.truncf %2 : vector<144x64xf32> to vector<144x64xbf16>
    %c0_2 = arith.constant 0 : index
    %c0_3 = arith.constant 0 : index
    %c0_4 = arith.constant 0 : index
    %4 = vector.load %arg2[%c0_2, %c0_3, %c0_4] : memref<3x64x256xbf16, #tpu.memory_space<vmem>>, vector<1x64x256xbf16>
    %5 = vector.shape_cast %4 : vector<1x64x256xbf16> to vector<64x256xbf16>
    %cst = arith.constant dense<0.000000e+00> : vector<144x256xf32>
    %6 = tpu.matmul %3, %5, %cst {dimension_numbers = #tpu.dot_dimension_numbers<[1], [0], [0], [1], [0, 0, 1, 1], [], []>} : vector<144x64xbf16>, vector<64x256xbf16>, vector<144x256xf32> -> vector<144x256xf32>
    %7 = vector.extract_strided_slice %1 {offsets = [1, 0], sizes = [144, 64], strides = [1, 1]} : vector<146x64xf32> to vector<144x64xf32>
    %8 = arith.truncf %7 : vector<144x64xf32> to vector<144x64xbf16>
    %c1 = arith.constant 1 : index
    %c0_5 = arith.constant 0 : index
    %c0_6 = arith.constant 0 : index
    %9 = vector.load %arg2[%c1, %c0_5, %c0_6] : memref<3x64x256xbf16, #tpu.memory_space<vmem>>, vector<1x64x256xbf16>
    %10 = vector.shape_cast %9 : vector<1x64x256xbf16> to vector<64x256xbf16>
    %cst_7 = arith.constant dense<0.000000e+00> : vector<144x256xf32>
    %11 = tpu.matmul %8, %10, %cst_7 {dimension_numbers = #tpu.dot_dimension_numbers<[1], [0], [0], [1], [0, 0, 1, 1], [], []>} : vector<144x64xbf16>, vector<64x256xbf16>, vector<144x256xf32> -> vector<144x256xf32>
    %12 = arith.addf %6, %11 : vector<144x256xf32>
    %13 = vector.extract_strided_slice %1 {offsets = [2, 0], sizes = [144, 64], strides = [1, 1]} : vector<146x64xf32> to vector<144x64xf32>
    %14 = arith.truncf %13 : vector<144x64xf32> to vector<144x64xbf16>
    %c2 = arith.constant 2 : index
    %c0_8 = arith.constant 0 : index
    %c0_9 = arith.constant 0 : index
    %15 = vector.load %arg2[%c2, %c0_8, %c0_9] : memref<3x64x256xbf16, #tpu.memory_space<vmem>>, vector<1x64x256xbf16>
    %16 = vector.shape_cast %15 : vector<1x64x256xbf16> to vector<64x256xbf16>
    %cst_10 = arith.constant dense<0.000000e+00> : vector<144x256xf32>
    %17 = tpu.matmul %14, %16, %cst_10 {dimension_numbers = #tpu.dot_dimension_numbers<[1], [0], [0], [1], [0, 0, 1, 1], [], []>} : vector<144x64xbf16>, vector<64x256xbf16>, vector<144x256xf32> -> vector<144x256xf32>
    %18 = arith.addf %12, %17 : vector<144x256xf32>
    %c0_11 = arith.constant 0 : index
    %c0_12 = arith.constant 0 : index
    %19 = vector.load %arg3[%c0_11, %c0_12] : memref<1x256xf32, #tpu.memory_space<vmem>>, vector<1x256xf32>
    %20 = vector.broadcast %19 : vector<1x256xf32> to vector<144x256xf32>
    %21 = arith.addf %18, %20 : vector<144x256xf32>
    %cst_13 = arith.constant 0.000000e+00 : f32
    %22 = vector.broadcast %cst_13 : f32 to vector<144x256xf32>
    %23 = arith.maximumf %21, %22 : vector<144x256xf32>
    %24 = arith.truncf %23 : vector<144x256xf32> to vector<144x256xbf16>
    %c0_14 = arith.constant 0 : index
    %c0_15 = arith.constant 0 : index
    %c0_16 = arith.constant 0 : index
    %25 = vector.load %arg4[%c0_14, %c0_15, %c0_16] : memref<2x82x144xbf16, #tpu.memory_space<vmem>>, vector<1x82x144xbf16>
    %26 = vector.shape_cast %25 : vector<1x82x144xbf16> to vector<82x144xbf16>
    %cst_17 = arith.constant dense<0.000000e+00> : vector<82x256xf32>
    %27 = tpu.matmul %26, %24, %cst_17 {dimension_numbers = #tpu.dot_dimension_numbers<[1], [0], [0], [1], [0, 0, 1, 1], [], []>} : vector<82x144xbf16>, vector<144x256xbf16>, vector<82x256xf32> -> vector<82x256xf32>
    %c1_18 = arith.constant 1 : index
    %c0_19 = arith.constant 0 : index
    %c0_20 = arith.constant 0 : index
    %28 = vector.load %arg4[%c1_18, %c0_19, %c0_20] : memref<2x82x144xbf16, #tpu.memory_space<vmem>>, vector<1x82x144xbf16>
    %29 = vector.shape_cast %28 : vector<1x82x144xbf16> to vector<82x144xbf16>
    %cst_21 = arith.constant dense<0.000000e+00> : vector<82x256xf32>
    %30 = tpu.matmul %29, %24, %cst_21 {dimension_numbers = #tpu.dot_dimension_numbers<[1], [0], [0], [1], [0, 0, 1, 1], [], []>} : vector<82x144xbf16>, vector<144x256xbf16>, vector<82x256xf32> -> vector<82x256xf32>
    %31 = arith.maximumf %27, %30 : vector<82x256xf32>
    %c240_i32 = arith.constant 240 : i32
    %32 = tpu.dynamic_rotate %31 by %c240_i32 dim 1 : vector<82x256xf32>, i32 -> vector<82x256xf32>
    %33 = arith.maximumf %31, %32 : vector<82x256xf32>
    %34 = arith.truncf %33 : vector<82x256xf32> to vector<82x256xbf16>
    %c0_22 = arith.constant 0 : index
    %c0_23 = arith.constant 0 : index
    %35 = vector.load %arg5[%c0_22, %c0_23] : memref<256x128xbf16, #tpu.memory_space<vmem>>, vector<256x128xbf16>
    %cst_24 = arith.constant dense<0.000000e+00> : vector<82x128xf32>
    %36 = tpu.matmul %34, %35, %cst_24 {dimension_numbers = #tpu.dot_dimension_numbers<[1], [0], [0], [1], [0, 0, 1, 1], [], []>} : vector<82x256xbf16>, vector<256x128xbf16>, vector<82x128xf32> -> vector<82x128xf32>
    %37 = vector.extract_strided_slice %36 {offsets = [0, 0], sizes = [80, 128], strides = [1, 1]} : vector<82x128xf32> to vector<80x128xf32>
    %38 = arith.truncf %37 : vector<80x128xf32> to vector<80x128xbf16>
    %c0_25 = arith.constant 0 : index
    %c0_26 = arith.constant 0 : index
    %c0_27 = arith.constant 0 : index
    %39 = vector.load %arg6[%c0_25, %c0_26, %c0_27] : memref<3x128x256xbf16, #tpu.memory_space<vmem>>, vector<1x128x256xbf16>
    %40 = vector.shape_cast %39 : vector<1x128x256xbf16> to vector<128x256xbf16>
    %cst_28 = arith.constant dense<0.000000e+00> : vector<80x256xf32>
    %41 = tpu.matmul %38, %40, %cst_28 {dimension_numbers = #tpu.dot_dimension_numbers<[1], [0], [0], [1], [0, 0, 1, 1], [], []>} : vector<80x128xbf16>, vector<128x256xbf16>, vector<80x256xf32> -> vector<80x256xf32>
    %42 = vector.extract_strided_slice %36 {offsets = [1, 0], sizes = [80, 128], strides = [1, 1]} : vector<82x128xf32> to vector<80x128xf32>
    %43 = arith.truncf %42 : vector<80x128xf32> to vector<80x128xbf16>
    %c1_29 = arith.constant 1 : index
    %c0_30 = arith.constant 0 : index
    %c0_31 = arith.constant 0 : index
    %44 = vector.load %arg6[%c1_29, %c0_30, %c0_31] : memref<3x128x256xbf16, #tpu.memory_space<vmem>>, vector<1x128x256xbf16>
    %45 = vector.shape_cast %44 : vector<1x128x256xbf16> to vector<128x256xbf16>
    %cst_32 = arith.constant dense<0.000000e+00> : vector<80x256xf32>
    %46 = tpu.matmul %43, %45, %cst_32 {dimension_numbers = #tpu.dot_dimension_numbers<[1], [0], [0], [1], [0, 0, 1, 1], [], []>} : vector<80x128xbf16>, vector<128x256xbf16>, vector<80x256xf32> -> vector<80x256xf32>
    %47 = arith.addf %41, %46 : vector<80x256xf32>
    %48 = vector.extract_strided_slice %36 {offsets = [2, 0], sizes = [80, 128], strides = [1, 1]} : vector<82x128xf32> to vector<80x128xf32>
    %49 = arith.truncf %48 : vector<80x128xf32> to vector<80x128xbf16>
    %c2_33 = arith.constant 2 : index
    %c0_34 = arith.constant 0 : index
    %c0_35 = arith.constant 0 : index
    %50 = vector.load %arg6[%c2_33, %c0_34, %c0_35] : memref<3x128x256xbf16, #tpu.memory_space<vmem>>, vector<1x128x256xbf16>
    %51 = vector.shape_cast %50 : vector<1x128x256xbf16> to vector<128x256xbf16>
    %cst_36 = arith.constant dense<0.000000e+00> : vector<80x256xf32>
    %52 = tpu.matmul %49, %51, %cst_36 {dimension_numbers = #tpu.dot_dimension_numbers<[1], [0], [0], [1], [0, 0, 1, 1], [], []>} : vector<80x128xbf16>, vector<128x256xbf16>, vector<80x256xf32> -> vector<80x256xf32>
    %53 = arith.addf %47, %52 : vector<80x256xf32>
    %c0_37 = arith.constant 0 : index
    %c0_38 = arith.constant 0 : index
    %54 = vector.load %arg7[%c0_37, %c0_38] : memref<1x256xf32, #tpu.memory_space<vmem>>, vector<1x256xf32>
    %55 = vector.broadcast %54 : vector<1x256xf32> to vector<80x256xf32>
    %56 = arith.addf %53, %55 : vector<80x256xf32>
    %cst_39 = arith.constant 0.000000e+00 : f32
    %57 = vector.broadcast %cst_39 : f32 to vector<80x256xf32>
    %58 = arith.maximumf %56, %57 : vector<80x256xf32>
    %59 = arith.truncf %58 : vector<80x256xf32> to vector<80x256xbf16>
    %c0_40 = arith.constant 0 : index
    %c0_41 = arith.constant 0 : index
    %c0_42 = arith.constant 0 : index
    %60 = vector.load %arg8[%c0_40, %c0_41, %c0_42] : memref<2x50x80xbf16, #tpu.memory_space<vmem>>, vector<1x50x80xbf16>
    %61 = vector.shape_cast %60 : vector<1x50x80xbf16> to vector<50x80xbf16>
    %cst_43 = arith.constant dense<0.000000e+00> : vector<50x256xf32>
    %62 = tpu.matmul %61, %59, %cst_43 {dimension_numbers = #tpu.dot_dimension_numbers<[1], [0], [0], [1], [0, 0, 1, 1], [], []>} : vector<50x80xbf16>, vector<80x256xbf16>, vector<50x256xf32> -> vector<50x256xf32>
    %c1_44 = arith.constant 1 : index
    %c0_45 = arith.constant 0 : index
    %c0_46 = arith.constant 0 : index
    %63 = vector.load %arg8[%c1_44, %c0_45, %c0_46] : memref<2x50x80xbf16, #tpu.memory_space<vmem>>, vector<1x50x80xbf16>
    %64 = vector.shape_cast %63 : vector<1x50x80xbf16> to vector<50x80xbf16>
    %cst_47 = arith.constant dense<0.000000e+00> : vector<50x256xf32>
    %65 = tpu.matmul %64, %59, %cst_47 {dimension_numbers = #tpu.dot_dimension_numbers<[1], [0], [0], [1], [0, 0, 1, 1], [], []>} : vector<50x80xbf16>, vector<80x256xbf16>, vector<50x256xf32> -> vector<50x256xf32>
    %66 = arith.maximumf %62, %65 : vector<50x256xf32>
    %c224_i32 = arith.constant 224 : i32
    %67 = tpu.dynamic_rotate %66 by %c224_i32 dim 1 : vector<50x256xf32>, i32 -> vector<50x256xf32>
    %68 = arith.maximumf %66, %67 : vector<50x256xf32>
    %69 = arith.truncf %68 : vector<50x256xf32> to vector<50x256xbf16>
    %c0_48 = arith.constant 0 : index
    %c0_49 = arith.constant 0 : index
    %70 = vector.load %arg9[%c0_48, %c0_49] : memref<256x128xbf16, #tpu.memory_space<vmem>>, vector<256x128xbf16>
    %cst_50 = arith.constant dense<0.000000e+00> : vector<50x128xf32>
    %71 = tpu.matmul %69, %70, %cst_50 {dimension_numbers = #tpu.dot_dimension_numbers<[1], [0], [0], [1], [0, 0, 1, 1], [], []>} : vector<50x256xbf16>, vector<256x128xbf16>, vector<50x128xf32> -> vector<50x128xf32>
    %72 = vector.extract_strided_slice %71 {offsets = [0, 0], sizes = [48, 128], strides = [1, 1]} : vector<50x128xf32> to vector<48x128xf32>
    %73 = arith.truncf %72 : vector<48x128xf32> to vector<48x128xbf16>
    %c0_51 = arith.constant 0 : index
    %c0_52 = arith.constant 0 : index
    %c0_53 = arith.constant 0 : index
    %74 = vector.load %arg10[%c0_51, %c0_52, %c0_53] : memref<3x128x256xbf16, #tpu.memory_space<vmem>>, vector<1x128x256xbf16>
    %75 = vector.shape_cast %74 : vector<1x128x256xbf16> to vector<128x256xbf16>
    %cst_54 = arith.constant dense<0.000000e+00> : vector<48x256xf32>
    %76 = tpu.matmul %73, %75, %cst_54 {dimension_numbers = #tpu.dot_dimension_numbers<[1], [0], [0], [1], [0, 0, 1, 1], [], []>} : vector<48x128xbf16>, vector<128x256xbf16>, vector<48x256xf32> -> vector<48x256xf32>
    %77 = vector.extract_strided_slice %71 {offsets = [1, 0], sizes = [48, 128], strides = [1, 1]} : vector<50x128xf32> to vector<48x128xf32>
    %78 = arith.truncf %77 : vector<48x128xf32> to vector<48x128xbf16>
    %c1_55 = arith.constant 1 : index
    %c0_56 = arith.constant 0 : index
    %c0_57 = arith.constant 0 : index
    %79 = vector.load %arg10[%c1_55, %c0_56, %c0_57] : memref<3x128x256xbf16, #tpu.memory_space<vmem>>, vector<1x128x256xbf16>
    %80 = vector.shape_cast %79 : vector<1x128x256xbf16> to vector<128x256xbf16>
    %cst_58 = arith.constant dense<0.000000e+00> : vector<48x256xf32>
    %81 = tpu.matmul %78, %80, %cst_58 {dimension_numbers = #tpu.dot_dimension_numbers<[1], [0], [0], [1], [0, 0, 1, 1], [], []>} : vector<48x128xbf16>, vector<128x256xbf16>, vector<48x256xf32> -> vector<48x256xf32>
    %82 = arith.addf %76, %81 : vector<48x256xf32>
    %83 = vector.extract_strided_slice %71 {offsets = [2, 0], sizes = [48, 128], strides = [1, 1]} : vector<50x128xf32> to vector<48x128xf32>
    %84 = arith.truncf %83 : vector<48x128xf32> to vector<48x128xbf16>
    %c2_59 = arith.constant 2 : index
    %c0_60 = arith.constant 0 : index
    %c0_61 = arith.constant 0 : index
    %85 = vector.load %arg10[%c2_59, %c0_60, %c0_61] : memref<3x128x256xbf16, #tpu.memory_space<vmem>>, vector<1x128x256xbf16>
    %86 = vector.shape_cast %85 : vector<1x128x256xbf16> to vector<128x256xbf16>
    %cst_62 = arith.constant dense<0.000000e+00> : vector<48x256xf32>
    %87 = tpu.matmul %84, %86, %cst_62 {dimension_numbers = #tpu.dot_dimension_numbers<[1], [0], [0], [1], [0, 0, 1, 1], [], []>} : vector<48x128xbf16>, vector<128x256xbf16>, vector<48x256xf32> -> vector<48x256xf32>
    %88 = arith.addf %82, %87 : vector<48x256xf32>
    %c0_63 = arith.constant 0 : index
    %c0_64 = arith.constant 0 : index
    %89 = vector.load %arg11[%c0_63, %c0_64] : memref<1x256xf32, #tpu.memory_space<vmem>>, vector<1x256xf32>
    %90 = vector.broadcast %89 : vector<1x256xf32> to vector<48x256xf32>
    %91 = arith.addf %88, %90 : vector<48x256xf32>
    %cst_65 = arith.constant 0.000000e+00 : f32
    %92 = vector.broadcast %cst_65 : f32 to vector<48x256xf32>
    %93 = arith.maximumf %91, %92 : vector<48x256xf32>
    %94 = arith.truncf %93 : vector<48x256xf32> to vector<48x256xbf16>
    %c0_66 = arith.constant 0 : index
    %c0_67 = arith.constant 0 : index
    %c0_68 = arith.constant 0 : index
    %95 = vector.load %arg12[%c0_66, %c0_67, %c0_68] : memref<2x16x48xbf16, #tpu.memory_space<vmem>>, vector<1x16x48xbf16>
    %96 = vector.shape_cast %95 : vector<1x16x48xbf16> to vector<16x48xbf16>
    %cst_69 = arith.constant dense<0.000000e+00> : vector<16x256xf32>
    %97 = tpu.matmul %96, %94, %cst_69 {dimension_numbers = #tpu.dot_dimension_numbers<[1], [0], [0], [1], [0, 0, 1, 1], [], []>} : vector<16x48xbf16>, vector<48x256xbf16>, vector<16x256xf32> -> vector<16x256xf32>
    %c1_70 = arith.constant 1 : index
    %c0_71 = arith.constant 0 : index
    %c0_72 = arith.constant 0 : index
    %98 = vector.load %arg12[%c1_70, %c0_71, %c0_72] : memref<2x16x48xbf16, #tpu.memory_space<vmem>>, vector<1x16x48xbf16>
    %99 = vector.shape_cast %98 : vector<1x16x48xbf16> to vector<16x48xbf16>
    %cst_73 = arith.constant dense<0.000000e+00> : vector<16x256xf32>
    %100 = tpu.matmul %99, %94, %cst_73 {dimension_numbers = #tpu.dot_dimension_numbers<[1], [0], [0], [1], [0, 0, 1, 1], [], []>} : vector<16x48xbf16>, vector<48x256xbf16>, vector<16x256xf32> -> vector<16x256xf32>
    %101 = arith.maximumf %97, %100 : vector<16x256xf32>
    %c192_i32 = arith.constant 192 : i32
    %102 = tpu.dynamic_rotate %101 by %c192_i32 dim 1 : vector<16x256xf32>, i32 -> vector<16x256xf32>
    %103 = arith.maximumf %101, %102 : vector<16x256xf32>
    %104 = arith.truncf %103 : vector<16x256xf32> to vector<16x256xbf16>
    %c0_74 = arith.constant 0 : index
    %c0_75 = arith.constant 0 : index
    %105 = vector.load %arg13[%c0_74, %c0_75] : memref<256x128xbf16, #tpu.memory_space<vmem>>, vector<256x128xbf16>
    %cst_76 = arith.constant dense<0.000000e+00> : vector<16x128xf32>
    %106 = tpu.matmul %104, %105, %cst_76 {dimension_numbers = #tpu.dot_dimension_numbers<[1], [0], [0], [1], [0, 0, 1, 1], [], []>} : vector<16x256xbf16>, vector<256x128xbf16>, vector<16x128xf32> -> vector<16x128xf32>
    %107 = vector.extract_strided_slice %106 {offsets = [0, 0], sizes = [8, 128], strides = [1, 1]} : vector<16x128xf32> to vector<8x128xf32>
    %108 = arith.truncf %107 : vector<8x128xf32> to vector<8x128xbf16>
    %c0_77 = arith.constant 0 : index
    %c0_78 = arith.constant 0 : index
    %c0_79 = arith.constant 0 : index
    %109 = vector.load %arg14[%c0_77, %c0_78, %c0_79] : memref<2x128x256xbf16, #tpu.memory_space<vmem>>, vector<1x128x256xbf16>
    %110 = vector.shape_cast %109 : vector<1x128x256xbf16> to vector<128x256xbf16>
    %cst_80 = arith.constant dense<0.000000e+00> : vector<8x256xf32>
    %111 = tpu.matmul %108, %110, %cst_80 {dimension_numbers = #tpu.dot_dimension_numbers<[1], [0], [0], [1], [0, 0, 1, 1], [], []>} : vector<8x128xbf16>, vector<128x256xbf16>, vector<8x256xf32> -> vector<8x256xf32>
    %112 = vector.extract_strided_slice %106 {offsets = [8, 0], sizes = [8, 128], strides = [1, 1]} : vector<16x128xf32> to vector<8x128xf32>
    %113 = arith.truncf %112 : vector<8x128xf32> to vector<8x128xbf16>
    %c1_81 = arith.constant 1 : index
    %c0_82 = arith.constant 0 : index
    %c0_83 = arith.constant 0 : index
    %114 = vector.load %arg14[%c1_81, %c0_82, %c0_83] : memref<2x128x256xbf16, #tpu.memory_space<vmem>>, vector<1x128x256xbf16>
    %115 = vector.shape_cast %114 : vector<1x128x256xbf16> to vector<128x256xbf16>
    %cst_84 = arith.constant dense<0.000000e+00> : vector<8x256xf32>
    %116 = tpu.matmul %113, %115, %cst_84 {dimension_numbers = #tpu.dot_dimension_numbers<[1], [0], [0], [1], [0, 0, 1, 1], [], []>} : vector<8x128xbf16>, vector<128x256xbf16>, vector<8x256xf32> -> vector<8x256xf32>
    %117 = arith.addf %111, %116 : vector<8x256xf32>
    %c0_85 = arith.constant 0 : index
    %c0_86 = arith.constant 0 : index
    %118 = vector.load %arg15[%c0_85, %c0_86] : memref<8x256xf32, #tpu.memory_space<vmem>>, vector<8x256xf32>
    tpu.vector_store %arg15[%c0_85, %c0_86], %117 {strides = array<i32>} : memref<8x256xf32, #tpu.memory_space<vmem>>, vector<8x256xf32>,
    return
  }
  func.func @transform_0(%arg0: i32) -> (i32, i32, i32) {
    %c0_i32 = arith.constant 0 : i32
    %c0_i32_0 = arith.constant 0 : i32
    %c0_i32_1 = arith.constant 0 : i32
    return %arg0, %c0_i32, %c0_i32_0 : i32, i32, i32
  }
  func.func @transform_1(%arg0: i32) -> (i32, i32, i32) {
    %c0_i32 = arith.constant 0 : i32
    %c0_i32_0 = arith.constant 0 : i32
    %c0_i32_1 = arith.constant 0 : i32
    %c0_i32_2 = arith.constant 0 : i32
    return %c0_i32, %c0_i32_0, %c0_i32_1 : i32, i32, i32
  }
  func.func @transform_2(%arg0: i32) -> (i32, i32) {
    %c0_i32 = arith.constant 0 : i32
    %c0_i32_0 = arith.constant 0 : i32
    %c0_i32_1 = arith.constant 0 : i32
    return %c0_i32, %c0_i32_0 : i32, i32
  }
  func.func @transform_3(%arg0: i32) -> (i32, i32, i32) {
    %c0_i32 = arith.constant 0 : i32
    %c0_i32_0 = arith.constant 0 : i32
    %c0_i32_1 = arith.constant 0 : i32
    %c0_i32_2 = arith.constant 0 : i32
    return %c0_i32, %c0_i32_0, %c0_i32_1 : i32, i32, i32
  }
  func.func @transform_4(%arg0: i32) -> (i32, i32) {
    %c0_i32 = arith.constant 0 : i32
    %c0_i32_0 = arith.constant 0 : i32
    %c0_i32_1 = arith.constant 0 : i32
    return %c0_i32, %c0_i32_0 : i32, i32
  }
  func.func @transform_5(%arg0: i32) -> (i32, i32, i32) {
    %c0_i32 = arith.constant 0 : i32
    %c0_i32_0 = arith.constant 0 : i32
    %c0_i32_1 = arith.constant 0 : i32
    %c0_i32_2 = arith.constant 0 : i32
    return %c0_i32, %c0_i32_0, %c0_i32_1 : i32, i32, i32
  }
  func.func @transform_6(%arg0: i32) -> (i32, i32) {
    %c0_i32 = arith.constant 0 : i32
    %c0_i32_0 = arith.constant 0 : i32
    %c0_i32_1 = arith.constant 0 : i32
    return %c0_i32, %c0_i32_0 : i32, i32
  }
  func.func @transform_7(%arg0: i32) -> (i32, i32, i32) {
    %c0_i32 = arith.constant 0 : i32
    %c0_i32_0 = arith.constant 0 : i32
    %c0_i32_1 = arith.constant 0 : i32
    %c0_i32_2 = arith.constant 0 : i32
    return %c0_i32, %c0_i32_0, %c0_i32_1 : i32, i32, i32
  }
  func.func @transform_8(%arg0: i32) -> (i32, i32) {
    %c0_i32 = arith.constant 0 : i32
    %c0_i32_0 = arith.constant 0 : i32
    %c0_i32_1 = arith.constant 0 : i32
    return %c0_i32, %c0_i32_0 : i32, i32
  }
  func.func @transform_9(%arg0: i32) -> (i32, i32, i32) {
    %c0_i32 = arith.constant 0 : i32
    %c0_i32_0 = arith.constant 0 : i32
    %c0_i32_1 = arith.constant 0 : i32
    %c0_i32_2 = arith.constant 0 : i32
    return %c0_i32, %c0_i32_0, %c0_i32_1 : i32, i32, i32
  }
  func.func @transform_10(%arg0: i32) -> (i32, i32) {
    %c0_i32 = arith.constant 0 : i32
    %c0_i32_0 = arith.constant 0 : i32
    %c0_i32_1 = arith.constant 0 : i32
    return %c0_i32, %c0_i32_0 : i32, i32
  }
  func.func @transform_11(%arg0: i32) -> (i32, i32, i32) {
    %c0_i32 = arith.constant 0 : i32
    %c0_i32_0 = arith.constant 0 : i32
    %c0_i32_1 = arith.constant 0 : i32
    %c0_i32_2 = arith.constant 0 : i32
    return %c0_i32, %c0_i32_0, %c0_i32_1 : i32, i32, i32
  }
  func.func @transform_12(%arg0: i32) -> (i32, i32) {
    %c0_i32 = arith.constant 0 : i32
    %c0_i32_0 = arith.constant 0 : i32
    %c0_i32_1 = arith.constant 0 : i32
    return %c0_i32, %c0_i32_0 : i32, i32
  }
  func.func @transform_13(%arg0: i32) -> (i32, i32, i32) {
    %c0_i32 = arith.constant 0 : i32
    %c0_i32_0 = arith.constant 0 : i32
    %c0_i32_1 = arith.constant 0 : i32
    %c0_i32_2 = arith.constant 0 : i32
    return %c0_i32, %c0_i32_0, %c0_i32_1 : i32, i32, i32
  }
  func.func @transform_14(%arg0: i32) -> (i32, i32) {
    %c0_i32 = arith.constant 0 : i32
    %c0_i32_0 = arith.constant 0 : i32
    return %arg0, %c0_i32 : i32, i32
  }
}

</mosaic_0001>

<bundles_post_ra>
// kernel: cnn_feature_extractor.1
= control target key start
LH: loop header
LB: loop body
LE: loop exit
PB: predicated region body
PF: predicated region fallthrough
CT: control target
= control target key end

     0   :  { %vm94_vm0 = vsmask.f32 7424  ;;  %vm211_vm1 = vcmask 523264   ;;  %vm532_vm2 = vcmask 1046528   ;;  %vm921_vm3 = vcmask 130048   ;;  %s7538_s1 = inlined_call_operand.vmem [shape: bf16[3,64,256], index: 1, kind: input, shape index: {}]   ;;  %s7539_s0 = inlined_call_operand.vmem [shape: f32[1,146,64], index: 0, kind: input, shape index: {}]   ;;  %s7540_s2 = inlined_call_operand.vmem [shape: f32[1,256], index: 2, kind: input, shape index: {}]   ;;  %s7541_s3 = inlined_call_operand.vmem [shape: bf16[2,82,144], index: 3, kind: input, shape index: {}]   ;;  %s7542_s4 = inlined_call_operand.vmem [shape: bf16[256,128], index: 4, kind: input, shape index: {}]   ;;  %s7543_s5 = inlined_call_operand.vmem [shape: bf16[3,128,256], index: 5, kind: input, shape index: {}]   ;;  %s7544_s6 = inlined_call_operand.vmem [shape: f32[1,256], index: 6, kind: input, shape index: {}]   ;;  %s7545_s7 = inlined_call_operand.vmem [shape: bf16[2,50,80], index: 7, kind: input, shape index: {}]   ;;  %s7546_s8 = inlined_call_operand.vmem [shape: bf16[256,128], index: 8, kind: input, shape index: {}]   ;;  %s7547_s9 = inlined_call_operand.vmem [shape: bf16[3,128,256], index: 9, kind: input, shape index: {}]   ;;  %s7548_s10 = inlined_call_operand.vmem [shape: f32[1,256], index: 10, kind: input, shape index: {}]   ;;  %s7549_s11 = inlined_call_operand.vmem [shape: bf16[2,16,48], index: 11, kind: input, shape index: {}]   ;;  %s7550_s12 = inlined_call_operand.vmem [shape: bf16[256,128], index: 12, kind: input, shape index: {}]   ;;  %s7551_s13 = inlined_call_operand.vmem [shape: bf16[2,128,256], index: 13, kind: input, shape index: {}]   ;;  %s7552_s14 = inlined_call_operand.vmem [shape: f32[8,256], index: 14, kind: output, shape index: {}]  }
   0x1   :  { %v3827_v0 = vld [vmem:[%s7538_s1 + $0x70] sm:$0xf]  ;;  %v4934_v1 = vld [vmem:[%s7538_s1 + $0x74] sm:$0xf0]  ;;  %v4933_v2 = vld [vmem:[%s7538_s1 + $0x74] sm:$0xf] }
   0x2   :  { %v3828_v3 = vor.u32 %v4934_v1, %v3827_v0  ;;  %v3829_v4 = vld [vmem:[%s7538_s1 + $0x78] sm:$0xf0]  ;;  %v3877_v5 = vld [vmem:[%s7538_s1 + $0x30] sm:$0xf]  ;;  %v4926_v6 = vld [vmem:[%s7538_s1 + $0x34] sm:$0xf0] }
   0x3   :  { %v3832_v7 = vor.u32 %v4933_v2, %v3829_v4  ;;  %v3878_v8 = vor.u32 %v4926_v6, %v3877_v5  ;;  %v3819_v9 = vld [vmem:[%s7538_s1 + $0x60] sm:$0xf]  ;;  %v4932_v10 = vld [vmem:[%s7538_s1 + $0x64] sm:$0xf0]  ;;  %v4931_v11 = vld [vmem:[%s7538_s1 + $0x64] sm:$0xf] }
   0x4   :  { %243 = vmatpush.bf16.msra.mxu0 %v3828_v3  ;;  %v3820_v12 = vor.u32 %v4932_v10, %v3819_v9  ;;  %v3821_v13 = vld [vmem:[%s7538_s1 + $0x68] sm:$0xf0]  ;;  %v3869_v14 = vld [vmem:[%s7538_s1 + $0x20] sm:$0xf]  ;;  %v4924_v15 = vld [vmem:[%s7538_s1 + $0x24] sm:$0xf0] }
   0x5   :  { %297 = vmatpush.bf16.msra.mxu1 %v3832_v7  ;;  %409 = vmatpush.bf16.msra.mxu2 %v3878_v8  ;;  %v3824_v16 = vor.u32 %v4931_v11, %v3821_v13  ;;  %v3870_v17 = vor.u32 %v4924_v15, %v3869_v14  ;;  %v3811_v18 = vld [vmem:[%s7538_s1 + $0x50] sm:$0xf]  ;;  %v4930_v19 = vld [vmem:[%s7538_s1 + $0x54] sm:$0xf0]  ;;  %v4929_v20 = vld [vmem:[%s7538_s1 + $0x54] sm:$0xf] }
   0x6   :  { %v3813_v21 = vld [vmem:[%s7538_s1 + $0x58] sm:$0xf0]  ;;  %v3861_v22 = vld [vmem:[%s7538_s1 + $0x10] sm:$0xf]  ;;  %v4922_v23 = vld [vmem:[%s7538_s1 + $0x14] sm:$0xf0]  ;;  %v3812_v25 = vor.u32 %v4930_v19, %v3811_v18 }
   0x7   :  { %v3803_v24 = vld [vmem:[%s7538_s1 + $0x40] sm:$0xf]  ;;  %v4928_v26 = vld [vmem:[%s7538_s1 + $0x44] sm:$0xf0]  ;;  %v4927_v27 = vld [vmem:[%s7538_s1 + $0x44] sm:$0xf]  ;;  %v3816_v29 = vor.u32 %v4929_v20, %v3813_v21  ;;  %v3862_v30 = vor.u32 %v4922_v23, %v3861_v22 }
   0x8   :  { %244 = vmatpush.bf16.msra.mxu0 %v3820_v12  ;;  %v3805_v28 = vld [vmem:[%s7538_s1 + $0x48] sm:$0xf0]  ;;  %v48_v31 = vld [vmem:[%s7539_s0] sm:$0xff]  ;;  %v50_v33 = vld [vmem:[%s7539_s0 + $0x10] sm:$0xff]  ;;  %v3804_v39 = vor.u32 %v4928_v26, %v3803_v24  ;;  %vm2326_vm5 = vcmask 654336   ;;  %vm3290_vm7 = vcmask 392192  }
   0x9   :  { %298 = vmatpush.bf16.msra.mxu1 %v3824_v16  ;;  %410 = vmatpush.bf16.msra.mxu2 %v3870_v17  ;;  %v49_v32 = vld [vmem:[%s7539_s0 + $0x8] sm:$0xff]  ;;  %v3853_v34 = vld [vmem:[%s7538_s1] sm:$0xf]  ;;  %v51_v36 = vld [vmem:[%s7539_s0 + $0x18] sm:$0xff]  ;;  %v3808_v42 = vor.u32 %v4927_v27, %v3805_v28 }
   0xa   :  { %v4920_v35 = vld [vmem:[%s7538_s1 + $0x4] sm:$0xf0]  ;;  %v5412_v37 = vpack.c.bf16 %v49_v32, %v48_v31  ;;  %v5414_v38 = vpack.c.bf16 %v51_v36, %v50_v33  ;;  %v52_v48 = vld [vmem:[%s7539_s0 + $0x20] sm:$0xff]  ;;  %v54_v57 = vld [vmem:[%s7539_s0 + $0x30] sm:$0xff] }
   0xb   :  { %v3854_v43 = vor.u32 %v4920_v35, %v3853_v34  ;;  %v53_v49 = vld [vmem:[%s7539_s0 + $0x28] sm:$0xff]  ;;  %v55_v58 = vld [vmem:[%s7539_s0 + $0x38] sm:$0xff]  ;;  %v56_v1 = vld [vmem:[%s7539_s0 + $0x40] sm:$0xff] }
   0xc   :  { %245 = vmatpush.bf16.msra.mxu0 %v3812_v25  ;;  %v96_v40 = vshrl.u32 %v5412_v37, 16  ;;  %v98_v41 = vshll.u32 %v5412_v37, 16  ;;  %v103_v44 = vshll.u32 %v5414_v38, 16  ;;  %v5430_v51 = vpack.c.bf16 %v53_v49, %v52_v48  ;;  %v57_v2 = vld [vmem:[%s7539_s0 + $0x48] sm:$0xff]  ;;  %v4925_v4 = vld [vmem:[%s7538_s1 + $0x34] sm:$0xf] }
   0xd   :  { %299 = vmatpush.bf16.msra.mxu1 %v3816_v29  ;;  %411 = vmatpush.bf16.msra.mxu2 %v3862_v30  ;;  %v107_v52 = vshrl.u32 %v5414_v38, 16  ;;  %v5445_v59 = vpack.c.bf16 %v55_v58, %v54_v57  ;;  %v5460_v3 = vpack.c.bf16 %v57_v2, %v56_v1  ;;  %v3879_v5 = vld [vmem:[%s7538_s1 + $0x38] sm:$0xf0]  ;;  %v4923_v9 = vld [vmem:[%s7538_s1 + $0x24] sm:$0xf]  ;;  %v58_v20 = vld [vmem:[%s7539_s0 + $0x50] sm:$0xff] }
   0xe   :  { %v100_v45 = vrot.slane %v98_v41, 1  ;;  %v105_v46 = vrot.slane %v103_v44, 1  ;;  %v111_v53 = vshll.u32 %v5430_v51, 16  ;;  %v115_v60 = vshrl.u32 %v5430_v51, 16  ;;  %v3871_v10 = vld [vmem:[%s7538_s1 + $0x28] sm:$0xf0] }
   0xf   :  { %v119_v61 = vshll.u32 %v5445_v59, 16  ;;  %v3882_v6 = vor.u32 %v4925_v4, %v3879_v5  ;;  %v123_v7 = vshrl.u32 %v5445_v59, 16  ;;  %v127_v8 = vshll.u32 %v5460_v3, 16  ;;  %v4921_v14 = vld [vmem:[%s7538_s1 + $0x14] sm:$0xf]  ;;  %v59_v21 = vld [vmem:[%s7539_s0 + $0x58] sm:$0xff] }
  0x10   :  { %246 = vmatpush.bf16.msra.mxu0 %v3804_v39  ;;  %v101_v47 = vor.u32 %v100_v45, %v96_v40  ;;  %v109_v54 = vor.u32 %v107_v52, %v105_v46  ;;  %v113_v55 = vrot.slane %v111_v53, 1  ;;  %v3874_v11 = vor.u32 %v4923_v9, %v3871_v10  ;;  %v3863_v15 = vld [vmem:[%s7538_s1 + $0x18] sm:$0xf0]  ;;  %v4919_v18 = vld [vmem:[%s7538_s1 + $0x4] sm:$0xf]  ;;  %v61_v30 = vld [vmem:[%s7539_s0 + $0x68] sm:$0xff] }
  0x11   :  { %300 = vmatpush.bf16.msra.mxu1 %v3808_v42  ;;  %412 = vmatpush.bf16.msra.mxu2 %v3854_v43  ;;  %v121_v63 = vrot.slane %v119_v61, 1  ;;  %v129_v13 = vrot.slane %v127_v8, 1  ;;  %v3866_v16 = vor.u32 %v4921_v14, %v3863_v15  ;;  %v3855_v19 = vld [vmem:[%s7538_s1 + $0x8] sm:$0xf0]  ;;  %v5499_v23 = vpack.c.bf16 %v59_v21, %v58_v20  ;;  %v60_v29 = vld [vmem:[%s7539_s0 + $0x60] sm:$0xff]  ;;  %v62_v39 = vld [vmem:[%s7539_s0 + $0x70] sm:$0xff] }
  0x12   :  { %v106_v50 = vsel %vm94_vm0, %v101_v47, %v105_v46  ;;  %v114_v56 = vsel %vm94_vm0, %v109_v54, %v113_v55  ;;  %v117_v62 = vor.u32 %v115_v60, %v113_v55  ;;  %463 = vmatpush.bf16.msra.mxu3 %v3882_v6  ;;  %v3858_v22 = vor.u32 %v4919_v18, %v3855_v19  ;;  %v63_v40 = vld [vmem:[%s7539_s0 + $0x78] sm:$0xff]  ;;  %v64_v47 = vld [vmem:[%s7539_s0 + $0x80] sm:$0xff]  ;;  %v65_v48 = vld [vmem:[%s7539_s0 + $0x88] sm:$0xff] }
  0x13   :  { %3833 = vmatmul.msk.bf16.vlgmr.msra.gmra.mxu0 %vm211_vm1, %v106_v50  ;;  %v125_v12 = vor.u32 %v123_v7, %v121_v63  ;;  %v131_v24 = vshrl.u32 %v5460_v3, 16  ;;  %v135_v25 = vshll.u32 %v5499_v23, 16  ;;  %v5516_v31 = vpack.c.bf16 %v61_v30, %v60_v29  ;;  %v3935_v49 = vld [vmem:[%s7538_s1 + $0xb0] sm:$0xf]  ;;  %v4941_v52 = vld [vmem:[%s7538_s1 + $0xb4] sm:$0xf] }
  0x14   :  { %3842 = vmatmul.msk.bf16.vlgmr.msra.gmra.mxu1 %vm211_vm1, %v106_v50  ;;  %3883 = vmatmul.msk.bf16.vlgmr.msra.gmra.mxu2 %vm211_vm1, %v5412_v37  ;;  %v122_v0 = vsel %vm94_vm0, %v117_v62, %v121_v63  ;;  %v139_v32 = vshrl.u32 %v5499_v23, 16  ;;  %v5533_v41 = vpack.c.bf16 %v63_v40, %v62_v39  ;;  %v4942_v50 = vld [vmem:[%s7538_s1 + $0xb4] sm:$0xf0]  ;;  %v3937_v54 = vld [vmem:[%s7538_s1 + $0xb8] sm:$0xf0]  ;;  %v5562_v55 = vpack.c.bf16 %v65_v48, %v64_v47 }
  0x15   :  { %v130_v17 = vsel %vm94_vm0, %v125_v12, %v129_v13  ;;  %v133_v26 = vor.u32 %v131_v24, %v129_v13  ;;  %v137_v27 = vrot.slane %v135_v25, 1  ;;  %v143_v33 = vshll.u32 %v5516_v31, 16  ;;  %v3927_v57 = vld [vmem:[%s7538_s1 + $0xa0] sm:$0xf]  ;;  %v4940_v58 = vld [vmem:[%s7538_s1 + $0xa4] sm:$0xf0] }
  0x16   :  { %464 = vmatpush.bf16.msra.mxu3 %v3874_v11  ;;  %v147_v42 = vshrl.u32 %v5516_v31, 16  ;;  %v151_v43 = vshll.u32 %v5533_v41, 16  ;;  %v3936_v53 = vor.u32 %v4942_v50, %v3935_v49  ;;  %v4939_v60 = vld [vmem:[%s7538_s1 + $0xa4] sm:$0xf]  ;;  %v3928_v61 = vor.u32 %v4940_v58, %v3927_v57  ;;  %v3929_v62 = vld [vmem:[%s7538_s1 + $0xa8] sm:$0xf0] }
  0x17   :  { %v138_v28 = vsel %vm94_vm0, %v133_v26, %v137_v27  ;;  %v141_v34 = vor.u32 %v139_v32, %v137_v27  ;;  %v145_v35 = vrot.slane %v143_v33, 1  ;;  %v155_v63 = vshrl.u32 %v5533_v41, 16  ;;  %v3919_v2 = vld [vmem:[%s7538_s1 + $0x90] sm:$0xf]  ;;  %v4938_v4 = vld [vmem:[%s7538_s1 + $0x94] sm:$0xf0] }
  0x18   :  { %v153_v45 = vrot.slane %v151_v43, 1  ;;  %623 = vmatpush.bf16.msrb.mxu0 %v3936_v53  ;;  %v3932_v1 = vor.u32 %v4939_v60, %v3929_v62  ;;  %v4937_v5 = vld [vmem:[%s7538_s1 + $0x94] sm:$0xf]  ;;  %v3920_v6 = vor.u32 %v4938_v4, %v3919_v2  ;;  %v3921_v7 = vld [vmem:[%s7538_s1 + $0x98] sm:$0xf0]  ;;  %v163_v20 = vshrl.u32 %v5562_v55, 16 }
  0x19   :  { %v146_v36 = vsel %vm94_vm0, %v141_v34, %v145_v35  ;;  %v149_v44 = vor.u32 %v147_v42, %v145_v35  ;;  %v3924_v8 = vor.u32 %v4937_v5, %v3921_v7  ;;  %v3911_v11 = vld [vmem:[%s7538_s1 + $0x80] sm:$0xf]  ;;  %v4936_v12 = vld [vmem:[%s7538_s1 + $0x84] sm:$0xf0]  ;;  %v4935_v13 = vld [vmem:[%s7538_s1 + $0x84] sm:$0xf] }
  0x1a   :  { %465 = vmatpush.bf16.msra.mxu3 %v3866_v16  ;;  %v157_v9 = vor.u32 %v155_v63, %v153_v45  ;;  %v3912_v14 = vor.u32 %v4936_v12, %v3911_v11  ;;  %v3913_v15 = vld [vmem:[%s7538_s1 + $0x88] sm:$0xf0]  ;;  %v66_v18 = vld [vmem:[%s7539_s0 + $0x90] sm:$0x3]  ;;  %v533_v33 = vrot.slane %v5412_v37, 1  ;;  %v534_v34 = vrot.slane %v5414_v38, 1 }
  0x1b   :  { %v154_v46 = vsel %vm94_vm0, %v149_v44, %v153_v45  ;;  %v5612_v19 = vpack.c.bf16 %v66_v18, %v66_v18  ;;  %v542_v12 = vrot.slane %v5499_v23, 1 }
  0x1c   :  { %624 = vmatpush.bf16.msrb.mxu0 %v3928_v61  ;;  %v535_v39 = vsel %vm532_vm2, %v533_v33, %v534_v34 }
  0x1d   :  { %v167_v21 = vshll.u32 %v5612_v19, 16 }
  0x1e   :  { %466 = vmatpush.bf16.msra.mxu3 %v3858_v22 }
  0x1f   :  { %v169_v24 = vrot.slane %v167_v21, 1 }
  0x20   :  { %625 = vmatpush.bf16.msrb.mxu0 %v3920_v6 }
  0x21   :  { %3892 = vmatmul.msk.bf16.vlgmr.msra.gmra.mxu3 %vm211_vm1, %v5412_v37 }
  0x23   :  { %3834 = vmatmul.msk.bf16.gmra.mxu0 %vm211_vm1, %v114_v56 }
  0x24   :  { %3843 = vmatmul.msk.bf16.gmra.mxu1 %vm211_vm1, %v114_v56  ;;  %3884 = vmatmul.msk.bf16.gmra.mxu2 %vm211_vm1, %v5414_v38  ;;  %v3940_v56 = vor.u32 %v4941_v52, %v3937_v54 }
  0x25   :  { %626 = vmatpush.bf16.msrb.mxu0 %v3912_v14 }
  0x26   :  { %677 = vmatpush.bf16.msrb.mxu1 %v3940_v56 }
  0x2a   :  { %678 = vmatpush.bf16.msrb.mxu1 %v3932_v1 }
  0x2e   :  { %679 = vmatpush.bf16.msrb.mxu1 %v3924_v8 }
  0x31   :  { %3893 = vmatmul.msk.bf16.gmra.mxu3 %vm211_vm1, %v5414_v38  ;;  %v536_v38 = vrot.slane %v5430_v51, 1 }
  0x33   :  { %3835 = vmatmul.msk.bf16.gmra.mxu0 %vm211_vm1, %v122_v0  ;;  %v537_v47 = vsel %vm532_vm2, %v534_v34, %v536_v38 }
  0x34   :  { %3844 = vmatmul.msk.bf16.gmra.mxu1 %vm211_vm1, %v122_v0  ;;  %3885 = vmatmul.msk.bf16.gmra.mxu2 %vm211_vm1, %v5430_v51  ;;  %v159_v0 = vshll.u32 %v5562_v55, 16 }
  0x36   :  { %v161_v10 = vrot.slane %v159_v0, 1  ;;  %v540_v0 = vrot.slane %v5460_v3, 1 }
  0x38   :  { %v162_v16 = vsel %vm94_vm0, %v157_v9, %v161_v10  ;;  %v165_v22 = vor.u32 %v163_v20, %v161_v10  ;;  %v543_v14 = vsel %vm532_vm2, %v540_v0, %v542_v12 }
  0x3a   :  { %v170_v26 = vsel %vm94_vm0, %v165_v22, %v169_v24 }
  0x41   :  { %3894 = vmatmul.msk.bf16.gmra.mxu3 %vm211_vm1, %v5430_v51  ;;  %v538_v51 = vrot.slane %v5445_v59, 1 }
  0x43   :  { %3836 = vmatmul.msk.bf16.gmra.mxu0 %vm211_vm1, %v130_v17  ;;  %v539_v57 = vsel %vm532_vm2, %v536_v38, %v538_v51  ;;  %v541_v4 = vsel %vm532_vm2, %v538_v51, %v540_v0 }
  0x44   :  { %3845 = vmatmul.msk.bf16.gmra.mxu1 %vm211_vm1, %v130_v17  ;;  %3886 = vmatmul.msk.bf16.gmra.mxu2 %vm211_vm1, %v5445_v59  ;;  %v3916_v17 = vor.u32 %v4935_v13, %v3913_v15 }
  0x46   :  { %680 = vmatpush.bf16.msrb.mxu1 %v3916_v17 }
  0x51   :  { %3895 = vmatmul.msk.bf16.gmra.mxu3 %vm211_vm1, %v5445_v59 }
  0x53   :  { %3837 = vmatmul.msk.bf16.gmra.mxu0 %vm211_vm1, %v138_v28 }
  0x54   :  { %3846 = vmatmul.msk.bf16.gmra.mxu1 %vm211_vm1, %v138_v28  ;;  %3887 = vmatmul.msk.bf16.gmra.mxu2 %vm211_vm1, %v5460_v3 }
  0x61   :  { %3896 = vmatmul.msk.bf16.gmra.mxu3 %vm211_vm1, %v5460_v3 }
  0x63   :  { %3838 = vmatmul.msk.bf16.gmra.mxu0 %vm211_vm1, %v146_v36 }
  0x64   :  { %3847 = vmatmul.msk.bf16.gmra.mxu1 %vm211_vm1, %v146_v36  ;;  %3888 = vmatmul.msk.bf16.gmra.mxu2 %vm211_vm1, %v5499_v23 }
  0x71   :  { %3897 = vmatmul.msk.bf16.gmra.mxu3 %vm211_vm1, %v5499_v23  ;;  %v544_v23 = vrot.slane %v5516_v31, 1 }
  0x73   :  { %3839 = vmatmul.msk.bf16.gmra.mxu0 %vm211_vm1, %v154_v46  ;;  %v545_v24 = vsel %vm532_vm2, %v542_v12, %v544_v23 }
  0x74   :  { %3848 = vmatmul.msk.bf16.gmra.mxu1 %vm211_vm1, %v154_v46  ;;  %3889 = vmatmul.msk.bf16.gmra.mxu2 %vm211_vm1, %v5516_v31 }
  0x81   :  { %3898 = vmatmul.msk.bf16.gmra.mxu3 %vm211_vm1, %v5516_v31  ;;  %v546_v31 = vrot.slane %v5533_v41, 1 }
  0x83   :  { %3840 = vmatmul.msk.bf16.gmra.mxu0 %vm211_vm1, %v162_v16 }
  0x84   :  { %3849 = vmatmul.msk.bf16.gmra.mxu1 %vm211_vm1, %v162_v16  ;;  %3890 = vmatmul.msk.bf16.gmra.mxu2 %vm211_vm1, %v5533_v41 }
  0x90   :  { %v248_v25 = vpop.f32.mrf.mxu0 }
  0x91   :  { %v302_v27 = vpop.f32.mrf.mxu1  ;;  %3899 = vmatmul.msk.bf16.gmra.mxu3 %vm211_vm1, %v5533_v41  ;;  %v548_v41 = vrot.slane %v5562_v55, 1 }
  0x93   :  { %3841 = vmatmul.msk.bf16.gmra.mxu0 %vm211_vm1, %v170_v26  ;;  %v549_v51 = vsel %vm532_vm2, %v546_v31, %v548_v41 }
  0x94   :  { %3850 = vmatmul.msk.bf16.gmra.mxu1 %vm211_vm1, %v170_v26  ;;  %3891 = vmatmul.msk.bf16.gmra.mxu2 %vm211_vm1, %v5562_v55 }
  0x97   :  { %v414_v28 = vpop.f32.mrf.mxu2 }
  0x98   :  { %v5623_v29 = vadd.f32 %v414_v28, %v248_v25  ;;  %v5625_v30 = vpop.f32.mrf.mxu0 }
  0x99   :  { %v5629_v32 = vpop.f32.mrf.mxu1 }
  0x9f   :  { %v5633_v35 = vpop.f32.mrf.mxu2 }
  0xa0   :  { %v253_v36 = vpop.f32.mrf.mxu0 }
  0xa1   :  { %v307_v40 = vpop.f32.mrf.mxu1  ;;  %3900 = vmatmul.msk.bf16.gmra.mxu3 %vm211_vm1, %v5562_v55  ;;  %v550_v55 = vrot.slane %v5612_v19, 1 }
  0xa3   :  { %3941 = vmatmul.msk.bf16.vlgmr.msrb.gmra.mxu0 %vm211_vm1, %v535_v39 }
  0xa4   :  { %3950 = vmatmul.msk.bf16.vlgmr.msrb.gmra.mxu1 %vm211_vm1, %v535_v39  ;;  %v468_v59 = vpop.f32.mrf.mxu3  ;;  %v547_v39 = vsel %vm532_vm2, %v544_v23, %v546_v31 }
  0xa5   :  { %v469_v6 = vadd.f32 %v468_v59, %v302_v27 }
  0xa7   :  { %v419_v42 = vpop.f32.mrf.mxu2 }
  0xa8   :  { %v5638_v43 = vadd.f32 %v419_v42, %v253_v36  ;;  %v5640_v44 = vpop.f32.mrf.mxu0 }
  0xa9   :  { %v5644_v37 = vpop.f32.mrf.mxu1 }
  0xac   :  { %v5679_v7 = vpop.f32.mrf.mxu3 }
  0xad   :  { %v471_v23 = vadd.f32 %v5679_v7, %v5629_v32 }
  0xaf   :  { %v5647_v45 = vpop.f32.mrf.mxu2 }
  0xb0   :  { %v258_v46 = vpop.f32.mrf.mxu0 }
  0xb1   :  { %v312_v48 = vpop.f32.mrf.mxu1 }
  0xb3   :  { %3942 = vmatmul.msk.bf16.gmra.mxu0 %vm211_vm1, %v537_v47 }
  0xb4   :  { %3951 = vmatmul.msk.bf16.gmra.mxu1 %vm211_vm1, %v537_v47  ;;  %v473_v3 = vpop.f32.mrf.mxu3 }
  0xb5   :  { %v5692_v16 = vadd.f32 %v473_v3, %v307_v40  ;;  %v763_v3 = vld [vmem:[%s7540_s2] sm:$0x3] }
  0xb6   :  { %v5762_v19 = vperm.slane %v763_v3, 1 }
  0xb7   :  { %v424_v49 = vpop.f32.mrf.mxu2 }
  0xb8   :  { %v5652_v50 = vadd.f32 %v424_v49, %v258_v46  ;;  %v5654_v52 = vpop.f32.mrf.mxu0 }
  0xb9   :  { %v5658_v53 = vpop.f32.mrf.mxu1 }
  0xbc   :  { %v5695_v17 = vpop.f32.mrf.mxu3 }
  0xbf   :  { %v5661_v54 = vpop.f32.mrf.mxu2 }
  0xc0   :  { %v263_v56 = vpop.f32.mrf.mxu0 }
  0xc1   :  { %v317_v58 = vpop.f32.mrf.mxu1 }
  0xc3   :  { %3943 = vmatmul.msk.bf16.gmra.mxu0 %vm211_vm1, %v539_v57 }
  0xc4   :  { %3952 = vmatmul.msk.bf16.gmra.mxu1 %vm211_vm1, %v539_v57  ;;  %v478_v21 = vpop.f32.mrf.mxu3 }
  0xc5   :  { %v5708_v26 = vadd.f32 %v478_v21, %v312_v48  ;;  %v5760_v21 = vperm.slane %v763_v3, 0  ;;  %v476_v3 = vadd.f32 %v5695_v17, %v5644_v37 }
  0xc7   :  { %v429_v60 = vpop.f32.mrf.mxu2 }
  0xc8   :  { %v5666_v61 = vadd.f32 %v429_v60, %v263_v56  ;;  %v5668_v62 = vpop.f32.mrf.mxu0 }
  0xc9   :  { %v5672_v63 = vpop.f32.mrf.mxu1 }
  0xcc   :  { %v5711_v27 = vpop.f32.mrf.mxu3 }
  0xcf   :  { %v5675_v1 = vpop.f32.mrf.mxu2 }
  0xd0   :  { %v268_v2 = vpop.f32.mrf.mxu0 }
  0xd1   :  { %v322_v5 = vpop.f32.mrf.mxu1 }
  0xd3   :  { %3944 = vmatmul.msk.bf16.gmra.mxu0 %vm211_vm1, %v541_v4 }
  0xd4   :  { %3953 = vmatmul.msk.bf16.gmra.mxu1 %vm211_vm1, %v541_v4  ;;  %v483_v34 = vpop.f32.mrf.mxu3 }
  0xd5   :  { %v5724_v42 = vadd.f32 %v483_v34, %v317_v58 }
  0xd7   :  { %v434_v8 = vpop.f32.mrf.mxu2 }
  0xd8   :  { %v5682_v9 = vadd.f32 %v434_v8, %v268_v2  ;;  %v5684_v10 = vpop.f32.mrf.mxu0  ;;  %v551_v2 = vsel %vm532_vm2, %v548_v41, %v550_v55 }
  0xd9   :  { %v5686_v11 = vpop.f32.mrf.mxu1 }
  0xdc   :  { %v5727_v38 = vpop.f32.mrf.mxu3 }
  0xe0   :  { %v5689_v13 = vpop.f32.mrf.mxu0 }
  0xe1   :  { %v327_v15 = vpop.f32.mrf.mxu1 }
  0xe3   :  { %3945 = vmatmul.msk.bf16.gmra.mxu0 %vm211_vm1, %v543_v14 }
  0xe4   :  { %3954 = vmatmul.msk.bf16.gmra.mxu1 %vm211_vm1, %v543_v14  ;;  %v488_v48 = vpop.f32.mrf.mxu3 }
  0xe5   :  { %v5740_v57 = vadd.f32 %v488_v48, %v322_v5 }
  0xe8   :  { %v5698_v18 = vpop.f32.mrf.mxu0 }
  0xe9   :  { %v5700_v20 = vpop.f32.mrf.mxu1 }
  0xec   :  { %v5744_v58 = vpop.f32.mrf.mxu3 }
  0xf0   :  { %v5703_v22 = vpop.f32.mrf.mxu0 }
  0xf1   :  { %v5706_v25 = vpop.f32.mrf.mxu1 }
  0xf3   :  { %3946 = vmatmul.msk.bf16.gmra.mxu0 %vm211_vm1, %v545_v24 }
  0xf4   :  { %3955 = vmatmul.msk.bf16.gmra.mxu1 %vm211_vm1, %v545_v24  ;;  %v493_v5 = vpop.f32.mrf.mxu3 }
  0xf5   :  { %v5756_v14 = vadd.f32 %v493_v5, %v327_v15  ;;  %v422_v5 = vadd.f32 %v5647_v45, %v5640_v44 }
  0xf8   :  { %v5714_v28 = vpop.f32.mrf.mxu0 }
  0xf9   :  { %v5716_v33 = vpop.f32.mrf.mxu1 }
 0x100   :  { %v5719_v36 = vpop.f32.mrf.mxu0 }
 0x101   :  { %v5722_v40 = vpop.f32.mrf.mxu1 }
 0x103   :  { %3947 = vmatmul.msk.bf16.gmra.mxu0 %vm211_vm1, %v547_v39 }
 0x104   :  { %3956 = vmatmul.msk.bf16.gmra.mxu1 %vm211_vm1, %v547_v39 }
 0x108   :  { %v5730_v46 = vpop.f32.mrf.mxu0 }
 0x109   :  { %v5732_v47 = vpop.f32.mrf.mxu1 }
 0x110   :  { %v5735_v49 = vpop.f32.mrf.mxu0 }
 0x111   :  { %v5738_v56 = vpop.f32.mrf.mxu1 }
 0x113   :  { %3948 = vmatmul.msk.bf16.gmra.mxu0 %vm211_vm1, %v549_v51 }
 0x114   :  { %3957 = vmatmul.msk.bf16.gmra.mxu1 %vm211_vm1, %v549_v51 }
 0x118   :  { %v5746_v60 = vpop.f32.mrf.mxu0 }
 0x119   :  { %v5748_v59 = vpop.f32.mrf.mxu1 }
 0x120   :  { %v628_v0 = vpop.f32.mrf.mxu0 }
 0x121   :  { %v727_v4 = vadd.f32 %v628_v0, %v5623_v29  ;;  %v682_v8 = vpop.f32.mrf.mxu1  ;;  %v417_v29 = vadd.f32 %v5633_v35, %v5625_v30 }
 0x122   :  { %v728_v12 = vadd.f32 %v682_v8, %v469_v6 }
 0x123   :  { %3949 = vmatmul.msk.bf16.gmra.mxu0 %vm211_vm1, %v551_v2  ;;  %v769_v34 = vadd.f32 %v5760_v21, %v727_v4 }
 0x124   :  { %3958 = vmatmul.msk.bf16.gmra.mxu1 %vm211_vm1, %v551_v2  ;;  %v770_v31 = vadd.f32 %v5762_v19, %v728_v12 }
 0x125   :  { %v805_v51 = vmax.f32 %v769_v34, 0.0 }
 0x126   :  { %v806_v0 = vmax.f32 %v770_v31, 0.0 }
 0x128   :  { %v630_v24 = vpop.f32.mrf.mxu0 }
 0x129   :  { %v729_v6 = vadd.f32 %v630_v24, %v417_v29  ;;  %v684_v15 = vpop.f32.mrf.mxu1 }
 0x12a   :  { %v730_v39 = vadd.f32 %v684_v15, %v471_v23 }
 0x12b   :  { %v771_v41 = vadd.f32 %v5760_v21, %v729_v6 }
 0x12c   :  { %v772_v48 = vadd.f32 %v5762_v19, %v730_v39 }
 0x12d   :  { %v807_v55 = vmax.f32 %v771_v41, 0.0 }
 0x12e   :  { %v808_v2 = vmax.f32 %v772_v48, 0.0 }
 0x12f   :  { %v5772_v30 = vpack.c.bf16 %v807_v55, %v805_v51  ;;  %v427_v55 = vadd.f32 %v5661_v54, %v5654_v52 }
 0x130   :  { %v633_v35 = vpop.f32.mrf.mxu0  ;;  %v5774_v32 = vpack.c.bf16 %v808_v2, %v806_v0  ;;  %v481_v0 = vadd.f32 %v5711_v27, %v5658_v53 }
 0x131   :  { %v731_v7 = vadd.f32 %v633_v35, %v5638_v43  ;;  %v687_v4 = vpop.f32.mrf.mxu1 }
 0x132   :  { %v732_v8 = vadd.f32 %v687_v4, %v5692_v16 }
 0x133   :  { %v773_v29 = vadd.f32 %v5760_v21, %v731_v7 }
 0x134   :  { %v774_v34 = vadd.f32 %v5762_v19, %v732_v8 }
 0x135   :  { %v809_v31 = vmax.f32 %v773_v29, 0.0 }
 0x136   :  { %v810_v39 = vmax.f32 %v774_v34, 0.0 }
 0x138   :  { %v635_v12 = vpop.f32.mrf.mxu0 }
 0x139   :  { %v733_v23 = vadd.f32 %v635_v12, %v422_v5  ;;  %v689_v24 = vpop.f32.mrf.mxu1 }
 0x13a   :  { %v734_v6 = vadd.f32 %v689_v24, %v476_v3 }
 0x13b   :  { %v775_v15 = vadd.f32 %v5760_v21, %v733_v23 }
 0x13c   :  { %v776_v43 = vadd.f32 %v5762_v19, %v734_v6  ;;  %v436_v6 = vpop.f32.mrf.mxu2 }
 0x13d   :  { %v811_v16 = vmax.f32 %v775_v15, 0.0  ;;  %v432_v15 = vadd.f32 %v5675_v1, %v5668_v62 }
 0x13e   :  { %v812_v41 = vmax.f32 %v776_v43, 0.0  ;;  %v486_v43 = vadd.f32 %v5727_v38, %v5672_v63 }
 0x13f   :  { %v5786_v44 = vpack.c.bf16 %v811_v16, %v809_v31 }
 0x140   :  { %v638_v45 = vpop.f32.mrf.mxu0  ;;  %v5788_v37 = vpack.c.bf16 %v812_v41, %v810_v39 }
 0x141   :  { %v735_v17 = vadd.f32 %v638_v45, %v5652_v50  ;;  %v692_v48 = vpop.f32.mrf.mxu1 }
 0x142   :  { %v736_v51 = vadd.f32 %v692_v48, %v5708_v26 }
 0x143   :  { %v777_v35 = vadd.f32 %v5760_v21, %v735_v17 }
 0x144   :  { %v778_v8 = vadd.f32 %v5762_v19, %v736_v51 }
 0x145   :  { %v813_v12 = vmax.f32 %v777_v35, 0.0 }
 0x146   :  { %v814_v29 = vmax.f32 %v778_v8, 0.0 }
 0x148   :  { %v640_v2 = vpop.f32.mrf.mxu0 }
 0x149   :  { %v737_v7 = vadd.f32 %v640_v2, %v427_v55  ;;  %v694_v4 = vpop.f32.mrf.mxu1  ;;  %v439_v55 = vpop.f32.mrf.mxu2 }
 0x14a   :  { %v738_v5 = vadd.f32 %v694_v4, %v481_v0  ;;  %v437_v4 = vadd.f32 %v436_v6, %v5684_v10 }
 0x14b   :  { %v779_v3 = vadd.f32 %v5760_v21, %v737_v7 }
 0x14c   :  { %v780_v50 = vadd.f32 %v5762_v19, %v738_v5  ;;  %v491_v5 = vadd.f32 %v5744_v58, %v5686_v11 }
 0x14d   :  { %v815_v26 = vmax.f32 %v779_v3, 0.0 }
 0x14e   :  { %v816_v23 = vmax.f32 %v780_v50, 0.0 }
 0x14f   :  { %v5800_v52 = vpack.c.bf16 %v815_v26, %v813_v12 }
 0x150   :  { %v643_v54 = vpop.f32.mrf.mxu0  ;;  %v5802_v53 = vpack.c.bf16 %v816_v23, %v814_v29  ;;  %v495_v29 = vpop.f32.mrf.mxu3 }
 0x151   :  { %v739_v27 = vadd.f32 %v643_v54, %v5666_v61  ;;  %v697_v24 = vpop.f32.mrf.mxu1  ;;  %v441_v8 = vpop.f32.mrf.mxu2 }
 0x152   :  { %v740_v34 = vadd.f32 %v697_v24, %v5724_v42 }
 0x153   :  { %v781_v16 = vadd.f32 %v5760_v21, %v739_v27 }
 0x154   :  { %v782_v45 = vadd.f32 %v5762_v19, %v740_v34 }
 0x155   :  { %v817_v42 = vmax.f32 %v781_v16, 0.0  ;;  %v440_v16 = vadd.f32 %v439_v55, %v5689_v13 }
 0x156   :  { %v818_v0 = vmax.f32 %v782_v45, 0.0  ;;  %v442_v45 = vadd.f32 %v441_v8, %v5698_v18 }
 0x158   :  { %v645_v31 = vpop.f32.mrf.mxu0 }
 0x159   :  { %v741_v39 = vadd.f32 %v645_v31, %v432_v15  ;;  %v699_v41 = vpop.f32.mrf.mxu1 }
 0x15a   :  { %v742_v17 = vadd.f32 %v699_v41, %v486_v43  ;;  %v444_v43 = vpop.f32.mrf.mxu2 }
 0x15b   :  { %v783_v61 = vadd.f32 %v5760_v21, %v741_v39  ;;  %v5833_v39 = vpop.f32.mrf.mxu3 }
 0x15c   :  { %v784_v48 = vadd.f32 %v5762_v19, %v742_v17  ;;  %v496_v17 = vadd.f32 %v495_v29, %v5700_v20 }
 0x15d   :  { %v819_v51 = vmax.f32 %v783_v61, 0.0 }
 0x15e   :  { %v820_v62 = vmax.f32 %v784_v48, 0.0 }
 0x15f   :  { %v5814_v1 = vpack.c.bf16 %v819_v51, %v817_v42 }
 0x160   :  { %v648_v63 = vpop.f32.mrf.mxu0  ;;  %v5816_v38 = vpack.c.bf16 %v820_v62, %v818_v0 }
 0x161   :  { %v743_v2 = vadd.f32 %v648_v63, %v5682_v9  ;;  %v702_v35 = vpop.f32.mrf.mxu1 }
 0x162   :  { %v744_v7 = vadd.f32 %v702_v35, %v5740_v57 }
 0x163   :  { %v785_v50 = vadd.f32 %v5760_v21, %v743_v2  ;;  %v5841_v2 = vpop.f32.mrf.mxu3 }
 0x164   :  { %v786_v23 = vadd.f32 %v5762_v19, %v744_v7 }
 0x165   :  { %v821_v57 = vmax.f32 %v785_v50, 0.0 }
 0x166   :  { %v822_v10 = vmax.f32 %v786_v23, 0.0 }
 0x168   :  { %v650_v3 = vpop.f32.mrf.mxu0 }
 0x169   :  { %v745_v12 = vadd.f32 %v650_v3, %v437_v4  ;;  %v704_v26 = vpop.f32.mrf.mxu1 }
 0x16a   :  { %v746_v54 = vadd.f32 %v704_v26, %v491_v5 }
 0x16b   :  { %v787_v9 = vadd.f32 %v5760_v21, %v745_v12  ;;  %v5847_v50 = vpop.f32.mrf.mxu3 }
 0x16c   :  { %v788_v27 = vadd.f32 %v5762_v19, %v746_v54 }
 0x16d   :  { %v823_v24 = vmax.f32 %v787_v9, 0.0 }
 0x16e   :  { %v824_v34 = vmax.f32 %v788_v27, 0.0 }
 0x16f   :  { %v5827_v6 = vpack.c.bf16 %v823_v24, %v821_v57 }
 0x170   :  { %v653_v11 = vpop.f32.mrf.mxu0  ;;  %v5829_v58 = vpack.c.bf16 %v824_v34, %v822_v10  ;;  %v445_v10 = vadd.f32 %v444_v43, %v5703_v22 }
 0x171   :  { %v707_v15 = vpop.f32.mrf.mxu1  ;;  %v747_v41 = vadd.f32 %v653_v11, %v440_v16 }
 0x172   :  { %v748_v31 = vadd.f32 %v707_v15, %v5756_v14  ;;  %v446_v14 = vpop.f32.mrf.mxu2 }
 0x173   :  { %v789_v48 = vadd.f32 %v5760_v21, %v747_v41  ;;  %v505_v54 = vpop.f32.mrf.mxu3  ;;  %v447_v57 = vadd.f32 %v446_v14, %v5714_v28 }
 0x174   :  { %v790_v0 = vadd.f32 %v5762_v19, %v748_v31 }
 0x175   :  { %v825_v55 = vmax.f32 %v789_v48, 0.0 }
 0x176   :  { %v826_v18 = vmax.f32 %v790_v0, 0.0 }
 0x178   :  { %v655_v61 = vpop.f32.mrf.mxu0 }
 0x179   :  { %v749_v42 = vadd.f32 %v655_v61, %v442_v45  ;;  %v709_v51 = vpop.f32.mrf.mxu1 }
 0x17a   :  { %v750_v62 = vadd.f32 %v709_v51, %v496_v17  ;;  %v449_v3 = vpop.f32.mrf.mxu2 }
 0x17b   :  { %v791_v63 = vadd.f32 %v5760_v21, %v749_v42  ;;  %v450_v27 = vadd.f32 %v449_v3, %v5719_v36  ;;  %v508_v48 = vpop.f32.mrf.mxu3 }
 0x17c   :  { %v792_v13 = vadd.f32 %v5762_v19, %v750_v62 }
 0x17d   :  { %v827_v35 = vmax.f32 %v791_v63, 0.0 }
 0x17e   :  { %v828_v7 = vmax.f32 %v792_v13, 0.0 }
 0x17f   :  { %v851_v20 = vpack.c.bf16 %v827_v35, %v825_v55  ;;  %v509_v55 = vadd.f32 %v508_v48, %v5738_v56 }
 0x180   :  { %v658_v4 = vpop.f32.mrf.mxu0  ;;  %v5843_v8 = vpack.c.bf16 %v828_v7, %v826_v18 }
 0x181   :  { %v5845_v5 = vpop.f32.mrf.mxu1  ;;  %v751_v31 = vadd.f32 %v658_v4, %v445_v10 }
 0x182   :  { %v451_v29 = vpop.f32.mrf.mxu2 }
 0x183   :  { %v452_v34 = vadd.f32 %v451_v29, %v5730_v46  ;;  %v793_v28 = vadd.f32 %v5760_v21, %v751_v31  ;;  %v510_v35 = vpop.f32.mrf.mxu3  ;;  %v4953_v31 = vld [vmem:[%s7541_s3 + $0x5c] sm:$0xf] }
 0x184   :  { %v511_v3 = vadd.f32 %v510_v35, %v5748_v59  ;;  %v4943_v59 = vld [vmem:[%s7541_s3 + $0x4] sm:$0xf]  ;;  %v4956_v35 = vld [vmem:[%s7541_s3 + $0x6c] sm:$0xf0] }
 0x185   :  { %v829_v0 = vmax.f32 %v793_v28, 0.0 }
 0x188   :  { %v660_v12 = vpop.f32.mrf.mxu0 }
 0x189   :  { %v5849_v26 = vpop.f32.mrf.mxu1  ;;  %v753_v11 = vadd.f32 %v660_v12, %v447_v57 }
 0x18a   :  { %v454_v17 = vpop.f32.mrf.mxu2 }
 0x18b   :  { %v795_v61 = vadd.f32 %v5760_v21, %v753_v11  ;;  %v455_v63 = vadd.f32 %v454_v17, %v5735_v49 }
 0x18d   :  { %v831_v43 = vmax.f32 %v795_v61, 0.0 }
 0x18f   :  { %v853_v14 = vpack.c.bf16 %v831_v43, %v829_v0  ;;  %v4034_v0 = vld [vmem:[%s7541_s3 + $0x70] sm:$0xf0] }
 0x190   :  { %v663_v23 = vpop.f32.mrf.mxu0 }
 0x191   :  { %v5851_v9 = vpop.f32.mrf.mxu1  ;;  %v755_v24 = vadd.f32 %v663_v23, %v450_v27 }
 0x192   :  { %v456_v13 = vpop.f32.mrf.mxu2 }
 0x193   :  { %v797_v16 = vadd.f32 %v5760_v21, %v755_v24  ;;  %v457_v4 = vadd.f32 %v456_v13, %v5746_v60  ;;  %v4946_v13 = vld [vmem:[%s7541_s3 + $0x14] sm:$0xf0] }
 0x195   :  { %v833_v42 = vmax.f32 %v797_v16, 0.0  ;;  %v504_v16 = vadd.f32 %v5847_v50, %v5722_v40  ;;  %v499_v40 = vadd.f32 %v5833_v39, %v5706_v25 }
 0x198   :  { %v665_v15 = vpop.f32.mrf.mxu0 }
 0x199   :  { %v757_v41 = vadd.f32 %v665_v15, %v452_v34  ;;  %v719_v45 = vpop.f32.mrf.mxu1  ;;  %v506_v34 = vadd.f32 %v505_v54, %v5732_v47  ;;  %v501_v47 = vadd.f32 %v5841_v2, %v5716_v33  ;;  %v756_v54 = vadd.f32 %v5851_v9, %v504_v16  ;;  %v3961_v2 = vld [vmem:[%s7541_s3] sm:$0xf]  ;;  %v4048_v16 = vld [vmem:[%s7541_s3 + $0x88] sm:$0xf] }
 0x19a   :  { %v752_v33 = vadd.f32 %v5845_v5, %v499_v40  ;;  %v4944_v5 = vld [vmem:[%s7541_s3 + $0x4] sm:$0xf0] }
 0x19b   :  { %v799_v36 = vadd.f32 %v5760_v21, %v757_v41  ;;  %v758_v41 = vadd.f32 %v719_v45, %v506_v34  ;;  %v754_v50 = vadd.f32 %v5849_v26, %v501_v47  ;;  %v4959_v34 = vld [vmem:[%s7541_s3 + $0x8c] sm:$0xf] }
 0x19c   :  { %v794_v26 = vadd.f32 %v5762_v19, %v752_v33  ;;  %v869_v33 = vld [vmem:[%s7541_s3 + $0x50] sm:$0x11] }
 0x19d   :  { %v835_v51 = vmax.f32 %v799_v36, 0.0  ;;  %v800_v45 = vadd.f32 %v5762_v19, %v758_v41  ;;  %v796_v25 = vadd.f32 %v5762_v19, %v754_v50  ;;  %v4954_v36 = vld [vmem:[%s7541_s3 + $0x5c] sm:$0xf0] }
 0x19e   :  { %v830_v43 = vmax.f32 %v794_v26, 0.0 }
 0x19f   :  { %v855_v22 = vpack.c.bf16 %v835_v51, %v833_v42  ;;  %v836_v39 = vmax.f32 %v800_v45, 0.0  ;;  %v832_v28 = vmax.f32 %v796_v25, 0.0  ;;  %v5923_v51 = vor.u32 %v4944_v5, %v3961_v2  ;;  %v4952_v45 = vld [vmem:[%s7541_s3 + $0x44] sm:$0xf0] }
 0x1a0   :  { %v668_v46 = vpop.f32.mrf.mxu0 }
 0x1a1   :  { %v722_v62 = vpop.f32.mrf.mxu1  ;;  %940 = vmatpush.bf16.msrb.mxu2 %v855_v22  ;;  %1173 = vmatpush.bf16.msra.mxu0 %v855_v22  ;;  %v759_v18 = vadd.f32 %v668_v46, %v455_v63  ;;  %v4955_v46 = vld [vmem:[%s7541_s3 + $0x6c] sm:$0xf] }
 0x1a2   :  { %v760_v7 = vadd.f32 %v722_v62, %v509_v55  ;;  %v854_v62 = vpack.c.bf16 %v832_v28, %v830_v43  ;;  %v4032_v55 = vld [vmem:[%s7541_s3 + $0x68] sm:$0xf] }
 0x1a3   :  { %v801_v29 = vadd.f32 %v5760_v21, %v759_v18 }
 0x1a4   :  { %v802_v49 = vadd.f32 %v5762_v19, %v760_v7  ;;  %v4947_v7 = vld [vmem:[%s7541_s3 + $0x24] sm:$0xf] }
 0x1a5   :  { %941 = vmatpush.bf16.msrb.mxu2 %v853_v14  ;;  %1174 = vmatpush.bf16.msra.mxu0 %v853_v14  ;;  %v837_v10 = vmax.f32 %v801_v29, 0.0  ;;  %v5945_v14 = vor.u32 %v4955_v46, %v4034_v0  ;;  %v4042_v29 = vld [vmem:[%s7541_s3 + $0x80] sm:$0xf0] }
 0x1a6   :  { %v838_v11 = vmax.f32 %v802_v49, 0.0  ;;  %v3977_v49 = vld [vmem:[%s7541_s3 + $0x20] sm:$0xf] }
 0x1a8   :  { %v670_v12 = vpop.f32.mrf.mxu0 }
 0x1a9   :  { %v761_v23 = vadd.f32 %v670_v12, %v457_v4  ;;  %v724_v27 = vpop.f32.mrf.mxu1  ;;  %942 = vmatpush.bf16.msrb.mxu2 %v851_v20  ;;  %1175 = vmatpush.bf16.msra.mxu0 %v851_v20  ;;  %v3963_v20 = vld [vmem:[%s7541_s3 + $0x8] sm:$0xf0]  ;;  %v4957_v12 = vld [vmem:[%s7541_s3 + $0x7c] sm:$0xf] }
 0x1aa   :  { %v762_v57 = vadd.f32 %v724_v27, %v511_v3  ;;  %v5886_v61 = vor.u32 %v4943_v59, %v3963_v20  ;;  %v3979_v4 = vld [vmem:[%s7541_s3 + $0x28] sm:$0xf0]  ;;  %v5973_v3 = vor.u32 %v4956_v35, %v4032_v55  ;;  %v5987_v27 = vor.u32 %v4957_v12, %v4042_v29  ;;  %v3987_v59 = vld [vmem:[%s7541_s3 + $0x38] sm:$0xf0] }
 0x1ab   :  { %v803_v56 = vadd.f32 %v5760_v21, %v761_v23  ;;  %v5983_v23 = vor.u32 %v4947_v7, %v3979_v4 }
 0x1ac   :  { %v804_v24 = vadd.f32 %v5762_v19, %v762_v57  ;;  %v4948_v57 = vld [vmem:[%s7541_s3 + $0x24] sm:$0xf0] }
 0x1ad   :  { %943 = vmatpush.bf16.msrb.mxu2 %v5827_v6  ;;  %1176 = vmatpush.bf16.msra.mxu0 %v5827_v6  ;;  %v839_v60 = vmax.f32 %v803_v56, 0.0  ;;  %v4026_v6 = vld [vmem:[%s7541_s3 + $0x60] sm:$0xf0]  ;;  %v4040_v56 = vld [vmem:[%s7541_s3 + $0x78] sm:$0xf] }
 0x1ae   :  { %v840_v21 = vmax.f32 %v804_v24, 0.0  ;;  %v5893_v48 = vor.u32 %v4953_v31, %v4026_v6  ;;  %v4958_v24 = vld [vmem:[%s7541_s3 + $0x7c] sm:$0xf0]  ;;  %v3985_v31 = vld [vmem:[%s7541_s3 + $0x30] sm:$0xf] }
 0x1af   :  { %v857_v15 = vpack.c.bf16 %v839_v60, %v837_v10  ;;  %v6007_v10 = vor.u32 %v4948_v57, %v3977_v49  ;;  %v4949_v60 = vld [vmem:[%s7541_s3 + $0x34] sm:$0xf]  ;;  %v6015_v20 = vor.u32 %v4958_v24, %v4040_v56  ;;  %v4950_v6 = vld [vmem:[%s7541_s3 + $0x34] sm:$0xf0] }
 0x1b0   :  { %v858_v17 = vpack.c.bf16 %v840_v21, %v838_v11  ;;  %v4050_v11 = vld [vmem:[%s7541_s3 + $0x90] sm:$0xf0]  ;;  %v3990_v21 = vor.u32 %v4949_v60, %v3987_v59  ;;  %v3986_v41 = vor.u32 %v4950_v6, %v3985_v31 }
 0x1b1   :  { %944 = vmatpush.bf16.msrb.mxu2 %v5814_v1  ;;  %985 = vmatpush.bf16.msrb.mxu3 %v857_v15 }
 0x1b2   :  { %1177 = vmatpush.bf16.msra.mxu0 %v5814_v1  ;;  %1218 = vmatpush.bf16.msra.mxu1 %v857_v15  ;;  %v798_v1 = vadd.f32 %v5762_v19, %v756_v54  ;;  %v4945_v19 = vld [vmem:[%s7541_s3 + $0x14] sm:$0xf]  ;;  %v6025_v15 = vor.u32 %v4959_v34, %v4050_v11  ;;  %v4961_v54 = vld [vmem:[%s7541_s3 + $0x9c] sm:$0xf] }
 0x1b4   :  { %3999 = vmatmul.msk.bf16.vlgmr.msrb.gmra.mxu3 %vm921_vm3, %v5886_v61  ;;  %v834_v9 = vmax.f32 %v798_v1, 0.0  ;;  %v4021_v1 = vld [vmem:[%s7541_s3 + $0xa8] sm:$0x11] }
 0x1b5   :  { %1061 = vmatpush.bf16.msra.mxu3 %v858_v17  ;;  %945 = vmatpush.bf16.msrb.mxu2 %v5800_v52  ;;  %v1136_v5 = vunpack.c.h.b16 %v4021_v1 }
 0x1b6   :  { %1178 = vmatpush.bf16.msra.mxu0 %v5800_v52  ;;  %4062 = vmatmul.msk.bf16.vlgmr.msra.gmra.mxu1 %vm921_vm3, %v5893_v48  ;;  %v4024_v52 = vld [vmem:[%s7541_s3 + $0x58] sm:$0xf]  ;;  %v856_v42 = vpack.c.bf16 %v836_v39, %v834_v9  ;;  %v902_v39 = vunpack.c.h.b16 %v869_v33 }
 0x1b7   :  { %v5932_v22 = vor.u32 %v4954_v36, %v4024_v52  ;;  %v6089_v9 = vpack.c.b16 %v1136_v5, %v1136_v5  ;;  %v901_v52 = vunpack.c.l.b16 %v869_v33  ;;  %v1135_v36 = vunpack.c.l.b16 %v4021_v1 }
 0x1b8   :  { %v914_v26 = vpack.c.b16 %v902_v39, %v902_v39 }
 0x1b9   :  { %1294 = vmatpush.bf16.msrb.mxu3 %v858_v17  ;;  %946 = vmatpush.bf16.msrb.mxu2 %v5786_v44  ;;  %v3995_v17 = vld [vmem:[%s7541_s3 + $0x48] sm:$0xf0]  ;;  %v6094_v28 = vpack.c.b16 %v901_v52, %v901_v52 }
 0x1ba   :  { %1179 = vmatpush.bf16.msra.mxu0 %v5786_v44  ;;  %v3971_v44 = vld [vmem:[%s7541_s3 + $0x18] sm:$0xf0] }
 0x1bb   :  { %v5942_v63 = vor.u32 %v4945_v19, %v3971_v44 }
 0x1bd   :  { %947 = vmatpush.bf16.msrb.mxu2 %v5772_v30 }
 0x1be   :  { %1180 = vmatpush.bf16.msra.mxu0 %v5772_v30  ;;  %v3969_v30 = vld [vmem:[%s7541_s3 + $0x10] sm:$0xf] }
 0x1bf   :  { %v5965_v18 = vor.u32 %v4946_v13, %v3969_v30 }
 0x1c0   :  { %948 = vmatmul.bf16.vlgmr.msrb.gmra.mxu2 %v5923_v51 }
 0x1c1   :  { %1016 = vmatpush.bf16.msra.mxu2 %v856_v42  ;;  %1181 = vmatmul.bf16.vlgmr.msra.gmra.mxu0 %v5932_v22 }
 0x1c4   :  { %4000 = vmatmul.msk.bf16.gmra.mxu3 %vm921_vm3, %v5942_v63 }
 0x1c5   :  { %1017 = vmatpush.bf16.msra.mxu2 %v854_v62 }
 0x1c6   :  { %4063 = vmatmul.msk.bf16.gmra.mxu1 %vm921_vm3, %v5945_v14 }
 0x1c9   :  { %1018 = vmatpush.bf16.msra.mxu2 %v5843_v8 }
 0x1cd   :  { %1019 = vmatpush.bf16.msra.mxu2 %v5829_v58 }
 0x1d0   :  { %953 = vmatmul.bf16.gmra.mxu2 %v5965_v18 }
 0x1d1   :  { %1020 = vmatpush.bf16.msra.mxu2 %v5816_v38  ;;  %1186 = vmatmul.bf16.gmra.mxu0 %v5973_v3 }
 0x1d4   :  { %4001 = vmatmul.msk.bf16.gmra.mxu3 %vm921_vm3, %v5983_v23 }
 0x1d5   :  { %1021 = vmatpush.bf16.msra.mxu2 %v5802_v53 }
 0x1d6   :  { %4064 = vmatmul.msk.bf16.gmra.mxu1 %vm921_vm3, %v5987_v27 }
 0x1d9   :  { %1022 = vmatpush.bf16.msra.mxu2 %v5788_v37 }
 0x1dd   :  { %1023 = vmatpush.bf16.msra.mxu2 %v5774_v32 }
 0x1e0   :  { %958 = vmatmul.bf16.gmra.mxu2 %v6007_v10 }
 0x1e1   :  { %1249 = vmatpush.bf16.msrb.mxu2 %v856_v42  ;;  %1191 = vmatmul.bf16.gmra.mxu0 %v6015_v20  ;;  %v6096_v42 = vpack.c.b16 %v1135_v36, %v1135_v36 }
 0x1e4   :  { %4002 = vmatmul.msk.bf16.gmra.mxu3 %vm921_vm3, %v3990_v21 }
 0x1e5   :  { %1250 = vmatpush.bf16.msrb.mxu2 %v854_v62 }
 0x1e6   :  { %4065 = vmatmul.msk.bf16.gmra.mxu1 %vm921_vm3, %v6025_v15 }
 0x1e9   :  { %1251 = vmatpush.bf16.msrb.mxu2 %v5843_v8  ;;  %v4960_v8 = vld [vmem:[%s7541_s3 + $0x8c] sm:$0xf0] }
 0x1ea   :  { %v6051_v47 = vor.u32 %v4960_v8, %v4048_v16 }
 0x1ed   :  { %1252 = vmatpush.bf16.msrb.mxu2 %v5829_v58  ;;  %v4951_v58 = vld [vmem:[%s7541_s3 + $0x44] sm:$0xf] }
 0x1ee   :  { %v3998_v40 = vor.u32 %v4951_v58, %v3995_v17 }
 0x1f0   :  { %963 = vmatmul.bf16.gmra.mxu2 %v3986_v41 }
 0x1f1   :  { %1253 = vmatpush.bf16.msrb.mxu2 %v5816_v38  ;;  %v4058_v38 = vld [vmem:[%s7541_s3 + $0xa0] sm:$0xf0]  ;;  %1196 = vmatmul.bf16.gmra.mxu0 %v6051_v47 }
 0x1f2   :  { %v6061_v50 = vor.u32 %v4961_v54, %v4058_v38 }
 0x1f4   :  { %4003 = vmatmul.msk.bf16.gmra.mxu3 %vm921_vm3, %v3998_v40 }
 0x1f5   :  { %1254 = vmatpush.bf16.msrb.mxu2 %v5802_v53  ;;  %v3993_v53 = vld [vmem:[%s7541_s3 + $0x40] sm:$0xf] }
 0x1f6   :  { %4066 = vmatmul.msk.bf16.gmra.mxu1 %vm921_vm3, %v6061_v50  ;;  %v3994_v25 = vor.u32 %v4952_v45, %v3993_v53 }
 0x1f9   :  { %1255 = vmatpush.bf16.msrb.mxu2 %v5788_v37  ;;  %v4056_v37 = vld [vmem:[%s7541_s3 + $0x98] sm:$0xf] }
 0x1fd   :  { %1256 = vmatpush.bf16.msrb.mxu2 %v5774_v32  ;;  %v4962_v32 = vld [vmem:[%s7541_s3 + $0x9c] sm:$0xf0]  ;;  %s5250_s3 = smov 112  }
 0x1fe   :  { %v6086_v2 = vor.u32 %v4962_v32, %v4056_v37 }
 0x200   :  { %968 = vmatmul.bf16.gmra.mxu2 %v3994_v25 }
 0x201   :  { %1201 = vmatmul.bf16.gmra.mxu0 %v6086_v2 }
 0x204   :  { %4004 = vmatmul.msk.bf16.gmra.mxu3 %vm921_vm3, %v914_v26 }
 0x206   :  { %4067 = vmatmul.msk.bf16.gmra.mxu1 %vm921_vm3, %v6089_v9 }
 0x210   :  { %973 = vmatmul.bf16.gmra.mxu2 %v6094_v28 }
 0x211   :  { %1206 = vmatmul.bf16.gmra.mxu0 %v6096_v42 }
 0x214   :  { %4005 = vmatmul.msk.bf16.vlgmr.msra.gmra.mxu3 %vm921_vm3, %v5886_v61 }
 0x220   :  { %1024 = vmatmul.bf16.vlgmr.msra.gmra.mxu2 %v5923_v51 }
 0x224   :  { %4006 = vmatmul.msk.bf16.gmra.mxu3 %vm921_vm3, %v5942_v63 }
 0x230   :  { %1029 = vmatmul.bf16.gmra.mxu2 %v5965_v18 }
 0x233   :  { %v1220_v19 = vpop.f32.mrf.mxu1 }
 0x234   :  { %4007 = vmatmul.msk.bf16.gmra.mxu3 %vm921_vm3, %v5983_v23 }
 0x237   :  { %v987_v44 = vpop.f32.mrf.mxu3 }
 0x23b   :  { %v1222_v43 = vpop.f32.mrf.mxu1 }
 0x23e   :  { %v1182_v46 = vpop.f32.mrf.mxu0 }
 0x23f   :  { %v989_v0 = vpop.f32.mrf.mxu3  ;;  %v1221_v63 = vadd.f32 %v1220_v19, %v1182_v46 }
 0x240   :  { %1034 = vmatmul.bf16.gmra.mxu2 %v6007_v10 }
 0x243   :  { %v949_v62 = vpop.f32.mrf.mxu2  ;;  %v1225_v30 = vpop.f32.mrf.mxu1 }
 0x244   :  { %4008 = vmatmul.msk.bf16.gmra.mxu3 %vm921_vm3, %v3990_v21  ;;  %v988_v13 = vadd.f32 %v987_v44, %v949_v62 }
 0x246   :  { %v1184_v61 = vpop.f32.mrf.mxu0  ;;  %v6110_v4 = vmax.f32 %v988_v13, %v1221_v63 }
 0x247   :  { %v992_v51 = vpop.f32.mrf.mxu3  ;;  %v1223_v55 = vadd.f32 %v1222_v43, %v1184_v61 }
 0x24b   :  { %v951_v35 = vpop.f32.mrf.mxu2  ;;  %v1227_v18 = vpop.f32.mrf.mxu1 }
 0x24c   :  { %v990_v7 = vadd.f32 %v989_v0, %v951_v35 }
 0x24e   :  { %v6112_v12 = vmax.f32 %v990_v7, %v1223_v55  ;;  %v1187_v29 = vpop.f32.mrf.mxu0 }
 0x24f   :  { %v994_v23 = vpop.f32.mrf.mxu3  ;;  %v1226_v59 = vadd.f32 %v1225_v30, %v1187_v29 }
 0x250   :  { %1039 = vmatmul.bf16.gmra.mxu2 %v3986_v41  ;;  %v5150_v49 = vpack.i.bf16 %v6112_v12, %v6110_v4 }
 0x252   :  { %5151 = vrot.lane.b32.xlu0 %v5150_v49, %s5250_s3 }
 0x253   :  { %v954_v57 = vpop.f32.mrf.mxu2  ;;  %v1230_v56 = vpop.f32.mrf.mxu1 }
 0x254   :  { %4009 = vmatmul.msk.bf16.gmra.mxu3 %vm921_vm3, %v3998_v40  ;;  %v993_v60 = vadd.f32 %v992_v51, %v954_v57 }
 0x256   :  { %v1189_v24 = vpop.f32.mrf.mxu0  ;;  %v6118_v6 = vmax.f32 %v993_v60, %v1226_v59 }
 0x257   :  { %v997_v10 = vpop.f32.mrf.mxu3  ;;  %v1228_v34 = vadd.f32 %v1227_v18, %v1189_v24 }
 0x25b   :  { %v956_v11 = vpop.f32.mrf.mxu2  ;;  %v1232_v21 = vpop.f32.mrf.mxu1 }
 0x25c   :  { %v995_v31 = vadd.f32 %v994_v23, %v956_v11 }
 0x25e   :  { %v6120_v16 = vmax.f32 %v995_v31, %v1228_v34  ;;  %v1192_v8 = vpop.f32.mrf.mxu0 }
 0x25f   :  { %v999_v41 = vpop.f32.mrf.mxu3  ;;  %v1231_v45 = vadd.f32 %v1230_v56, %v1192_v8 }
 0x260   :  { %1044 = vmatmul.bf16.gmra.mxu2 %v3994_v25  ;;  %v5160_v58 = vpack.i.bf16 %v6120_v16, %v6118_v6 }
 0x262   :  { %5161 = vrot.lane.b32.xlu1 %v5160_v58, %s5250_s3 }
 0x263   :  { %v959_v17 = vpop.f32.mrf.mxu2  ;;  %v1235_v54 = vpop.f32.mrf.mxu1 }
 0x264   :  { %4010 = vmatmul.msk.bf16.gmra.mxu3 %vm921_vm3, %v914_v26  ;;  %v998_v53 = vadd.f32 %v997_v10, %v959_v17 }
 0x266   :  { %v1194_v38 = vpop.f32.mrf.mxu0  ;;  %v6128_v39 = vmax.f32 %v998_v53, %v1231_v45 }
 0x267   :  { %v1002_v40 = vpop.f32.mrf.mxu3  ;;  %v1233_v33 = vadd.f32 %v1232_v21, %v1194_v38 }
 0x26b   :  { %v961_v37 = vpop.f32.mrf.mxu2  ;;  %v6126_v32 = vpop.f32.mrf.mxu1 }
 0x26c   :  { %v1000_v1 = vadd.f32 %v999_v41, %v961_v37 }
 0x26e   :  { %v6130_v25 = vmax.f32 %v1000_v1, %v1233_v33  ;;  %v1197_v5 = vpop.f32.mrf.mxu0 }
 0x26f   :  { %v1004_v52 = vpop.f32.mrf.mxu3  ;;  %v1236_v36 = vadd.f32 %v1235_v54, %v1197_v5 }
 0x270   :  { %1049 = vmatmul.bf16.gmra.mxu2 %v6094_v28  ;;  %v5170_v26 = vpack.i.bf16 %v6130_v25, %v6128_v39 }
 0x272   :  { %5171 = vrot.lane.b32.xlu2 %v5170_v26, %s5250_s3 }
 0x273   :  { %v964_v19 = vpop.f32.mrf.mxu2  ;;  %v1240_v44 = vpop.f32.mrf.mxu1 }
 0x274   :  { %v1003_v43 = vadd.f32 %v1002_v40, %v964_v19  ;;  %4068 = vmatmul.msk.bf16.vlgmr.msrb.gmra.mxu3 %vm921_vm3, %v5893_v48 }
 0x276   :  { %v6138_v46 = vmax.f32 %v1003_v43, %v1236_v36  ;;  %v6140_v0 = vpop.f32.mrf.mxu0 }
 0x277   :  { %v1007_v62 = vpop.f32.mrf.mxu3 }
 0x27b   :  { %v966_v30 = vpop.f32.mrf.mxu2  ;;  %v6142_v61 = vpop.f32.mrf.mxu1 }
 0x27c   :  { %v6144_v28 = vadd.f32 %v1004_v52, %v966_v30 }
 0x27e   :  { %v1202_v51 = vpop.f32.mrf.mxu0 }
 0x27f   :  { %v1009_v13 = vpop.f32.mrf.mxu3  ;;  %v1241_v63 = vadd.f32 %v1240_v44, %v1202_v51 }
 0x280   :  { %1257 = vmatmul.bf16.vlgmr.msrb.gmra.mxu2 %v5932_v22 }
 0x283   :  { %v969_v55 = vpop.f32.mrf.mxu2  ;;  %v1245_v35 = vpop.f32.mrf.mxu1 }
 0x284   :  { %v1008_v18 = vadd.f32 %v1007_v62, %v969_v55  ;;  %4069 = vmatmul.msk.bf16.gmra.mxu3 %vm921_vm3, %v5945_v14 }
 0x286   :  { %v6149_v48 = vmax.f32 %v1008_v18, %v1241_v63  ;;  %v6151_v7 = vpop.f32.mrf.mxu0 }
 0x287   :  { %v1012_v29 = vpop.f32.mrf.mxu3 }
 0x28b   :  { %v971_v23 = vpop.f32.mrf.mxu2  ;;  %v1247_v49 = vpop.f32.mrf.mxu1 }
 0x28c   :  { %v6153_v57 = vadd.f32 %v1009_v13, %v971_v23  ;;  %v1238_v49 = vadd.f32 %v6126_v32, %v6140_v0 }
 0x28e   :  { %v1207_v56 = vpop.f32.mrf.mxu0 }
 0x28f   :  { %v1014_v24 = vpop.f32.mrf.mxu3  ;;  %v1246_v10 = vadd.f32 %v1245_v35, %v1207_v56 }
 0x290   :  { %1262 = vmatmul.bf16.gmra.mxu2 %v5973_v3 }
 0x293   :  { %v974_v22 = vpop.f32.mrf.mxu2 }
 0x294   :  { %v1013_v60 = vadd.f32 %v1012_v29, %v974_v22  ;;  %4070 = vmatmul.msk.bf16.gmra.mxu3 %vm921_vm3, %v5987_v27 }
 0x296   :  { %v6158_v14 = vmax.f32 %v1013_v60, %v1246_v10  ;;  %v1209_v59 = vpop.f32.mrf.mxu0  ;;  %v6192_v10 = vmax.f32 %v6144_v28, %v1238_v49 }
 0x297   :  { %v1063_v34 = vpop.f32.mrf.mxu3 }
 0x298   :  { %v5180_v60 = vpack.i.bf16 %v6192_v10, %v6138_v46 }
 0x29b   :  { %v976_v11 = vpop.f32.mrf.mxu2 }
 0x29f   :  { %v1065_v21 = vpop.f32.mrf.mxu3 }
 0x2a0   :  { %1267 = vmatmul.bf16.gmra.mxu2 %v6015_v20 }
 0x2a3   :  { %v1025_v31 = vpop.f32.mrf.mxu2 }
 0x2a4   :  { %v1064_v8 = vadd.f32 %v1063_v34, %v1025_v31  ;;  %4071 = vmatmul.msk.bf16.gmra.mxu3 %vm921_vm3, %v6025_v15 }
 0x2a7   :  { %v1068_v41 = vpop.f32.mrf.mxu3 }
 0x2ab   :  { %v1027_v3 = vpop.f32.mrf.mxu2 }
 0x2ac   :  { %v1066_v55 = vadd.f32 %v1065_v21, %v1027_v3 }
 0x2af   :  { %v1070_v58 = vpop.f32.mrf.mxu3 }
 0x2b0   :  { %1272 = vmatmul.bf16.gmra.mxu2 %v6051_v47 }
 0x2b3   :  { %v1030_v17 = vpop.f32.mrf.mxu2 }
 0x2b4   :  { %v1069_v27 = vadd.f32 %v1068_v41, %v1030_v17  ;;  %4072 = vmatmul.msk.bf16.gmra.mxu3 %vm921_vm3, %v6061_v50 }
 0x2b7   :  { %v1073_v54 = vpop.f32.mrf.mxu3 }
 0x2bb   :  { %v1032_v38 = vpop.f32.mrf.mxu2 }
 0x2bc   :  { %v1071_v11 = vadd.f32 %v1070_v58, %v1032_v38  ;;  %v1243_v38 = vadd.f32 %v6142_v61, %v6151_v7  ;;  %v4970_v61 = vld [vmem:[%s7542_s4 + $0x38] sm:$0xff] }
 0x2bd   :  { %v4978_v7 = vld [vmem:[%s7542_s4 + $0x78] sm:$0xff]  ;;  %1578 = vmatpush.bf16.msrb.mxu0 %v4970_v61 }
 0x2be   :  { %1616 = vmatpush.bf16.msrb.mxu1 %v4978_v7 }
 0x2bf   :  { %v1075_v40 = vpop.f32.mrf.mxu3 }
 0x2c0   :  { %1277 = vmatmul.bf16.gmra.mxu2 %v6086_v2 }
 0x2c3   :  { %v1035_v20 = vpop.f32.mrf.mxu2 }
 0x2c4   :  { %v1074_v53 = vadd.f32 %v1073_v54, %v1035_v20  ;;  %4073 = vmatmul.msk.bf16.gmra.mxu3 %vm921_vm3, %v6089_v9 }
 0x2c7   :  { %v1078_v15 = vpop.f32.mrf.mxu3 }
 0x2cb   :  { %v1037_v45 = vpop.f32.mrf.mxu2 }
 0x2cc   :  { %v1076_v54 = vadd.f32 %v1075_v40, %v1037_v45 }
 0x2cf   :  { %v6169_v33 = vpop.f32.mrf.mxu3 }
 0x2d0   :  { %1282 = vmatmul.bf16.gmra.mxu2 %v6096_v42 }
 0x2d3   :  { %v1040_v47 = vpop.f32.mrf.mxu2 }
 0x2d4   :  { %v6172_v37 = vadd.f32 %v1078_v15, %v1040_v47 }
 0x2d7   :  { %v1083_v50 = vpop.f32.mrf.mxu3 }
 0x2db   :  { %v1042_v1 = vpop.f32.mrf.mxu2 }
 0x2df   :  { %v6174_v5 = vpop.f32.mrf.mxu3 }
 0x2e3   :  { %v1045_v52 = vpop.f32.mrf.mxu2 }
 0x2e4   :  { %v6176_v2 = vadd.f32 %v1083_v50, %v1045_v52  ;;  %v6214_v52 = vmax.f32 %v6153_v57, %v1243_v38 }
 0x2e6   :  { %v5190_v40 = vpack.i.bf16 %v6214_v52, %v6149_v48 }
 0x2e7   :  { %v1088_v36 = vpop.f32.mrf.mxu3 }
 0x2eb   :  { %v6178_v26 = vpop.f32.mrf.mxu2 }
 0x2ef   :  { %v1090_v9 = vpop.f32.mrf.mxu3 }
 0x2f0   :  { %v1081_v9 = vadd.f32 %v6169_v33, %v1042_v1  ;;  %v4968_v1 = vld [vmem:[%s7542_s4 + $0x28] sm:$0xff] }
 0x2f3   :  { %v1050_v19 = vpop.f32.mrf.mxu2 }
 0x2f4   :  { %v6180_v44 = vadd.f32 %v1088_v36, %v1050_v19  ;;  %v4969_v19 = vld [vmem:[%s7542_s4 + $0x30] sm:$0xff] }
 0x2f5   :  { %1579 = vmatpush.bf16.msrb.mxu0 %v4969_v19 }
 0x2f7   :  { %v1296_v43 = vpop.f32.mrf.mxu3 }
 0x2f9   :  { %1580 = vmatpush.bf16.msrb.mxu0 %v4968_v1  ;;  %v5162_v1 = vpop.permute.xlu1 %5161 }
 0x2fb   :  { %v1052_v62 = vpop.f32.mrf.mxu2 }
 0x2ff   :  { %v1298_v42 = vpop.f32.mrf.mxu3 }
 0x303   :  { %v1258_v30 = vpop.f32.mrf.mxu2 }
 0x304   :  { %v1297_v13 = vadd.f32 %v1296_v43, %v1258_v30  ;;  %v4977_v43 = vld [vmem:[%s7542_s4 + $0x70] sm:$0xff] }
 0x305   :  { %1617 = vmatpush.bf16.msrb.mxu1 %v4977_v43 }
 0x306   :  { %v6182_v18 = vmax.f32 %v1064_v8, %v1297_v13  ;;  %v4967_v13 = vld [vmem:[%s7542_s4 + $0x20] sm:$0xff] }
 0x307   :  { %v1301_v51 = vpop.f32.mrf.mxu3  ;;  %1581 = vmatpush.bf16.msrb.mxu0 %v4967_v13  ;;  %v5164_v13 = vunpack.i.h.bf16 %v5162_v1 }
 0x30b   :  { %v1260_v63 = vpop.f32.mrf.mxu2 }
 0x30c   :  { %v1299_v35 = vadd.f32 %v1298_v42, %v1260_v63  ;;  %v4975_v63 = vld [vmem:[%s7542_s4 + $0x60] sm:$0xff] }
 0x30e   :  { %v6184_v29 = vmax.f32 %v1066_v55, %v1299_v35  ;;  %v4966_v35 = vld [vmem:[%s7542_s4 + $0x18] sm:$0xff] }
 0x30f   :  { %v1303_v23 = vpop.f32.mrf.mxu3  ;;  %1582 = vmatpush.bf16.msrb.mxu0 %v4966_v35 }
 0x310   :  { %v5155_v56 = vpack.i.bf16 %v6184_v29, %v6182_v18 }
 0x312   :  { %5156 = vrot.lane.b32.xlu0 %v5155_v56, %s5250_s3 }
 0x313   :  { %v1263_v24 = vpop.f32.mrf.mxu2 }
 0x314   :  { %v1302_v59 = vadd.f32 %v1301_v51, %v1263_v24  ;;  %v4976_v51 = vld [vmem:[%s7542_s4 + $0x68] sm:$0xff]  ;;  %v1086_v24 = vadd.f32 %v6174_v5, %v6178_v26 }
 0x315   :  { %1618 = vmatpush.bf16.msrb.mxu1 %v4976_v51  ;;  %v5172_v51 = vpop.permute.xlu2 %5171 }
 0x316   :  { %v6197_v32 = vmax.f32 %v1069_v27, %v1302_v59  ;;  %v4973_v59 = vld [vmem:[%s7542_s4 + $0x50] sm:$0xff] }
 0x317   :  { %v1306_v22 = vpop.f32.mrf.mxu3 }
 0x319   :  { %1619 = vmatpush.bf16.msrb.mxu1 %v4975_v63  ;;  %v5163_v63 = vunpack.i.l.bf16 %v5162_v1  ;;  %v4270_v1 = vld [vmem:[%s7543_s5 + $0x68] sm:$0xf0] }
 0x31a   :  { %5181 = vrot.lane.b32.xlu0 %v5180_v60, %s5250_s3  ;;  %v4965_v60 = vld [vmem:[%s7542_s4 + $0x10] sm:$0xff] }
 0x31b   :  { %v1265_v34 = vpop.f32.mrf.mxu2  ;;  %1583 = vmatpush.bf16.msrb.mxu0 %v4965_v60 }
 0x31c   :  { %v1304_v21 = vadd.f32 %v1303_v23, %v1265_v34  ;;  %v4974_v23 = vld [vmem:[%s7542_s4 + $0x58] sm:$0xff] }
 0x31d   :  { %1620 = vmatpush.bf16.msrb.mxu1 %v4974_v23 }
 0x31e   :  { %v6199_v0 = vmax.f32 %v1071_v11, %v1304_v21 }
 0x31f   :  { %v1308_v31 = vpop.f32.mrf.mxu3 }
 0x320   :  { %v5165_v8 = vpack.i.bf16 %v6199_v0, %v6197_v32 }
 0x321   :  { %1621 = vmatpush.bf16.msrb.mxu1 %v4973_v59 }
 0x322   :  { %5166 = vrot.lane.b32.xlu1 %v5165_v8, %s5250_s3 }
 0x323   :  { %v1268_v28 = vpop.f32.mrf.mxu2 }
 0x324   :  { %v1307_v3 = vadd.f32 %v1306_v22, %v1268_v28 }
 0x326   :  { %v6204_v15 = vmax.f32 %v1074_v53, %v1307_v3  ;;  %v4972_v3 = vld [vmem:[%s7542_s4 + $0x48] sm:$0xff] }
 0x327   :  { %v1311_v41 = vpop.f32.mrf.mxu3  ;;  %1622 = vmatpush.bf16.msrb.mxu1 %v4972_v3 }
 0x32b   :  { %v1270_v17 = vpop.f32.mrf.mxu2 }
 0x32c   :  { %v1309_v20 = vadd.f32 %v1308_v31, %v1270_v17  ;;  %v4971_v17 = vld [vmem:[%s7542_s4 + $0x40] sm:$0xff] }
 0x32d   :  { %1623 = vmatpush.bf16.msrb.mxu1 %v4971_v17 }
 0x32e   :  { %v6206_v58 = vmax.f32 %v1076_v54, %v1309_v20  ;;  %v5152_v54 = vpop.permute.xlu0 %5151  ;;  %v1391_v20 = vlaneseq }
 0x32f   :  { %v1313_v27 = vpop.f32.mrf.mxu3 }
 0x330   :  { %v5175_v47 = vpack.i.bf16 %v6206_v58, %v6204_v15 }
 0x332   :  { %5176 = vrot.lane.b32.xlu2 %v5175_v47, %s5250_s3  ;;  %v5154_v47 = vunpack.i.h.bf16 %v5152_v54 }
 0x333   :  { %v1273_v50 = vpop.f32.mrf.mxu2 }
 0x334   :  { %v1312_v53 = vadd.f32 %v1311_v41, %v1273_v50  ;;  %v4964_v41 = vld [vmem:[%s7542_s4 + $0x8] sm:$0xff]  ;;  %v5153_v50 = vunpack.i.l.bf16 %v5152_v54 }
 0x335   :  { %1584 = vmatpush.bf16.msrb.mxu0 %v4964_v41 }
 0x336   :  { %v6233_v62 = vmax.f32 %v6172_v37, %v1312_v53 }
 0x337   :  { %v1316_v36 = vpop.f32.mrf.mxu3 }
 0x33a   :  { %5191 = vrot.lane.b32.xlu2 %v5190_v40, %s5250_s3 }
 0x33b   :  { %v1275_v45 = vpop.f32.mrf.mxu2 }
 0x33c   :  { %v1314_v57 = vadd.f32 %v1313_v27, %v1275_v45  ;;  %v6292_v27 = vand.u32 127, %v1391_v20 }
 0x33e   :  { %v6235_v42 = vmax.f32 %v1081_v9, %v1314_v57  ;;  %7555 = vst [vmem:[#allocation2_spill] sm:$0xff] %v6292_v27  ;;  %vm1393_vm4 = vcmp.lt.s32.totalorder %v6292_v27, 112 }
 0x33f   :  { %v1318_v30 = vpop.f32.mrf.mxu3 }
 0x340   :  { %v5185_v33 = vpack.i.bf16 %v6235_v42, %v6233_v62 }
 0x342   :  { %5186 = vrot.lane.b32.xlu1 %v5185_v33, %s5250_s3 }
 0x343   :  { %v1278_v37 = vpop.f32.mrf.mxu2 }
 0x344   :  { %v1317_v49 = vadd.f32 %v1316_v36, %v1278_v37 }
 0x346   :  { %v6267_v34 = vmax.f32 %v6176_v2, %v1317_v49 }
 0x347   :  { %v1321_v55 = vpop.f32.mrf.mxu3 }
 0x34b   :  { %v1280_v56 = vpop.f32.mrf.mxu2 }
 0x34c   :  { %v1319_v22 = vadd.f32 %v1318_v30, %v1280_v56 }
 0x34e   :  { %v6269_v11 = vmax.f32 %v1086_v24, %v1319_v22 }
 0x34f   :  { %v1323_v21 = vpop.f32.mrf.mxu3 }
 0x350   :  { %v5195_v5 = vpack.i.bf16 %v6269_v11, %v6267_v34 }
 0x352   :  { %5196 = vrot.lane.b32.xlu0 %v5195_v5, %s5250_s3 }
 0x353   :  { %v1283_v26 = vpop.f32.mrf.mxu2 }
 0x354   :  { %v1322_v31 = vadd.f32 %v1321_v55, %v1283_v26  ;;  %v5174_v26 = vunpack.i.h.bf16 %v5172_v51 }
 0x356   :  { %v6275_v8 = vmax.f32 %v6180_v44, %v1322_v31  ;;  %v4963_v44 = vld [vmem:[%s7542_s4] sm:$0xff]  ;;  %v5173_v31 = vunpack.i.l.bf16 %v5172_v51 }
 0x357   :  { %1585 = vmatpush.bf16.msrb.mxu0 %v4963_v44 }
 0x358   :  { %v5200_v28 = vpack.i.bf16 %v6275_v8, %v6158_v14 }
 0x35a   :  { %5201 = vrot.lane.b32.xlu1 %v5200_v28, %s5250_s3 }
 0x35b   :  { %v1285_v2 = vpop.f32.mrf.mxu2 }
 0x384   :  { %v5157_v38 = vpop.permute.xlu0 %5156 }
 0x385   :  { %v5159_v36 = vunpack.i.h.bf16 %v5157_v38  ;;  %v5158_v40 = vunpack.i.l.bf16 %v5157_v38 }
 0x387   :  { %v1394_v53 = vsel %vm1393_vm4, %v5153_v50, %v5158_v40  ;;  %v1395_v61 = vsel %vm1393_vm4, %v5154_v47, %v5159_v36  ;;  %v1405_v7 = vsel %vm1393_vm4, %v5158_v40, %v5153_v50  ;;  %v1406_v45 = vsel %vm1393_vm4, %v5159_v36, %v5154_v47 }
 0x388   :  { %v1416_v9 = vmax.f32 %v6110_v4, %v1394_v53  ;;  %v1417_v57 = vmax.f32 %v6182_v18, %v1405_v7  ;;  %v1418_v19 = vmax.f32 %v6112_v12, %v1395_v61  ;;  %v1419_v43 = vmax.f32 %v6184_v29, %v1406_v45 }
 0x38a   :  { %v1438_v30 = vpack.c.bf16 %v1418_v19, %v1416_v9  ;;  %v1439_v33 = vpack.c.bf16 %v1419_v43, %v1417_v57  ;;  %v4276_v57 = vld [vmem:[%s7543_s5 + $0x70] sm:$0xf]  ;;  %v4994_v19 = vld [vmem:[%s7543_s5 + $0x74] sm:$0xf0]  ;;  %v4992_v43 = vld [vmem:[%s7543_s5 + $0x64] sm:$0xf0] }
 0x38c   :  { %1586 = vmatmul.bf16.vlgmr.msrb.gmra.mxu0 %v1438_v30  ;;  %1624 = vmatmul.bf16.vlgmr.msrb.gmra.mxu1 %v1439_v33  ;;  %v5177_v59 = vpop.permute.xlu2 %5176  ;;  %v5182_v54 = vpop.permute.xlu0 %5181  ;;  %v4991_v33 = vld [vmem:[%s7543_s5 + $0x64] sm:$0xf] }
 0x38d   :  { %v5179_v21 = vunpack.i.h.bf16 %v5177_v59  ;;  %v5178_v5 = vunpack.i.l.bf16 %v5177_v59  ;;  %v5184_v38 = vunpack.i.h.bf16 %v5182_v54  ;;  %v5183_v47 = vunpack.i.l.bf16 %v5182_v54 }
 0x38f   :  { %v1398_v28 = vsel %vm1393_vm4, %v5173_v31, %v5178_v5 }
 0x394   :  { %v5167_v37 = vpop.permute.xlu1 %5166 }
 0x395   :  { %v5169_v55 = vunpack.i.h.bf16 %v5167_v37  ;;  %v5168_v35 = vunpack.i.l.bf16 %v5167_v37  ;;  %v4273_v37 = vor.u32 %v4991_v33, %v4270_v1 }
 0x397   :  { %v1396_v4 = vsel %vm1393_vm4, %v5163_v63, %v5168_v35  ;;  %v1397_v18 = vsel %vm1393_vm4, %v5164_v13, %v5169_v55  ;;  %v1407_v12 = vsel %vm1393_vm4, %v5168_v35, %v5163_v63  ;;  %v1408_v29 = vsel %vm1393_vm4, %v5169_v55, %v5164_v13  ;;  %v4260_v13 = vld [vmem:[%s7543_s5 + $0x50] sm:$0xf]  ;;  %v4990_v63 = vld [vmem:[%s7543_s5 + $0x54] sm:$0xf0]  ;;  %v4989_v55 = vld [vmem:[%s7543_s5 + $0x54] sm:$0xf] }
 0x398   :  { %v1420_v23 = vmax.f32 %v6118_v6, %v1396_v4  ;;  %v1422_v49 = vmax.f32 %v6120_v16, %v1397_v18  ;;  %v1421_v56 = vmax.f32 %v6197_v32, %v1407_v12  ;;  %v1423_v24 = vmax.f32 %v6199_v0, %v1408_v29  ;;  %v4262_v35 = vld [vmem:[%s7543_s5 + $0x58] sm:$0xf0]  ;;  %v5192_v4 = vpop.permute.xlu2 %5191  ;;  %v4252_v12 = vld [vmem:[%s7543_s5 + $0x40] sm:$0xf]  ;;  %v4988_v29 = vld [vmem:[%s7543_s5 + $0x44] sm:$0xf0] }
 0x399   :  { %v1399_v6 = vsel %vm1393_vm4, %v5174_v26, %v5179_v21  ;;  %v1409_v16 = vsel %vm1393_vm4, %v5178_v5, %v5173_v31  ;;  %v1410_v32 = vsel %vm1393_vm4, %v5179_v21, %v5174_v26  ;;  %v1424_v0 = vmax.f32 %v6128_v39, %v1398_v28  ;;  %v4987_v21 = vld [vmem:[%s7543_s5 + $0x44] sm:$0xf]  ;;  %v4254_v5 = vld [vmem:[%s7543_s5 + $0x48] sm:$0xf0] }
 0x39a   :  { %v1440_v22 = vpack.c.bf16 %v1422_v49, %v1420_v23  ;;  %v1441_v60 = vpack.c.bf16 %v1423_v24, %v1421_v56  ;;  %v1426_v2 = vmax.f32 %v6130_v25, %v1399_v6  ;;  %v1425_v41 = vmax.f32 %v6204_v15, %v1409_v16 }
 0x39b   :  { %v1427_v3 = vmax.f32 %v6206_v58, %v1410_v32  ;;  %v4261_v18 = vor.u32 %v4990_v63, %v4260_v13  ;;  %v4265_v49 = vor.u32 %v4989_v55, %v4262_v35  ;;  %v5194_v56 = vunpack.i.h.bf16 %v5192_v4  ;;  %v5007_v13 = vld [vmem:[%s7543_s5 + $0xe4] sm:$0xf]  ;;  %v4206_v55 = vld [vmem:[%s7543_s5 + $0xe8] sm:$0xf0] }
 0x39c   :  { %1591 = vmatmul.bf16.gmra.mxu0 %v1440_v22  ;;  %1629 = vmatmul.bf16.gmra.mxu1 %v1441_v60  ;;  %v1442_v44 = vpack.c.bf16 %v1426_v2, %v1424_v0  ;;  %v5193_v24 = vunpack.i.l.bf16 %v5192_v4  ;;  %v4253_v59 = vor.u32 %v4988_v29, %v4252_v12  ;;  %v4209_v35 = vor.u32 %v5007_v13, %v4206_v55  ;;  %v4220_v4 = vld [vmem:[%s7543_s5] sm:$0xf]  ;;  %v4979_v12 = vld [vmem:[%s7543_s5 + $0x4] sm:$0xf] }
 0x39d   :  { %v1443_v17 = vpack.c.bf16 %v1427_v3, %v1425_v41  ;;  %v4244_v41 = vld [vmem:[%s7543_s5 + $0x30] sm:$0xf]  ;;  %v4986_v3 = vld [vmem:[%s7543_s5 + $0x34] sm:$0xf0] }
 0x3ac   :  { %1596 = vmatmul.bf16.gmra.mxu0 %v1442_v44  ;;  %1634 = vmatmul.bf16.gmra.mxu1 %v1443_v17  ;;  %v4257_v44 = vor.u32 %v4987_v21, %v4254_v5  ;;  %v4188_v5 = vld [vmem:[%s7543_s5 + $0xc0] sm:$0xf] }
 0x3b4   :  { %v5187_v20 = vpop.permute.xlu1 %5186 }
 0x3b5   :  { %v5189_v50 = vunpack.i.h.bf16 %v5187_v20  ;;  %v5188_v36 = vunpack.i.l.bf16 %v5187_v20 }
 0x3b7   :  { %v1400_v40 = vsel %vm1393_vm4, %v5183_v47, %v5188_v36  ;;  %v1401_v39 = vsel %vm1393_vm4, %v5184_v38, %v5189_v50  ;;  %v1411_v25 = vsel %vm1393_vm4, %v5188_v36, %v5183_v47  ;;  %v1412_v15 = vsel %vm1393_vm4, %v5189_v50, %v5184_v38 }
 0x3b8   :  { %v1428_v58 = vmax.f32 %v6138_v46, %v1400_v40  ;;  %v1430_v53 = vmax.f32 %v6192_v10, %v1401_v39  ;;  %v1429_v61 = vmax.f32 %v6233_v62, %v1411_v25  ;;  %v1431_v7 = vmax.f32 %v6235_v42, %v1412_v15  ;;  %v4993_v46 = vld [vmem:[%s7543_s5 + $0x74] sm:$0xf]  ;;  %v4278_v62 = vld [vmem:[%s7543_s5 + $0x78] sm:$0xf0]  ;;  %v4268_v42 = vld [vmem:[%s7543_s5 + $0x60] sm:$0xf] }
 0x3b9   :  { %v4277_v10 = vor.u32 %v4994_v19, %v4276_v57  ;;  %v4281_v30 = vor.u32 %v4993_v46, %v4278_v62  ;;  %v4269_v51 = vor.u32 %v4992_v43, %v4268_v42  ;;  %v5009_v19 = vld [vmem:[%s7543_s5 + $0xf4] sm:$0xf]  ;;  %v4214_v46 = vld [vmem:[%s7543_s5 + $0xf8] sm:$0xf0]  ;;  %v4982_v42 = vld [vmem:[%s7543_s5 + $0x14] sm:$0xf0] }
 0x3ba   :  { %v1444_v45 = vpack.c.bf16 %v1430_v53, %v1428_v58  ;;  %v1445_v9 = vpack.c.bf16 %v1431_v7, %v1429_v61  ;;  %v4236_v58 = vld [vmem:[%s7543_s5 + $0x20] sm:$0xf]  ;;  %v4984_v53 = vld [vmem:[%s7543_s5 + $0x24] sm:$0xf0]  ;;  %v4983_v61 = vld [vmem:[%s7543_s5 + $0x24] sm:$0xf]  ;;  %v4217_v62 = vor.u32 %v5009_v19, %v4214_v46 }
 0x3bb   :  { %1970 = vmatpush.bf16.msra.mxu0 %v4277_v10  ;;  %2004 = vmatpush.bf16.msra.mxu1 %v4281_v30  ;;  %v4237_v7 = vor.u32 %v4984_v53, %v4236_v58  ;;  %v4228_v10 = vld [vmem:[%s7543_s5 + $0x10] sm:$0xf]  ;;  %v4981_v43 = vld [vmem:[%s7543_s5 + $0x14] sm:$0xf]  ;;  %v4230_v30 = vld [vmem:[%s7543_s5 + $0x18] sm:$0xf0] }
 0x3bc   :  { %1601 = vmatmul.bf16.gmra.mxu0 %v1444_v45  ;;  %1639 = vmatmul.bf16.gmra.mxu1 %v1445_v9  ;;  %v5010_v45 = vld [vmem:[%s7543_s5 + $0xf4] sm:$0xf0]  ;;  %v4229_v33 = vor.u32 %v4982_v42, %v4228_v10  ;;  %v4233_v1 = vor.u32 %v4981_v43, %v4230_v30  ;;  %v4158_v53 = vld [vmem:[%s7543_s5 + $0x88] sm:$0xf0] }
 0x3bd   :  { %1856 = vmatpush.bf16.msra.mxu3 %v4217_v62 }
 0x3bf   :  { %1971 = vmatpush.bf16.msra.mxu0 %v4269_v51  ;;  %2005 = vmatpush.bf16.msra.mxu1 %v4273_v37  ;;  %v4204_v51 = vld [vmem:[%s7543_s5 + $0xe0] sm:$0xf]  ;;  %v5008_v37 = vld [vmem:[%s7543_s5 + $0xe4] sm:$0xf0] }
 0x3c0   :  { %v4205_v63 = vor.u32 %v5008_v37, %v4204_v51 }
 0x3c1   :  { %1857 = vmatpush.bf16.msra.mxu3 %v4209_v35 }
 0x3c3   :  { %1972 = vmatpush.bf16.msra.mxu0 %v4261_v18  ;;  %2006 = vmatpush.bf16.msra.mxu1 %v4265_v49  ;;  %v4980_v18 = vld [vmem:[%s7543_s5 + $0x4] sm:$0xf0]  ;;  %v4196_v49 = vld [vmem:[%s7543_s5 + $0xd0] sm:$0xf] }
 0x3c4   :  { %v5197_v23 = vpop.permute.xlu0 %5196  ;;  %v4221_v29 = vor.u32 %v4980_v18, %v4220_v4 }
 0x3c5   :  { %v5199_v22 = vunpack.i.h.bf16 %v5197_v23  ;;  %v5198_v60 = vunpack.i.l.bf16 %v5197_v23  ;;  %v4222_v23 = vld [vmem:[%s7543_s5 + $0x8] sm:$0xf0] }
 0x3c7   :  { %v1403_v26 = vsel %vm1393_vm4, %v5194_v56, %v5199_v22  ;;  %v1414_v31 = vsel %vm1393_vm4, %v5199_v22, %v5194_v56  ;;  %v1402_v28 = vsel %vm1393_vm4, %v5193_v24, %v5198_v60  ;;  %v1413_v6 = vsel %vm1393_vm4, %v5198_v60, %v5193_v24  ;;  %1973 = vmatpush.bf16.msra.mxu0 %v4253_v59  ;;  %v5006_v56 = vld [vmem:[%s7543_s5 + $0xd4] sm:$0xf0]  ;;  %v5005_v60 = vld [vmem:[%s7543_s5 + $0xd4] sm:$0xf]  ;;  %v4198_v59 = vld [vmem:[%s7543_s5 + $0xd8] sm:$0xf0] }
 0x3c8   :  { %v1432_v16 = vmax.f32 %v6149_v48, %v1402_v28  ;;  %v1434_v32 = vmax.f32 %v6214_v52, %v1403_v26  ;;  %v1433_v0 = vmax.f32 %v6267_v34, %v1413_v6  ;;  %v1435_v2 = vmax.f32 %v6269_v11, %v1414_v31  ;;  %v4985_v48 = vld [vmem:[%s7543_s5 + $0x34] sm:$0xf]  ;;  %v4246_v52 = vld [vmem:[%s7543_s5 + $0x38] sm:$0xf0]  ;;  %2007 = vmatpush.bf16.msra.mxu1 %v4257_v44  ;;  %v5004_v26 = vld [vmem:[%s7543_s5 + $0xc4] sm:$0xf0] }
 0x3c9   :  { %v4245_v34 = vor.u32 %v4986_v3, %v4244_v41  ;;  %v4249_v20 = vor.u32 %v4985_v48, %v4246_v52  ;;  %v4225_v24 = vor.u32 %v4979_v12, %v4222_v23  ;;  %v4197_v22 = vor.u32 %v5006_v56, %v4196_v49  ;;  %v5003_v31 = vld [vmem:[%s7543_s5 + $0xc4] sm:$0xf]  ;;  %v4190_v6 = vld [vmem:[%s7543_s5 + $0xc8] sm:$0xf0]  ;;  %v4182_v3 = vld [vmem:[%s7543_s5 + $0xb8] sm:$0xf0] }
 0x3ca   :  { %v1446_v17 = vpack.c.bf16 %v1434_v32, %v1432_v16  ;;  %v1447_v54 = vpack.c.bf16 %v1435_v2, %v1433_v0  ;;  %v4201_v21 = vor.u32 %v5005_v60, %v4198_v59  ;;  %v4189_v28 = vor.u32 %v5004_v26, %v4188_v5  ;;  %v4180_v32 = vld [vmem:[%s7543_s5 + $0xb0] sm:$0xf]  ;;  %v5002_v0 = vld [vmem:[%s7543_s5 + $0xb4] sm:$0xf0]  ;;  %v5001_v2 = vld [vmem:[%s7543_s5 + $0xb4] sm:$0xf] }
 0x3cb   :  { %1974 = vmatpush.bf16.msra.mxu0 %v4245_v34  ;;  %v4193_v16 = vor.u32 %v5003_v31, %v4190_v6  ;;  %v4181_v41 = vor.u32 %v5002_v0, %v4180_v32  ;;  %v4172_v44 = vld [vmem:[%s7543_s5 + $0xa0] sm:$0xf]  ;;  %v4999_v48 = vld [vmem:[%s7543_s5 + $0xa4] sm:$0xf]  ;;  %v4174_v52 = vld [vmem:[%s7543_s5 + $0xa8] sm:$0xf0] }
 0x3cc   :  { %v5202_v11 = vpop.permute.xlu1 %5201  ;;  %1606 = vmatmul.bf16.gmra.mxu0 %v1446_v17  ;;  %1644 = vmatmul.bf16.gmra.mxu1 %v1447_v54  ;;  %v5000_v17 = vld [vmem:[%s7543_s5 + $0xa4] sm:$0xf0]  ;;  %v4185_v54 = vor.u32 %v5001_v2, %v4182_v3  ;;  %v4356_v0 = vld [vmem:[%s7543_s5 + $0x170] sm:$0xf]  ;;  %v5026_v2 = vld [vmem:[%s7543_s5 + $0x174] sm:$0xf0] }
 0x3cd   :  { %v5204_v38 = vunpack.i.h.bf16 %v5202_v11  ;;  %v5203_v47 = vunpack.i.l.bf16 %v5202_v11  ;;  %2008 = vmatpush.bf16.msra.mxu1 %v4249_v20  ;;  %1858 = vmatpush.bf16.msra.mxu3 %v4201_v21  ;;  %v4173_v34 = vor.u32 %v5000_v17, %v4172_v44  ;;  %v4177_v11 = vor.u32 %v4999_v48, %v4174_v52  ;;  %v4164_v20 = vld [vmem:[%s7543_s5 + $0x90] sm:$0xf]  ;;  %v4358_v44 = vld [vmem:[%s7543_s5 + $0x178] sm:$0xf0]  ;;  %v5024_v48 = vld [vmem:[%s7543_s5 + $0x164] sm:$0xf0] }
 0x3ce   :  { %v4357_v3 = vor.u32 %v5026_v2, %v4356_v0  ;;  %v5023_v52 = vld [vmem:[%s7543_s5 + $0x164] sm:$0xf] }
 0x3cf   :  { %v1404_v50 = vsel %vm1393_vm4, %v5203_v47, %v5204_v38  ;;  %v1415_v36 = vsel %vm1393_vm4, %v5204_v38, %v5203_v47  ;;  %1975 = vmatpush.bf16.msra.mxu0 %v4237_v7  ;;  %v4998_v38 = vld [vmem:[%s7543_s5 + $0x94] sm:$0xf0]  ;;  %v4997_v47 = vld [vmem:[%s7543_s5 + $0x94] sm:$0xf] }
 0x3d0   :  { %v1436_v40 = vmax.f32 %v6158_v14, %v1404_v50  ;;  %v1437_v39 = vmax.f32 %v6275_v8, %v1415_v36  ;;  %v4238_v14 = vld [vmem:[%s7543_s5 + $0x28] sm:$0xf0]  ;;  %v4212_v8 = vld [vmem:[%s7543_s5 + $0xf0] sm:$0xf]  ;;  %v4165_v50 = vor.u32 %v4998_v38, %v4164_v20  ;;  %v4166_v36 = vld [vmem:[%s7543_s5 + $0x98] sm:$0xf0] }
 0x3d1   :  { %v4241_v9 = vor.u32 %v4983_v61, %v4238_v14  ;;  %v4213_v57 = vor.u32 %v5010_v45, %v4212_v8  ;;  %1859 = vmatpush.bf16.msra.mxu3 %v4193_v16 }
 0x3d2   :  { %v1448_v25 = vpack.c.bf16 %v1436_v40, %v1436_v40  ;;  %v1449_v15 = vpack.c.bf16 %v1437_v39, %v1437_v39  ;;  %v4169_v40 = vor.u32 %v4997_v47, %v4166_v36  ;;  %v4156_v39 = vld [vmem:[%s7543_s5 + $0x80] sm:$0xf]  ;;  %v5022_v36 = vld [vmem:[%s7543_s5 + $0x154] sm:$0xf0] }
 0x3d3   :  { %2009 = vmatpush.bf16.msra.mxu1 %v4241_v9  ;;  %1822 = vmatpush.bf16.msra.mxu2 %v4213_v57 }
 0x3d4   :  { %1976 = vmatpush.bf16.msra.mxu0 %v4229_v33 }
 0x3d5   :  { %1860 = vmatpush.bf16.msra.mxu3 %v4185_v54  ;;  %v4348_v54 = vld [vmem:[%s7543_s5 + $0x160] sm:$0xf] }
 0x3d7   :  { %2010 = vmatpush.bf16.msra.mxu1 %v4233_v1  ;;  %1823 = vmatpush.bf16.msra.mxu2 %v4205_v63 }
 0x3d8   :  { %1977 = vmatpush.bf16.msra.mxu0 %v4221_v29 }
 0x3d9   :  { %1861 = vmatpush.bf16.msra.mxu3 %v4177_v11  ;;  %v4350_v11 = vld [vmem:[%s7543_s5 + $0x168] sm:$0xf0] }
 0x3da   :  { %v4353_v20 = vor.u32 %v5023_v52, %v4350_v11 }
 0x3db   :  { %2011 = vmatpush.bf16.msra.mxu1 %v4225_v24  ;;  %1824 = vmatpush.bf16.msra.mxu2 %v4197_v22 }
 0x3dc   :  { %1611 = vmatmul.bf16.gmra.mxu0 %v1448_v25  ;;  %1649 = vmatmul.bf16.gmra.mxu1 %v1449_v15  ;;  %v4996_v25 = vld [vmem:[%s7543_s5 + $0x84] sm:$0xf0]  ;;  %v4995_v15 = vld [vmem:[%s7543_s5 + $0x84] sm:$0xf] }
 0x3dd   :  { %1862 = vmatpush.bf16.msra.mxu3 %v4169_v40  ;;  %v4157_v58 = vor.u32 %v4996_v25, %v4156_v39  ;;  %v4161_v61 = vor.u32 %v4995_v15, %v4158_v53  ;;  %v5021_v40 = vld [vmem:[%s7543_s5 + $0x154] sm:$0xf]  ;;  %v4332_v53 = vld [vmem:[%s7543_s5 + $0x140] sm:$0xf] }
 0x3df   :  { %1825 = vmatpush.bf16.msra.mxu2 %v4189_v28 }
 0x3e1   :  { %1863 = vmatpush.bf16.msra.mxu3 %v4161_v61  ;;  %v5020_v61 = vld [vmem:[%s7543_s5 + $0x144] sm:$0xf0] }
 0x3e3   :  { %1826 = vmatpush.bf16.msra.mxu2 %v4181_v41  ;;  %v5025_v41 = vld [vmem:[%s7543_s5 + $0x174] sm:$0xf] }
 0x3e4   :  { %v4361_v17 = vor.u32 %v5025_v41, %v4358_v44  ;;  %v4302_v44 = vld [vmem:[%s7543_s5 + $0x108] sm:$0xf0] }
 0x3e6   :  { %2191 = vmatpush.bf16.msrb.mxu3 %v4361_v17 }
 0x3e7   :  { %1827 = vmatpush.bf16.msra.mxu2 %v4173_v34  ;;  %v4349_v34 = vor.u32 %v5024_v48, %v4348_v54 }
 0x3ea   :  { %2192 = vmatpush.bf16.msrb.mxu3 %v4353_v20 }
 0x3eb   :  { %1828 = vmatpush.bf16.msra.mxu2 %v4165_v50  ;;  %v4340_v50 = vld [vmem:[%s7543_s5 + $0x150] sm:$0xf] }
 0x3ec   :  { %v4341_v15 = vor.u32 %v5022_v36, %v4340_v50 }
 0x3ef   :  { %1829 = vmatpush.bf16.msra.mxu2 %v4157_v58  ;;  %v4342_v58 = vld [vmem:[%s7543_s5 + $0x158] sm:$0xf0] }
 0x3f3   :  { %2157 = vmatpush.bf16.msrb.mxu2 %v4357_v3  ;;  %v5011_v3 = vld [vmem:[%s7543_s5 + $0x104] sm:$0xf] }
 0x3f4   :  { %v4305_v11 = vor.u32 %v5011_v3, %v4302_v44 }
 0x3f7   :  { %2158 = vmatpush.bf16.msrb.mxu2 %v4349_v34 }
 0x3fb   :  { %2159 = vmatpush.bf16.msrb.mxu2 %v4341_v15 }
 0x409   :  { %v1587_v7 = vpop.f32.mrf.mxu0  ;;  %v1625_v14 = vpop.f32.mrf.mxu1 }
 0x40a   :  { %v1626_v9 = vadd.f32 %v1625_v14, %v1587_v7  ;;  %v4345_v7 = vor.u32 %v5021_v40, %v4342_v58 }
 0x40c   :  { %2193 = vmatpush.bf16.msrb.mxu3 %v4345_v7 }
 0x411   :  { %v1589_v8 = vpop.f32.mrf.mxu0  ;;  %v1627_v45 = vpop.f32.mrf.mxu1 }
 0x412   :  { %v1628_v57 = vadd.f32 %v1627_v45, %v1589_v8  ;;  %v4333_v8 = vor.u32 %v5020_v61, %v4332_v53  ;;  %v5019_v45 = vld [vmem:[%s7543_s5 + $0x144] sm:$0xf] }
 0x414   :  { %v1654_v19 = vpack.c.bf16 %v1628_v57, %v1626_v9  ;;  %v4334_v9 = vld [vmem:[%s7543_s5 + $0x148] sm:$0xf0]  ;;  %2160 = vmatpush.bf16.msrb.mxu2 %v4333_v8 }
 0x416   :  { %1978 = vmatmul.bf16.vlgmr.msra.gmra.mxu0 %v1654_v19  ;;  %2012 = vmatmul.bf16.vlgmr.msra.gmra.mxu1 %v1654_v19  ;;  %v1696_v62 = vshll.u32 %v1654_v19, 16  ;;  %v1694_v37 = vshrl.u32 %v1654_v19, 16  ;;  %v2061_v63 = vrot.slane %v1654_v19, 1 }
 0x418   :  { %v1698_v51 = vrot.slane %v1696_v62, 1 }
 0x419   :  { %v1592_v46 = vpop.f32.mrf.mxu0  ;;  %v1630_v10 = vpop.f32.mrf.mxu1 }
 0x41a   :  { %v1631_v30 = vadd.f32 %v1630_v10, %v1592_v46  ;;  %v1699_v35 = vor.u32 %v1698_v51, %v1694_v37  ;;  %v4324_v51 = vld [vmem:[%s7543_s5 + $0x130] sm:$0xf]  ;;  %v5018_v37 = vld [vmem:[%s7543_s5 + $0x134] sm:$0xf0] }
 0x421   :  { %v1594_v42 = vpop.f32.mrf.mxu0  ;;  %v1632_v43 = vpop.f32.mrf.mxu1 }
 0x422   :  { %v1633_v33 = vadd.f32 %v1632_v43, %v1594_v42  ;;  %v4337_v42 = vor.u32 %v5019_v45, %v4334_v9 }
 0x424   :  { %v1655_v1 = vpack.c.bf16 %v1633_v33, %v1631_v30  ;;  %2194 = vmatpush.bf16.msrb.mxu3 %v4337_v42 }
 0x426   :  { %1983 = vmatmul.bf16.gmra.mxu0 %v1655_v1  ;;  %2017 = vmatmul.bf16.gmra.mxu1 %v1655_v1  ;;  %v1701_v13 = vshll.u32 %v1655_v1, 16  ;;  %v2062_v55 = vrot.slane %v1655_v1, 1  ;;  %v1705_v59 = vshrl.u32 %v1655_v1, 16 }
 0x428   :  { %v1703_v4 = vrot.slane %v1701_v13, 1  ;;  %v6554_v18 = vsel %vm532_vm2, %v2061_v63, %v2062_v55  ;;  %v5017_v13 = vld [vmem:[%s7543_s5 + $0x134] sm:$0xf]  ;;  %v4325_v63 = vor.u32 %v5018_v37, %v4324_v51 }
 0x429   :  { %v1597_v12 = vpop.f32.mrf.mxu0  ;;  %v1635_v29 = vpop.f32.mrf.mxu1 }
 0x42a   :  { %v1704_v23 = vsel %vm94_vm0, %v1699_v35, %v1703_v4  ;;  %v1636_v24 = vadd.f32 %v1635_v29, %v1597_v12  ;;  %v1707_v26 = vor.u32 %v1705_v59, %v1703_v4  ;;  %v4316_v35 = vld [vmem:[%s7543_s5 + $0x120] sm:$0xf]  ;;  %v5016_v4 = vld [vmem:[%s7543_s5 + $0x124] sm:$0xf0]  ;;  %2161 = vmatpush.bf16.msrb.mxu2 %v4325_v63 }
 0x42b   :  { %1830 = vmatmul.bf16.vlgmr.msra.gmra.mxu2 %v1704_v23  ;;  %1864 = vmatmul.bf16.vlgmr.msra.gmra.mxu3 %v1704_v23  ;;  %v4317_v29 = vor.u32 %v5016_v4, %v4316_v35  ;;  %v5015_v23 = vld [vmem:[%s7543_s5 + $0x124] sm:$0xf] }
 0x42e   :  { %2162 = vmatpush.bf16.msrb.mxu2 %v4317_v29 }
 0x431   :  { %v1599_v49 = vpop.f32.mrf.mxu0  ;;  %v1637_v56 = vpop.f32.mrf.mxu1 }
 0x432   :  { %v1638_v22 = vadd.f32 %v1637_v56, %v1599_v49  ;;  %v4318_v49 = vld [vmem:[%s7543_s5 + $0x128] sm:$0xf0]  ;;  %v4308_v56 = vld [vmem:[%s7543_s5 + $0x110] sm:$0xf] }
 0x434   :  { %v1656_v60 = vpack.c.bf16 %v1638_v22, %v1636_v24  ;;  %v5014_v24 = vld [vmem:[%s7543_s5 + $0x114] sm:$0xf0]  ;;  %v4321_v22 = vor.u32 %v5015_v23, %v4318_v49 }
 0x436   :  { %1988 = vmatmul.bf16.gmra.mxu0 %v1656_v60  ;;  %2022 = vmatmul.bf16.gmra.mxu1 %v1656_v60  ;;  %v1709_v21 = vshll.u32 %v1656_v60, 16  ;;  %v2064_v5 = vrot.slane %v1656_v60, 1  ;;  %v1713_v57 = vshrl.u32 %v1656_v60, 16 }
 0x438   :  { %v1711_v31 = vrot.slane %v1709_v21, 1  ;;  %v6558_v28 = vsel %vm532_vm2, %v2062_v55, %v2064_v5  ;;  %v4326_v55 = vld [vmem:[%s7543_s5 + $0x138] sm:$0xf0]  ;;  %v4309_v21 = vor.u32 %v5014_v24, %v4308_v56 }
 0x439   :  { %v1602_v6 = vpop.f32.mrf.mxu0  ;;  %v1640_v16 = vpop.f32.mrf.mxu1  ;;  %v4329_v12 = vor.u32 %v5017_v13, %v4326_v55 }
 0x43a   :  { %v1712_v32 = vsel %vm94_vm0, %v1707_v26, %v1711_v31  ;;  %v1641_v39 = vadd.f32 %v1640_v16, %v1602_v6  ;;  %v1715_v10 = vor.u32 %v1713_v57, %v1711_v31  ;;  %v4310_v26 = vld [vmem:[%s7543_s5 + $0x118] sm:$0xf0]  ;;  %v4300_v16 = vld [vmem:[%s7543_s5 + $0x100] sm:$0xf]  ;;  %2163 = vmatpush.bf16.msrb.mxu2 %v4309_v21 }
 0x43b   :  { %1835 = vmatmul.bf16.gmra.mxu2 %v1712_v32  ;;  %1869 = vmatmul.bf16.gmra.mxu3 %v1712_v32  ;;  %v5012_v32 = vld [vmem:[%s7543_s5 + $0x104] sm:$0xf0] }
 0x43c   :  { %2195 = vmatpush.bf16.msrb.mxu3 %v4329_v12  ;;  %v4301_v41 = vor.u32 %v5012_v32, %v4300_v16 }
 0x43e   :  { %2164 = vmatpush.bf16.msrb.mxu2 %v4301_v41 }
 0x440   :  { %2196 = vmatpush.bf16.msrb.mxu3 %v4321_v22 }
 0x441   :  { %v1604_v38 = vpop.f32.mrf.mxu0  ;;  %v1642_v47 = vpop.f32.mrf.mxu1 }
 0x442   :  { %v1643_v25 = vadd.f32 %v1642_v47, %v1604_v38 }
 0x444   :  { %v6603_v14 = vpack.c.bf16 %v1643_v25, %v1641_v39 }
 0x446   :  { %1993 = vmatmul.bf16.gmra.mxu0 %v6603_v14  ;;  %2027 = vmatmul.bf16.gmra.mxu1 %v6603_v14  ;;  %v1717_v19 = vshll.u32 %v6603_v14, 16  ;;  %v2066_v46 = vrot.slane %v6603_v14, 1  ;;  %v1721_v17 = vshrl.u32 %v6603_v14, 16 }
 0x448   :  { %v1719_v62 = vrot.slane %v1717_v19, 1  ;;  %v6616_v43 = vsel %vm532_vm2, %v2064_v5, %v2066_v46  ;;  %v5013_v5 = vld [vmem:[%s7543_s5 + $0x114] sm:$0xf] }
 0x449   :  { %v1607_v30 = vpop.f32.mrf.mxu0  ;;  %v1645_v33 = vpop.f32.mrf.mxu1  ;;  %v4313_v2 = vor.u32 %v5013_v5, %v4310_v26 }
 0x44a   :  { %v1720_v1 = vsel %vm94_vm0, %v1715_v10, %v1719_v62  ;;  %v1646_v31 = vadd.f32 %v1645_v33, %v1607_v30  ;;  %v1723_v52 = vor.u32 %v1721_v17, %v1719_v62 }
 0x44b   :  { %1840 = vmatmul.bf16.gmra.mxu2 %v1720_v1  ;;  %1874 = vmatmul.bf16.gmra.mxu3 %v1720_v1 }
 0x44c   :  { %2197 = vmatpush.bf16.msrb.mxu3 %v4313_v2 }
 0x450   :  { %2198 = vmatpush.bf16.msrb.mxu3 %v4305_v11 }
 0x451   :  { %v1609_v60 = vpop.f32.mrf.mxu0  ;;  %v1647_v59 = vpop.f32.mrf.mxu1 }
 0x452   :  { %v1648_v6 = vadd.f32 %v1647_v59, %v1609_v60 }
 0x454   :  { %v1658_v0 = vpack.c.bf16 %v1648_v6, %v1646_v31 }
 0x456   :  { %1998 = vmatmul.bf16.gmra.mxu0 %v1658_v0  ;;  %2032 = vmatmul.bf16.gmra.mxu1 %v1658_v0  ;;  %v1725_v54 = vshll.u32 %v1658_v0, 16  ;;  %v2068_v48 = vrot.slane %v1658_v0, 1  ;;  %v1729_v7 = vshrl.u32 %v1658_v0, 16 }
 0x458   :  { %v1727_v34 = vrot.slane %v1725_v54, 1  ;;  %v2069_v20 = vsel %vm532_vm2, %v2066_v46, %v2068_v48 }
 0x459   :  { %v1612_v38 = vpop.f32.mrf.mxu0  ;;  %v1650_v47 = vpop.f32.mrf.mxu1 }
 0x45a   :  { %v1651_v50 = vadd.f32 %v1650_v47, %v1612_v38  ;;  %v1728_v36 = vsel %vm94_vm0, %v1723_v52, %v1727_v34  ;;  %v1731_v14 = vor.u32 %v1729_v7, %v1727_v34 }
 0x45b   :  { %1845 = vmatmul.bf16.gmra.mxu2 %v1728_v36  ;;  %1879 = vmatmul.bf16.gmra.mxu3 %v1728_v36 }
 0x45c   :  { %v1675_v40 = vpack.c.bf16 %v1651_v50, %v1651_v50 }
 0x45e   :  { %v2070_v39 = vrot.slane %v1675_v40, 1  ;;  %v1733_v53 = vshll.u32 %v1675_v40, 16 }
 0x460   :  { %v2071_v25 = vsel %vm532_vm2, %v2068_v48, %v2070_v39  ;;  %v1735_v61 = vrot.slane %v1733_v53, 1 }
 0x461   :  { %v1614_v15 = vpop.f32.mrf.mxu0  ;;  %v1652_v58 = vpop.f32.mrf.mxu1 }
 0x462   :  { %v1736_v8 = vsel %vm94_vm0, %v1731_v14, %v1735_v61 }
 0x46b   :  { %1850 = vmatmul.bf16.gmra.mxu2 %v1736_v8  ;;  %1884 = vmatmul.bf16.gmra.mxu3 %v1736_v8 }
 0x47b   :  { %2165 = vmatmul.bf16.vlgmr.msrb.gmra.mxu2 %v6554_v18  ;;  %2199 = vmatmul.bf16.vlgmr.msrb.gmra.mxu3 %v6554_v18 }
 0x48b   :  { %2170 = vmatmul.bf16.gmra.mxu2 %v6558_v28  ;;  %2204 = vmatmul.bf16.gmra.mxu3 %v6558_v28 }
 0x493   :  { %v1979_v45 = vpop.f32.mrf.mxu0  ;;  %v2013_v9 = vpop.f32.mrf.mxu1 }
 0x49b   :  { %2175 = vmatmul.bf16.gmra.mxu2 %v6616_v43  ;;  %2209 = vmatmul.bf16.gmra.mxu3 %v6616_v43  ;;  %v6678_v62 = vpop.f32.mrf.mxu0  ;;  %v6680_v42 = vpop.f32.mrf.mxu1 }
 0x4a3   :  { %v1984_v28 = vpop.f32.mrf.mxu0  ;;  %v2018_v33 = vpop.f32.mrf.mxu1 }
 0x4ab   :  { %2180 = vmatmul.bf16.gmra.mxu2 %v2069_v20  ;;  %2214 = vmatmul.bf16.gmra.mxu3 %v2069_v20  ;;  %v1986_v32 = vpop.f32.mrf.mxu0  ;;  %v2020_v0 = vpop.f32.mrf.mxu1 }
 0x4ae   :  { %v1831_v57 = vpop.f32.mrf.mxu2  ;;  %v1865_v19 = vpop.f32.mrf.mxu3 }
 0x4af   :  { %v1980_v46 = vadd.f32 %v1979_v45, %v1831_v57  ;;  %v2014_v10 = vadd.f32 %v2013_v9, %v1865_v19  ;;  %v2245_v19 = vld [vmem:[%s7544_s6] sm:$0x3] }
 0x4b3   :  { %v1989_v17 = vpop.f32.mrf.mxu0  ;;  %v2023_v54 = vpop.f32.mrf.mxu1 }
 0x4b6   :  { %v1833_v18 = vpop.f32.mrf.mxu2  ;;  %v6682_v30 = vpop.f32.mrf.mxu3 }
 0x4bb   :  { %2185 = vmatmul.bf16.gmra.mxu2 %v2071_v25  ;;  %2219 = vmatmul.bf16.gmra.mxu3 %v2071_v25  ;;  %v1991_v34 = vpop.f32.mrf.mxu0  ;;  %v2025_v11 = vpop.f32.mrf.mxu1 }
 0x4be   :  { %v1836_v43 = vpop.f32.mrf.mxu2  ;;  %v1870_v1 = vpop.f32.mrf.mxu3 }
 0x4bf   :  { %v1985_v51 = vadd.f32 %v1984_v28, %v1836_v43  ;;  %v2019_v37 = vadd.f32 %v2018_v33, %v1870_v1 }
 0x4c3   :  { %v1994_v47 = vpop.f32.mrf.mxu0  ;;  %v2028_v50 = vpop.f32.mrf.mxu1 }
 0x4c6   :  { %v1838_v13 = vpop.f32.mrf.mxu2  ;;  %v1872_v63 = vpop.f32.mrf.mxu3 }
 0x4c7   :  { %v2021_v28 = vadd.f32 %v2020_v0, %v1872_v63 }
 0x4cb   :  { %v1996_v15 = vpop.f32.mrf.mxu0  ;;  %v2030_v58 = vpop.f32.mrf.mxu1 }
 0x4ce   :  { %v6684_v55 = vpop.f32.mrf.mxu2  ;;  %v6686_v35 = vpop.f32.mrf.mxu3 }
 0x4d3   :  { %v1999_v7 = vpop.f32.mrf.mxu0  ;;  %v2033_v14 = vpop.f32.mrf.mxu1 }
 0x4d6   :  { %v6688_v4 = vpop.f32.mrf.mxu2  ;;  %v6690_v12 = vpop.f32.mrf.mxu3 }
 0x4de   :  { %v1846_v29 = vpop.f32.mrf.mxu2  ;;  %v1880_v23 = vpop.f32.mrf.mxu3 }
 0x4e6   :  { %v1848_v49 = vpop.f32.mrf.mxu2  ;;  %v1882_v56 = vpop.f32.mrf.mxu3 }
 0x4e7   :  { %v1997_v33 = vadd.f32 %v1996_v15, %v1848_v49  ;;  %v2031_v43 = vadd.f32 %v2030_v58, %v1882_v56 }
 0x4ee   :  { %v1851_v24 = vpop.f32.mrf.mxu2  ;;  %v1885_v22 = vpop.f32.mrf.mxu3 }
 0x4ef   :  { %v2000_v9 = vadd.f32 %v1999_v7, %v1851_v24  ;;  %v2034_v57 = vadd.f32 %v2033_v14, %v1885_v22  ;;  %v6714_v24 = vperm.slane %v2245_v19, 1 }
 0x4f6   :  { %v1853_v60 = vpop.f32.mrf.mxu2  ;;  %v1887_v59 = vpop.f32.mrf.mxu3 }
 0x4fe   :  { %v2166_v21 = vpop.f32.mrf.mxu2  ;;  %v2200_v5 = vpop.f32.mrf.mxu3 }
 0x4ff   :  { %v6692_v26 = vadd.f32 %v2166_v21, %v1980_v46  ;;  %v6694_v31 = vadd.f32 %v2200_v5, %v2014_v10  ;;  %v1982_v46 = vadd.f32 %v6678_v62, %v1833_v18  ;;  %v1987_v10 = vadd.f32 %v1986_v32, %v1838_v13  ;;  %v2035_v21 = vpop.f32.mrf.mxu1 }
 0x500   :  { %v1995_v5 = vadd.f32 %v1994_v47, %v1846_v29  ;;  %v2036_v7 = vadd.f32 %v2035_v21, %v1887_v59  ;;  %v1992_v62 = vadd.f32 %v1991_v34, %v6688_v4  ;;  %v2026_v18 = vadd.f32 %v2025_v11, %v6690_v12 }
 0x501   :  { %v1990_v47 = vadd.f32 %v1989_v17, %v6684_v55 }
 0x506   :  { %v6696_v6 = vpop.f32.mrf.mxu2  ;;  %v6698_v16 = vpop.f32.mrf.mxu3 }
 0x50e   :  { %v2171_v2 = vpop.f32.mrf.mxu2  ;;  %v2205_v41 = vpop.f32.mrf.mxu3 }
 0x50f   :  { %v6700_v3 = vadd.f32 %v2171_v2, %v1985_v51  ;;  %v6702_v44 = vadd.f32 %v2205_v41, %v2019_v37  ;;  %v2001_v37 = vpop.f32.mrf.mxu0  ;;  %v2029_v2 = vadd.f32 %v2028_v50, %v1880_v23  ;;  %v6712_v41 = vperm.slane %v2245_v19, 0 }
 0x510   :  { %v2002_v22 = vadd.f32 %v2001_v37, %v1853_v60  ;;  %v2024_v60 = vadd.f32 %v2023_v54, %v6686_v35 }
 0x516   :  { %v6704_v48 = vpop.f32.mrf.mxu2  ;;  %v6706_v52 = vpop.f32.mrf.mxu3 }
 0x517   :  { %v2231_v54 = vadd.f32 %v6704_v48, %v1987_v10 }
 0x51e   :  { %v2176_v20 = vpop.f32.mrf.mxu2  ;;  %v2210_v38 = vpop.f32.mrf.mxu3 }
 0x526   :  { %v2178_v36 = vpop.f32.mrf.mxu2  ;;  %v2212_v40 = vpop.f32.mrf.mxu3 }
 0x527   :  { %v2235_v59 = vadd.f32 %v2178_v36, %v1992_v62  ;;  %v2236_v50 = vadd.f32 %v2212_v40, %v2026_v18  ;;  %v2232_v36 = vadd.f32 %v6706_v52, %v2021_v28  ;;  %v2257_v28 = vadd.f32 %v6712_v41, %v2231_v54 }
 0x529   :  { %v2262_v40 = vadd.f32 %v6714_v24, %v2236_v50 }
 0x52e   :  { %v2181_v39 = vpop.f32.mrf.mxu2  ;;  %v2215_v25 = vpop.f32.mrf.mxu3 }
 0x52f   :  { %v2237_v13 = vadd.f32 %v2181_v39, %v1995_v5  ;;  %v2238_v63 = vadd.f32 %v2215_v25, %v2029_v2  ;;  %v2233_v39 = vadd.f32 %v2176_v20, %v1990_v47  ;;  %v2234_v25 = vadd.f32 %v2210_v38, %v2024_v60  ;;  %v5032_v47 = vld [vmem:[%s7545_s7 + $0x2c] sm:$0xff]  ;;  %v2307_v60 = vld [vmem:[%s7545_s7 + $0x18] sm:$0x1] }
 0x530   :  { %v2277_v5 = vmax.f32 %v2257_v28, 0.0  ;;  %v2321_v50 = vunpack.c.l.b16 %v2307_v60 }
 0x531   :  { %v2263_v15 = vadd.f32 %v6712_v41, %v2237_v13  ;;  %v2264_v58 = vadd.f32 %v6714_v24, %v2238_v63  ;;  %v2260_v19 = vadd.f32 %v6714_v24, %v2234_v25 }
 0x533   :  { %v2283_v48 = vmax.f32 %v2263_v15, 0.0  ;;  %v2284_v10 = vmax.f32 %v2264_v58, 0.0  ;;  %v2280_v37 = vmax.f32 %v2260_v19, 0.0  ;;  %v5040_v19 = vld [vmem:[%s7546_s8 + $0x38] sm:$0xff] }
 0x536   :  { %v2183_v53 = vpop.f32.mrf.mxu2  ;;  %v2217_v61 = vpop.f32.mrf.mxu3 }
 0x537   :  { %v2239_v14 = vadd.f32 %v2183_v53, %v1997_v33  ;;  %v2240_v27 = vadd.f32 %v2217_v61, %v2031_v43  ;;  %v2258_v33 = vadd.f32 %v6714_v24, %v2232_v36 }
 0x539   :  { %v2265_v4 = vadd.f32 %v6712_v41, %v2239_v14  ;;  %v2266_v12 = vadd.f32 %v6714_v24, %v2240_v27  ;;  %v2261_v27 = vadd.f32 %v6712_v41, %v2235_v59  ;;  %v2278_v2 = vmax.f32 %v2258_v33, 0.0  ;;  %v4388_v59 = vld [vmem:[%s7545_s7 + $0x34] sm:$0x1] }
 0x53b   :  { %v2285_v61 = vmax.f32 %v2265_v4, 0.0  ;;  %v2281_v43 = vmax.f32 %v2261_v27, 0.0  ;;  %v2416_v4 = vunpack.c.l.b16 %v4388_v59 }
 0x53e   :  { %v2186_v8 = vpop.f32.mrf.mxu2  ;;  %v2220_v45 = vpop.f32.mrf.mxu3 }
 0x53f   :  { %v2241_v1 = vadd.f32 %v2186_v8, %v2000_v9  ;;  %v2242_v51 = vadd.f32 %v2220_v45, %v2034_v57  ;;  %v2286_v8 = vmax.f32 %v2266_v12, 0.0  ;;  %v2016_v45 = vadd.f32 %v6680_v42, %v6682_v30 }
 0x540   :  { %v2227_v9 = vadd.f32 %v6696_v6, %v1982_v46  ;;  %v2259_v57 = vadd.f32 %v6712_v41, %v2233_v39  ;;  %v2282_v42 = vmax.f32 %v2262_v40, 0.0  ;;  %v2297_v30 = vpack.c.bf16 %v2285_v61, %v2283_v48  ;;  %v5048_v48 = vld [vmem:[%s7546_s8 + $0x78] sm:$0xff] }
 0x541   :  { %v2267_v32 = vadd.f32 %v6712_v41, %v2241_v1  ;;  %v2268_v29 = vadd.f32 %v6714_v24, %v2242_v51  ;;  %v2228_v52 = vadd.f32 %v6698_v16, %v2016_v45  ;;  %v2298_v6 = vpack.c.bf16 %v2286_v8, %v2284_v10  ;;  %v5039_v10 = vld [vmem:[%s7546_s8 + $0x30] sm:$0xff] }
 0x542   :  { %v2255_v46 = vadd.f32 %v6712_v41, %v6700_v3  ;;  %v2256_v1 = vadd.f32 %v6714_v24, %v6702_v44  ;;  %v2279_v51 = vmax.f32 %v2259_v57, 0.0  ;;  %v2253_v16 = vadd.f32 %v6712_v41, %v2227_v9 }
 0x543   :  { %v2287_v53 = vmax.f32 %v2267_v32, 0.0  ;;  %v2288_v55 = vmax.f32 %v2268_v29, 0.0  ;;  %v2254_v21 = vadd.f32 %v6714_v24, %v2228_v52  ;;  %v2251_v3 = vadd.f32 %v6712_v41, %v6692_v26  ;;  %v5028_v29 = vld [vmem:[%s7545_s7 + $0x8] sm:$0xff]  ;;  %v5047_v52 = vld [vmem:[%s7546_s8 + $0x70] sm:$0xff] }
 0x544   :  { %v2252_v44 = vadd.f32 %v6714_v24, %v6694_v31  ;;  %v2275_v14 = vmax.f32 %v2255_v46, 0.0  ;;  %v2276_v62 = vmax.f32 %v2256_v1, 0.0  ;;  %v2273_v18 = vmax.f32 %v2253_v16, 0.0  ;;  %v5027_v31 = vld [vmem:[%s7545_s7] sm:$0xff]  ;;  %v5038_v16 = vld [vmem:[%s7546_s8 + $0x28] sm:$0xff] }
 0x545   :  { %v2274_v13 = vmax.f32 %v2254_v21, 0.0  ;;  %v2325_v12 = vpack.c.b16 %v2321_v50, %v2321_v50  ;;  %v5046_v21 = vld [vmem:[%s7546_s8 + $0x68] sm:$0xff] }
 0x546   :  { %v2188_v49 = vpop.f32.mrf.mxu2  ;;  %v2222_v56 = vpop.f32.mrf.mxu3  ;;  %v2293_v63 = vpack.c.bf16 %v2277_v5, %v2275_v14  ;;  %v2272_v32 = vmax.f32 %v2252_v44, 0.0  ;;  %v5037_v5 = vld [vmem:[%s7546_s8 + $0x20] sm:$0xff]  ;;  %v5036_v14 = vld [vmem:[%s7546_s8 + $0x18] sm:$0xff] }
 0x547   :  { %v2243_v23 = vadd.f32 %v2188_v49, %v2002_v22  ;;  %v2244_v0 = vadd.f32 %v2222_v56, %v2036_v7  ;;  %v2295_v22 = vpack.c.bf16 %v2281_v43, %v2279_v51  ;;  %v2296_v7 = vpack.c.bf16 %v2282_v42, %v2280_v37 }
 0x548   :  { %v2294_v49 = vpack.c.bf16 %v2278_v2, %v2276_v62  ;;  %v2271_v56 = vmax.f32 %v2251_v3, 0.0  ;;  %v5045_v2 = vld [vmem:[%s7546_s8 + $0x60] sm:$0xff]  ;;  %v5044_v62 = vld [vmem:[%s7546_s8 + $0x58] sm:$0xff] }
 0x549   :  { %v2269_v34 = vadd.f32 %v6712_v41, %v2243_v23  ;;  %v2270_v11 = vadd.f32 %v6714_v24, %v2244_v0  ;;  %v2292_v41 = vpack.c.bf16 %v2274_v13, %v2272_v32  ;;  %v5030_v24 = vld [vmem:[%s7545_s7 + $0x1c] sm:$0xff]  ;;  %v5031_v23 = vld [vmem:[%s7545_s7 + $0x24] sm:$0xff]  ;;  %v5029_v0 = vld [vmem:[%s7545_s7 + $0x10] sm:$0xff]  ;;  %s5251_s7 = smov 96  }
 0x54a   :  { %v2291_v26 = vpack.c.bf16 %v2273_v18, %v2271_v56  ;;  %v5035_v18 = vld [vmem:[%s7546_s8 + $0x10] sm:$0xff] }
 0x54b   :  { %v2289_v17 = vmax.f32 %v2269_v34, 0.0  ;;  %v2290_v35 = vmax.f32 %v2270_v11, 0.0  ;;  %v2420_v34 = vpack.c.b16 %v2416_v4, %v2416_v4  ;;  %v5043_v13 = vld [vmem:[%s7546_s8 + $0x50] sm:$0xff] }
 0x54d   :  { %v2299_v20 = vpack.c.bf16 %v2289_v17, %v2287_v53  ;;  %v2300_v38 = vpack.c.bf16 %v2290_v35, %v2288_v55 }
 0x54f   :  { %2342 = vmatpush.bf16.msrb.mxu0 %v2299_v20  ;;  %2370 = vmatpush.bf16.msrb.mxu1 %v2300_v38 }
 0x550   :  { %2436 = vmatpush.bf16.msra.mxu2 %v2299_v20  ;;  %2464 = vmatpush.bf16.msra.mxu3 %v2300_v38 }
 0x553   :  { %2343 = vmatpush.bf16.msrb.mxu0 %v2297_v30  ;;  %2371 = vmatpush.bf16.msrb.mxu1 %v2298_v6 }
 0x554   :  { %2437 = vmatpush.bf16.msra.mxu2 %v2297_v30  ;;  %2465 = vmatpush.bf16.msra.mxu3 %v2298_v6 }
 0x557   :  { %2344 = vmatpush.bf16.msrb.mxu0 %v2295_v22  ;;  %2372 = vmatpush.bf16.msrb.mxu1 %v2296_v7 }
 0x558   :  { %2438 = vmatpush.bf16.msra.mxu2 %v2295_v22  ;;  %2466 = vmatpush.bf16.msra.mxu3 %v2296_v7 }
 0x55b   :  { %2345 = vmatpush.bf16.msrb.mxu0 %v2293_v63  ;;  %2373 = vmatpush.bf16.msrb.mxu1 %v2294_v49 }
 0x55c   :  { %2439 = vmatpush.bf16.msra.mxu2 %v2293_v63  ;;  %2467 = vmatpush.bf16.msra.mxu3 %v2294_v49 }
 0x55f   :  { %2346 = vmatpush.bf16.msrb.mxu0 %v2291_v26  ;;  %2374 = vmatpush.bf16.msrb.mxu1 %v2292_v41 }
 0x560   :  { %2440 = vmatpush.bf16.msra.mxu2 %v2291_v26  ;;  %2468 = vmatpush.bf16.msra.mxu3 %v2292_v41 }
 0x562   :  { %4374 = vmatmul.msk.bf16.vlgmr.msrb.gmra.mxu0 %vm2326_vm5, %v5027_v31  ;;  %4378 = vmatmul.msk.bf16.vlgmr.msrb.gmra.mxu1 %vm2326_vm5, %v5027_v31 }
 0x563   :  { %4401 = vmatmul.msk.bf16.vlgmr.msra.gmra.mxu2 %vm2326_vm5, %v5030_v24  ;;  %4405 = vmatmul.msk.bf16.vlgmr.msra.gmra.mxu3 %vm2326_vm5, %v5030_v24 }
 0x564   :  { %2696 = vmatpush.bf16.msra.mxu0 %v5040_v19  ;;  %2724 = vmatpush.bf16.msra.mxu1 %v5048_v48 }
 0x568   :  { %2697 = vmatpush.bf16.msra.mxu0 %v5039_v10  ;;  %2725 = vmatpush.bf16.msra.mxu1 %v5047_v52 }
 0x56c   :  { %2698 = vmatpush.bf16.msra.mxu0 %v5038_v16  ;;  %2726 = vmatpush.bf16.msra.mxu1 %v5046_v21 }
 0x570   :  { %2699 = vmatpush.bf16.msra.mxu0 %v5037_v5  ;;  %2727 = vmatpush.bf16.msra.mxu1 %v5045_v2 }
 0x572   :  { %4375 = vmatmul.msk.bf16.gmra.mxu0 %vm2326_vm5, %v5028_v29  ;;  %4379 = vmatmul.msk.bf16.gmra.mxu1 %vm2326_vm5, %v5028_v29 }
 0x573   :  { %4402 = vmatmul.msk.bf16.gmra.mxu2 %vm2326_vm5, %v5031_v23  ;;  %4406 = vmatmul.msk.bf16.gmra.mxu3 %vm2326_vm5, %v5031_v23 }
 0x574   :  { %2700 = vmatpush.bf16.msra.mxu0 %v5036_v14  ;;  %2728 = vmatpush.bf16.msra.mxu1 %v5044_v62  ;;  %v4611_v14 = vld [vmem:[%s7547_s9 + $0x70] sm:$0xf]  ;;  %v5064_v62 = vld [vmem:[%s7547_s9 + $0x74] sm:$0xf0] }
 0x578   :  { %2701 = vmatpush.bf16.msra.mxu0 %v5035_v18  ;;  %2729 = vmatpush.bf16.msra.mxu1 %v5043_v13  ;;  %v5062_v18 = vld [vmem:[%s7547_s9 + $0x64] sm:$0xf0] }
 0x582   :  { %4376 = vmatmul.msk.bf16.gmra.mxu0 %vm2326_vm5, %v5029_v0  ;;  %4380 = vmatmul.msk.bf16.gmra.mxu1 %vm2326_vm5, %v5029_v0 }
 0x583   :  { %4403 = vmatmul.msk.bf16.gmra.mxu2 %vm2326_vm5, %v5032_v47  ;;  %4407 = vmatmul.msk.bf16.gmra.mxu3 %vm2326_vm5, %v5032_v47 }
 0x592   :  { %4377 = vmatmul.msk.bf16.gmra.mxu0 %vm2326_vm5, %v2325_v12  ;;  %4381 = vmatmul.msk.bf16.gmra.mxu1 %vm2326_vm5, %v2325_v12 }
 0x593   :  { %4404 = vmatmul.msk.bf16.gmra.mxu2 %vm2326_vm5, %v2420_v34  ;;  %4408 = vmatmul.msk.bf16.gmra.mxu3 %vm2326_vm5, %v2420_v34 }
 0x5df   :  { %v2348_v11 = vpop.f32.mrf.mxu0  ;;  %v2376_v39 = vpop.f32.mrf.mxu1 }
 0x5e6   :  { %v2442_v25 = vpop.f32.mrf.mxu2  ;;  %v2470_v15 = vpop.f32.mrf.mxu3 }
 0x5e7   :  { %v2350_v58 = vpop.f32.mrf.mxu0  ;;  %v2378_v53 = vpop.f32.mrf.mxu1  ;;  %v6790_v35 = vmax.f32 %v2348_v11, %v2442_v25  ;;  %v6792_v54 = vmax.f32 %v2376_v39, %v2470_v15  ;;  %v5034_v39 = vld [vmem:[%s7546_s8 + $0x8] sm:$0xff]  ;;  %v5033_v15 = vld [vmem:[%s7546_s8] sm:$0xff] }
 0x5e8   :  { %v5042_v25 = vld [vmem:[%s7546_s8 + $0x48] sm:$0xff]  ;;  %2702 = vmatpush.bf16.msra.mxu0 %v5034_v39 }
 0x5e9   :  { %2730 = vmatpush.bf16.msra.mxu1 %v5042_v25 }
 0x5ec   :  { %2703 = vmatpush.bf16.msra.mxu0 %v5033_v15 }
 0x5ee   :  { %v2444_v55 = vpop.f32.mrf.mxu2  ;;  %v2472_v17 = vpop.f32.mrf.mxu3 }
 0x5ef   :  { %v6794_v36 = vmax.f32 %v2350_v58, %v2444_v55  ;;  %v6796_v27 = vmax.f32 %v2378_v53, %v2472_v17  ;;  %v2353_v40 = vpop.f32.mrf.mxu0  ;;  %v2381_v61 = vpop.f32.mrf.mxu1  ;;  %v5041_v58 = vld [vmem:[%s7546_s8 + $0x40] sm:$0xff] }
 0x5f0   :  { %2731 = vmatpush.bf16.msra.mxu1 %v5041_v58  ;;  %v7556_v17 = vld [vmem:[#allocation2_spill] sm:$0xff] }
 0x5f1   :  { %v5205_v8 = vpack.i.bf16 %v6794_v36, %v6790_v35  ;;  %v5210_v20 = vpack.i.bf16 %v6796_v27, %v6792_v54  ;;  %vm2531_vm6 = vcmp.lt.s32.totalorder %v7556_v17, 96  ;;  %vm3373_vm8 = vcmp.lt.s32.totalorder %v7556_v17, 64 }
 0x5f3   :  { %5211 = vrot.lane.b32.xlu0 %v5210_v20, %s5251_s7  ;;  %5206 = vrot.lane.b32.xlu2 %v5205_v8, %s5251_s7 }
 0x5f6   :  { %v2447_v38 = vpop.f32.mrf.mxu2  ;;  %v2475_v45 = vpop.f32.mrf.mxu3 }
 0x5f7   :  { %v2355_v9 = vpop.f32.mrf.mxu0  ;;  %v2383_v57 = vpop.f32.mrf.mxu1  ;;  %v6816_v43 = vmax.f32 %v2353_v40, %v2447_v38  ;;  %v6818_v42 = vmax.f32 %v2381_v61, %v2475_v45 }
 0x5fe   :  { %v2449_v28 = vpop.f32.mrf.mxu2  ;;  %v2477_v33 = vpop.f32.mrf.mxu3 }
 0x5ff   :  { %v6820_v30 = vmax.f32 %v2355_v9, %v2449_v28  ;;  %v6822_v6 = vmax.f32 %v2383_v57, %v2477_v33  ;;  %v2358_v46 = vpop.f32.mrf.mxu0  ;;  %v2386_v1 = vpop.f32.mrf.mxu1 }
 0x601   :  { %v5215_v51 = vpack.i.bf16 %v6820_v30, %v6816_v43  ;;  %v5220_v37 = vpack.i.bf16 %v6822_v6, %v6818_v42 }
 0x603   :  { %5216 = vrot.lane.b32.xlu1 %v5215_v51, %s5251_s7  ;;  %5221 = vrot.lane.b32.xlu2 %v5220_v37, %s5251_s7 }
 0x606   :  { %v2452_v22 = vpop.f32.mrf.mxu2  ;;  %v2480_v7 = vpop.f32.mrf.mxu3 }
 0x607   :  { %v2360_v3 = vpop.f32.mrf.mxu0  ;;  %v2388_v44 = vpop.f32.mrf.mxu1  ;;  %v6854_v56 = vmax.f32 %v2358_v46, %v2452_v22  ;;  %v6856_v32 = vmax.f32 %v2386_v1, %v2480_v7 }
 0x60e   :  { %v2454_v63 = vpop.f32.mrf.mxu2  ;;  %v2482_v49 = vpop.f32.mrf.mxu3 }
 0x60f   :  { %v6858_v26 = vmax.f32 %v2360_v3, %v2454_v63  ;;  %v6860_v41 = vmax.f32 %v2388_v44, %v2482_v49  ;;  %v2363_v31 = vpop.f32.mrf.mxu0  ;;  %v2391_v24 = vpop.f32.mrf.mxu1  ;;  %v5061_v63 = vld [vmem:[%s7547_s9 + $0x64] sm:$0xf]  ;;  %v4605_v49 = vld [vmem:[%s7547_s9 + $0x68] sm:$0xf0] }
 0x611   :  { %v5225_v29 = vpack.i.bf16 %v6858_v26, %v6854_v56  ;;  %v5230_v23 = vpack.i.bf16 %v6860_v41, %v6856_v32 }
 0x613   :  { %5231 = vrot.lane.b32.xlu1 %v5230_v23, %s5251_s7  ;;  %5226 = vrot.lane.b32.xlu0 %v5225_v29, %s5251_s7  ;;  %v4595_v29 = vld [vmem:[%s7547_s9 + $0x50] sm:$0xf]  ;;  %v5060_v23 = vld [vmem:[%s7547_s9 + $0x54] sm:$0xf0] }
 0x616   :  { %v2457_v0 = vpop.f32.mrf.mxu2  ;;  %v2485_v47 = vpop.f32.mrf.mxu3 }
 0x617   :  { %v6868_v60 = vmax.f32 %v2363_v31, %v2457_v0  ;;  %v6870_v59 = vmax.f32 %v2391_v24, %v2485_v47  ;;  %v2365_v50 = vpop.f32.mrf.mxu0  ;;  %v2393_v4 = vpop.f32.mrf.mxu1  ;;  %v4608_v24 = vor.u32 %v5061_v63, %v4605_v49  ;;  %v5059_v0 = vld [vmem:[%s7547_s9 + $0x54] sm:$0xf]  ;;  %v4597_v47 = vld [vmem:[%s7547_s9 + $0x58] sm:$0xf0] }
 0x618   :  { %v4596_v50 = vor.u32 %v5060_v23, %v4595_v29  ;;  %v4587_v4 = vld [vmem:[%s7547_s9 + $0x40] sm:$0xf]  ;;  %v4600_v39 = vor.u32 %v5059_v0, %v4597_v47  ;;  %v5077_v29 = vld [vmem:[%s7547_s9 + $0xe4] sm:$0xf]  ;;  %v4541_v0 = vld [vmem:[%s7547_s9 + $0xe8] sm:$0xf0] }
 0x619   :  { %v5235_v12 = vpack.i.bf16 %v6870_v59, %v6868_v60  ;;  %v4544_v47 = vor.u32 %v5077_v29, %v4541_v0  ;;  %v5093_v29 = vld [vmem:[%s7547_s9 + $0x164] sm:$0xf] }
 0x61b   :  { %5236 = vrot.lane.b32.xlu2 %v5235_v12, %s5251_s7  ;;  %v5058_v12 = vld [vmem:[%s7547_s9 + $0x44] sm:$0xf0] }
 0x61e   :  { %v2459_v34 = vpop.f32.mrf.mxu2  ;;  %v2487_v11 = vpop.f32.mrf.mxu3 }
 0x64d   :  { %v5207_v53 = vpop.permute.xlu2 %5206 }
 0x64e   :  { %v5209_v8 = vunpack.i.h.bf16 %v5207_v53  ;;  %v5208_v20 = vunpack.i.l.bf16 %v5207_v53 }
 0x65d   :  { %v5222_v46 = vpop.permute.xlu2 %5221 }
 0x65e   :  { %v5224_v51 = vunpack.i.h.bf16 %v5222_v46  ;;  %v5223_v37 = vunpack.i.l.bf16 %v5222_v46 }
 0x665   :  { %v5212_v55 = vpop.permute.xlu0 %5211 }
 0x666   :  { %v5214_v40 = vunpack.i.h.bf16 %v5212_v55  ;;  %v5213_v61 = vunpack.i.l.bf16 %v5212_v55  ;;  %v4588_v55 = vor.u32 %v5058_v12, %v4587_v4  ;;  %v5050_v4 = vld [vmem:[%s7547_s9 + $0x4] sm:$0xf0]  ;;  %v5049_v12 = vld [vmem:[%s7547_s9 + $0x4] sm:$0xf] }
 0x668   :  { %v2533_v38 = vsel %vm2531_vm6, %v5209_v8, %v5214_v40  ;;  %v2540_v45 = vsel %vm2531_vm6, %v5214_v40, %v5209_v8  ;;  %v2532_v9 = vsel %vm2531_vm6, %v5208_v20, %v5213_v61  ;;  %v2539_v57 = vsel %vm2531_vm6, %v5213_v61, %v5208_v20  ;;  %v5057_v40 = vld [vmem:[%s7547_s9 + $0x44] sm:$0xf]  ;;  %v4589_v61 = vld [vmem:[%s7547_s9 + $0x48] sm:$0xf0] }
 0x669   :  { %v2548_v19 = vmax.f32 %v6794_v36, %v2533_v38  ;;  %v2549_v48 = vmax.f32 %v6796_v27, %v2540_v45  ;;  %v2546_v10 = vmax.f32 %v6790_v35, %v2532_v9  ;;  %v2547_v52 = vmax.f32 %v6792_v54, %v2539_v57 }
 0x66b   :  { %v2560_v28 = vpack.c.bf16 %v2548_v19, %v2546_v10  ;;  %v2561_v33 = vpack.c.bf16 %v2549_v48, %v2547_v52  ;;  %v4579_v10 = vld [vmem:[%s7547_s9 + $0x30] sm:$0xf]  ;;  %v5056_v52 = vld [vmem:[%s7547_s9 + $0x34] sm:$0xf0] }
 0x66d   :  { %2704 = vmatmul.bf16.vlgmr.msra.gmra.mxu0 %v2560_v28  ;;  %2732 = vmatmul.bf16.vlgmr.msra.gmra.mxu1 %v2561_v33  ;;  %v4592_v28 = vor.u32 %v5057_v40, %v4589_v61  ;;  %v4523_v61 = vld [vmem:[%s7547_s9 + $0xc0] sm:$0xf] }
 0x675   :  { %v5217_v1 = vpop.permute.xlu1 %5216 }
 0x676   :  { %v5219_v16 = vunpack.i.h.bf16 %v5217_v1  ;;  %v5218_v21 = vunpack.i.l.bf16 %v5217_v1 }
 0x678   :  { %v2535_v5 = vsel %vm2531_vm6, %v5219_v16, %v5224_v51  ;;  %v2542_v36 = vsel %vm2531_vm6, %v5224_v51, %v5219_v16  ;;  %v2534_v35 = vsel %vm2531_vm6, %v5218_v21, %v5223_v37  ;;  %v2541_v54 = vsel %vm2531_vm6, %v5223_v37, %v5218_v21 }
 0x679   :  { %v2550_v27 = vmax.f32 %v6816_v43, %v2534_v35  ;;  %v2552_v2 = vmax.f32 %v6820_v30, %v2535_v5  ;;  %v2551_v22 = vmax.f32 %v6818_v42, %v2541_v54  ;;  %v2553_v7 = vmax.f32 %v6822_v6, %v2542_v36  ;;  %v5063_v43 = vld [vmem:[%s7547_s9 + $0x74] sm:$0xf]  ;;  %v4613_v42 = vld [vmem:[%s7547_s9 + $0x78] sm:$0xf0]  ;;  %v4603_v6 = vld [vmem:[%s7547_s9 + $0x60] sm:$0xf] }
 0x67a   :  { %v4612_v30 = vor.u32 %v5064_v62, %v4611_v14  ;;  %v4616_v13 = vor.u32 %v5063_v43, %v4613_v42  ;;  %v4604_v31 = vor.u32 %v5062_v18, %v4603_v6  ;;  %v5079_v62 = vld [vmem:[%s7547_s9 + $0xf4] sm:$0xf]  ;;  %v4549_v43 = vld [vmem:[%s7547_s9 + $0xf8] sm:$0xf0]  ;;  %v5052_v6 = vld [vmem:[%s7547_s9 + $0x14] sm:$0xf0] }
 0x67b   :  { %v2562_v3 = vpack.c.bf16 %v2552_v2, %v2550_v27  ;;  %v2563_v44 = vpack.c.bf16 %v2553_v7, %v2551_v22  ;;  %v4571_v27 = vld [vmem:[%s7547_s9 + $0x20] sm:$0xf]  ;;  %v5054_v2 = vld [vmem:[%s7547_s9 + $0x24] sm:$0xf0]  ;;  %v5053_v22 = vld [vmem:[%s7547_s9 + $0x24] sm:$0xf]  ;;  %v4552_v42 = vor.u32 %v5079_v62, %v4549_v43 }
 0x67c   :  { %3028 = vmatpush.bf16.msrb.mxu0 %v4612_v30  ;;  %3052 = vmatpush.bf16.msrb.mxu1 %v4616_v13  ;;  %v4572_v7 = vor.u32 %v5054_v2, %v4571_v27  ;;  %v4563_v30 = vld [vmem:[%s7547_s9 + $0x10] sm:$0xf]  ;;  %v5051_v18 = vld [vmem:[%s7547_s9 + $0x14] sm:$0xf]  ;;  %v4565_v13 = vld [vmem:[%s7547_s9 + $0x18] sm:$0xf0] }
 0x67d   :  { %2709 = vmatmul.bf16.gmra.mxu0 %v2562_v3  ;;  %2737 = vmatmul.bf16.gmra.mxu1 %v2563_v44  ;;  %v5080_v3 = vld [vmem:[%s7547_s9 + $0xf4] sm:$0xf0]  ;;  %v4564_v63 = vor.u32 %v5052_v6, %v4563_v30  ;;  %v4568_v49 = vor.u32 %v5051_v18, %v4565_v13  ;;  %v4493_v2 = vld [vmem:[%s7547_s9 + $0x88] sm:$0xf0]  ;;  %v5095_v18 = vld [vmem:[%s7547_s9 + $0x174] sm:$0xf] }
 0x67e   :  { %2924 = vmatpush.bf16.msrb.mxu3 %v4552_v42  ;;  %v4691_v42 = vld [vmem:[%s7547_s9 + $0x170] sm:$0xf]  ;;  %v5096_v6 = vld [vmem:[%s7547_s9 + $0x174] sm:$0xf0] }
 0x67f   :  { %v4692_v13 = vor.u32 %v5096_v6, %v4691_v42  ;;  %v5082_v42 = vld [vmem:[%s7547_s9 + $0x104] sm:$0xf0]  ;;  %v5081_v6 = vld [vmem:[%s7547_s9 + $0x104] sm:$0xf] }
 0x680   :  { %3029 = vmatpush.bf16.msrb.mxu0 %v4604_v31  ;;  %3053 = vmatpush.bf16.msrb.mxu1 %v4608_v24  ;;  %v4539_v31 = vld [vmem:[%s7547_s9 + $0xe0] sm:$0xf]  ;;  %v5078_v24 = vld [vmem:[%s7547_s9 + $0xe4] sm:$0xf0] }
 0x681   :  { %v4540_v23 = vor.u32 %v5078_v24, %v4539_v31  ;;  %v4683_v31 = vld [vmem:[%s7547_s9 + $0x160] sm:$0xf]  ;;  %v5094_v24 = vld [vmem:[%s7547_s9 + $0x164] sm:$0xf0] }
 0x682   :  { %2925 = vmatpush.bf16.msrb.mxu3 %v4544_v47  ;;  %v4684_v0 = vor.u32 %v5094_v24, %v4683_v31  ;;  %v4685_v47 = vld [vmem:[%s7547_s9 + $0x168] sm:$0xf0] }
 0x684   :  { %3030 = vmatpush.bf16.msrb.mxu0 %v4596_v50  ;;  %3054 = vmatpush.bf16.msrb.mxu1 %v4600_v39  ;;  %v4555_v50 = vld [vmem:[%s7547_s9] sm:$0xf]  ;;  %v4531_v39 = vld [vmem:[%s7547_s9 + $0xd0] sm:$0xf] }
 0x685   :  { %v5232_v34 = vpop.permute.xlu1 %5231  ;;  %v5227_v11 = vpop.permute.xlu0 %5226 }
 0x686   :  { %v5234_v25 = vunpack.i.h.bf16 %v5232_v34  ;;  %v5233_v15 = vunpack.i.l.bf16 %v5232_v34  ;;  %v5229_v58 = vunpack.i.h.bf16 %v5227_v11  ;;  %v5228_v53 = vunpack.i.l.bf16 %v5227_v11  ;;  %v4557_v11 = vld [vmem:[%s7547_s9 + $0x8] sm:$0xf0] }
 0x687   :  { %v4556_v34 = vor.u32 %v5050_v4, %v4555_v50 }
 0x688   :  { %v2537_v8 = vsel %vm2531_vm6, %v5229_v58, %v5234_v25  ;;  %v2544_v20 = vsel %vm2531_vm6, %v5234_v25, %v5229_v58  ;;  %v2536_v38 = vsel %vm2531_vm6, %v5228_v53, %v5233_v15  ;;  %v2543_v45 = vsel %vm2531_vm6, %v5233_v15, %v5228_v53  ;;  %3031 = vmatpush.bf16.msrb.mxu0 %v4588_v55  ;;  %v5076_v25 = vld [vmem:[%s7547_s9 + $0xd4] sm:$0xf0]  ;;  %v5075_v53 = vld [vmem:[%s7547_s9 + $0xd4] sm:$0xf]  ;;  %v4533_v55 = vld [vmem:[%s7547_s9 + $0xd8] sm:$0xf0] }
 0x689   :  { %v2554_v9 = vmax.f32 %v6854_v56, %v2536_v38  ;;  %v2556_v57 = vmax.f32 %v6858_v26, %v2537_v8  ;;  %v2555_v19 = vmax.f32 %v6856_v32, %v2543_v45  ;;  %v2557_v48 = vmax.f32 %v6860_v41, %v2544_v20  ;;  %v5055_v56 = vld [vmem:[%s7547_s9 + $0x34] sm:$0xf]  ;;  %v4581_v32 = vld [vmem:[%s7547_s9 + $0x38] sm:$0xf0]  ;;  %v5237_v41 = vpop.permute.xlu2 %5236  ;;  %3055 = vmatpush.bf16.msrb.mxu1 %v4592_v28  ;;  %v5074_v8 = vld [vmem:[%s7547_s9 + $0xc4] sm:$0xf0] }
 0x68a   :  { %v4580_v26 = vor.u32 %v5056_v52, %v4579_v10  ;;  %v4584_v1 = vor.u32 %v5055_v56, %v4581_v32  ;;  %v5239_v51 = vunpack.i.h.bf16 %v5237_v41  ;;  %v5238_v37 = vunpack.i.l.bf16 %v5237_v41  ;;  %v5073_v20 = vld [vmem:[%s7547_s9 + $0xc4] sm:$0xf]  ;;  %v4525_v45 = vld [vmem:[%s7547_s9 + $0xc8] sm:$0xf0]  ;;  %v4517_v52 = vld [vmem:[%s7547_s9 + $0xb8] sm:$0xf0] }
 0x68b   :  { %v2564_v33 = vpack.c.bf16 %v2556_v57, %v2554_v9  ;;  %v2565_v46 = vpack.c.bf16 %v2557_v48, %v2555_v19  ;;  %v4560_v15 = vor.u32 %v5049_v12, %v4557_v11  ;;  %v4532_v58 = vor.u32 %v5076_v25, %v4531_v39  ;;  %v4515_v57 = vld [vmem:[%s7547_s9 + $0xb0] sm:$0xf]  ;;  %v5072_v19 = vld [vmem:[%s7547_s9 + $0xb4] sm:$0xf0]  ;;  %v5071_v48 = vld [vmem:[%s7547_s9 + $0xb4] sm:$0xf] }
 0x68c   :  { %3032 = vmatpush.bf16.msrb.mxu0 %v4580_v26  ;;  %v2538_v16 = vsel %vm2531_vm6, %v5238_v37, %v5239_v51  ;;  %v2545_v21 = vsel %vm2531_vm6, %v5239_v51, %v5238_v37  ;;  %v4536_v40 = vor.u32 %v5075_v53, %v4533_v55  ;;  %v4524_v38 = vor.u32 %v5074_v8, %v4523_v61  ;;  %v4507_v28 = vld [vmem:[%s7547_s9 + $0xa0] sm:$0xf]  ;;  %v5069_v56 = vld [vmem:[%s7547_s9 + $0xa4] sm:$0xf]  ;;  %v4509_v32 = vld [vmem:[%s7547_s9 + $0xa8] sm:$0xf0] }
 0x68d   :  { %2714 = vmatmul.bf16.gmra.mxu0 %v2564_v33  ;;  %2742 = vmatmul.bf16.gmra.mxu1 %v2565_v46  ;;  %v2558_v5 = vmax.f32 %v6868_v60, %v2538_v16  ;;  %v2559_v36 = vmax.f32 %v6870_v59, %v2545_v21  ;;  %v4573_v60 = vld [vmem:[%s7547_s9 + $0x28] sm:$0xf0]  ;;  %v4547_v59 = vld [vmem:[%s7547_s9 + $0xf0] sm:$0xf]  ;;  %v4528_v9 = vor.u32 %v5073_v20, %v4525_v45  ;;  %v5070_v33 = vld [vmem:[%s7547_s9 + $0xa4] sm:$0xf0] }
 0x68e   :  { %3056 = vmatpush.bf16.msrb.mxu1 %v4584_v1  ;;  %v4576_v44 = vor.u32 %v5053_v22, %v4573_v60  ;;  %v4548_v14 = vor.u32 %v5080_v3, %v4547_v59  ;;  %2926 = vmatpush.bf16.msrb.mxu3 %v4536_v40  ;;  %v4516_v10 = vor.u32 %v5072_v19, %v4515_v57  ;;  %v4499_v1 = vld [vmem:[%s7547_s9 + $0x90] sm:$0xf]  ;;  %v5068_v51 = vld [vmem:[%s7547_s9 + $0x94] sm:$0xf0]  ;;  %v5067_v37 = vld [vmem:[%s7547_s9 + $0x94] sm:$0xf] }
 0x68f   :  { %v2566_v35 = vpack.c.bf16 %v2558_v5, %v2558_v5  ;;  %v2567_v54 = vpack.c.bf16 %v2559_v36, %v2559_v36  ;;  %v4520_v46 = vor.u32 %v5071_v48, %v4517_v52  ;;  %v4508_v26 = vor.u32 %v5070_v33, %v4507_v28  ;;  %v4501_v21 = vld [vmem:[%s7547_s9 + $0x98] sm:$0xf0]  ;;  %v4491_v36 = vld [vmem:[%s7547_s9 + $0x80] sm:$0xf]  ;;  %v5092_v11 = vld [vmem:[%s7547_s9 + $0x154] sm:$0xf0] }
 0x690   :  { %3033 = vmatpush.bf16.msrb.mxu0 %v4572_v7  ;;  %2900 = vmatpush.bf16.msrb.mxu2 %v4548_v14  ;;  %v4512_v41 = vor.u32 %v5069_v56, %v4509_v32  ;;  %v4500_v16 = vor.u32 %v5068_v51, %v4499_v1  ;;  %v4504_v5 = vor.u32 %v5067_v37, %v4501_v21  ;;  %v5091_v39 = vld [vmem:[%s7547_s9 + $0x154] sm:$0xf]  ;;  %v4667_v8 = vld [vmem:[%s7547_s9 + $0x140] sm:$0xf]  ;;  %v5090_v20 = vld [vmem:[%s7547_s9 + $0x144] sm:$0xf0] }
 0x691   :  { %v4688_v12 = vor.u32 %v5093_v29, %v4685_v47  ;;  %v4669_v45 = vld [vmem:[%s7547_s9 + $0x148] sm:$0xf0]  ;;  %v4659_v56 = vld [vmem:[%s7547_s9 + $0x130] sm:$0xf]  ;;  %v5088_v32 = vld [vmem:[%s7547_s9 + $0x134] sm:$0xf0] }
 0x692   :  { %3057 = vmatpush.bf16.msrb.mxu1 %v4576_v44  ;;  %2927 = vmatpush.bf16.msrb.mxu3 %v4528_v9  ;;  %v4661_v1 = vld [vmem:[%s7547_s9 + $0x138] sm:$0xf0]  ;;  %v4651_v51 = vld [vmem:[%s7547_s9 + $0x120] sm:$0xf]  ;;  %v5085_v21 = vld [vmem:[%s7547_s9 + $0x124] sm:$0xf] }
 0x694   :  { %3034 = vmatpush.bf16.msrb.mxu0 %v4564_v63  ;;  %2901 = vmatpush.bf16.msrb.mxu2 %v4540_v23  ;;  %v4693_v63 = vld [vmem:[%s7547_s9 + $0x178] sm:$0xf0] }
 0x696   :  { %3058 = vmatpush.bf16.msrb.mxu1 %v4568_v49  ;;  %2928 = vmatpush.bf16.msrb.mxu3 %v4520_v46  ;;  %v4696_v49 = vor.u32 %v5095_v18, %v4693_v63  ;;  %v4637_v18 = vld [vmem:[%s7547_s9 + $0x108] sm:$0xf0] }
 0x697   :  { %v4640_v29 = vor.u32 %v5081_v6, %v4637_v18 }
 0x698   :  { %3035 = vmatpush.bf16.msrb.mxu0 %v4556_v34  ;;  %2902 = vmatpush.bf16.msrb.mxu2 %v4532_v58  ;;  %v4675_v34 = vld [vmem:[%s7547_s9 + $0x150] sm:$0xf]  ;;  %v4677_v58 = vld [vmem:[%s7547_s9 + $0x158] sm:$0xf0] }
 0x699   :  { %v4676_v53 = vor.u32 %v5092_v11, %v4675_v34  ;;  %v4680_v55 = vor.u32 %v5091_v39, %v4677_v58 }
 0x69a   :  { %3059 = vmatpush.bf16.msrb.mxu1 %v4560_v15  ;;  %2929 = vmatpush.bf16.msrb.mxu3 %v4512_v41  ;;  %v4660_v41 = vor.u32 %v5088_v32, %v4659_v56 }
 0x69c   :  { %2903 = vmatpush.bf16.msrb.mxu2 %v4524_v38  ;;  %v5089_v38 = vld [vmem:[%s7547_s9 + $0x144] sm:$0xf] }
 0x69d   :  { %2719 = vmatmul.bf16.gmra.mxu0 %v2566_v35  ;;  %2747 = vmatmul.bf16.gmra.mxu1 %v2567_v54  ;;  %v5066_v35 = vld [vmem:[%s7547_s9 + $0x84] sm:$0xf0]  ;;  %v5065_v54 = vld [vmem:[%s7547_s9 + $0x84] sm:$0xf]  ;;  %v4672_v52 = vor.u32 %v5089_v38, %v4669_v45 }
 0x69e   :  { %2930 = vmatpush.bf16.msrb.mxu3 %v4504_v5  ;;  %v4492_v27 = vor.u32 %v5066_v35, %v4491_v36  ;;  %v4496_v22 = vor.u32 %v5065_v54, %v4493_v2  ;;  %v4653_v5 = vld [vmem:[%s7547_s9 + $0x128] sm:$0xf0]  ;;  %v4643_v54 = vld [vmem:[%s7547_s9 + $0x110] sm:$0xf] }
 0x69f   :  { %v4656_v35 = vor.u32 %v5085_v21, %v4653_v5 }
 0x6a0   :  { %2904 = vmatpush.bf16.msrb.mxu2 %v4516_v10  ;;  %v4668_v10 = vor.u32 %v5090_v20, %v4667_v8 }
 0x6a2   :  { %2931 = vmatpush.bf16.msrb.mxu3 %v4496_v22  ;;  %v5084_v22 = vld [vmem:[%s7547_s9 + $0x114] sm:$0xf0] }
 0x6a4   :  { %2905 = vmatpush.bf16.msrb.mxu2 %v4508_v26  ;;  %v5087_v26 = vld [vmem:[%s7547_s9 + $0x134] sm:$0xf] }
 0x6a5   :  { %v4664_v37 = vor.u32 %v5087_v26, %v4661_v1 }
 0x6a6   :  { %3211 = vmatpush.bf16.msra.mxu3 %v4696_v49 }
 0x6a8   :  { %2906 = vmatpush.bf16.msrb.mxu2 %v4500_v16  ;;  %v5086_v16 = vld [vmem:[%s7547_s9 + $0x124] sm:$0xf0] }
 0x6a9   :  { %v4652_v36 = vor.u32 %v5086_v16, %v4651_v51  ;;  %v3247_v16 = vld [vmem:[%s7548_s10] sm:$0x3]  ;;  %s5252_s10 = smov 64  }
 0x6aa   :  { %3212 = vmatpush.bf16.msra.mxu3 %v4688_v12 }
 0x6ac   :  { %2907 = vmatpush.bf16.msrb.mxu2 %v4492_v27 }
 0x6ae   :  { %3213 = vmatpush.bf16.msra.mxu3 %v4680_v55 }
 0x6b0   :  { %3187 = vmatpush.bf16.msra.mxu2 %v4692_v13 }
 0x6b2   :  { %3214 = vmatpush.bf16.msra.mxu3 %v4672_v52 }
 0x6b4   :  { %3188 = vmatpush.bf16.msra.mxu2 %v4684_v0 }
 0x6b6   :  { %3215 = vmatpush.bf16.msra.mxu3 %v4664_v37 }
 0x6b8   :  { %3189 = vmatpush.bf16.msra.mxu2 %v4676_v53 }
 0x6ba   :  { %3216 = vmatpush.bf16.msra.mxu3 %v4656_v35  ;;  %v7249_v35 = vperm.slane %v3247_v16, 0 }
 0x6bc   :  { %3190 = vmatpush.bf16.msra.mxu2 %v4668_v10 }
 0x6c0   :  { %3191 = vmatpush.bf16.msra.mxu2 %v4660_v41 }
 0x6c4   :  { %3192 = vmatpush.bf16.msra.mxu2 %v4652_v36 }
 0x6ea   :  { %v2705_v7 = vpop.f32.mrf.mxu0  ;;  %v2733_v60 = vpop.f32.mrf.mxu1 }
 0x6eb   :  { %v2734_v44 = vadd.f32 %v2733_v60, %v2705_v7  ;;  %v5083_v7 = vld [vmem:[%s7547_s9 + $0x114] sm:$0xf]  ;;  %v4645_v60 = vld [vmem:[%s7547_s9 + $0x118] sm:$0xf0] }
 0x6f2   :  { %v2707_v59 = vpop.f32.mrf.mxu0  ;;  %v2735_v3 = vpop.f32.mrf.mxu1 }
 0x6f3   :  { %v2736_v14 = vadd.f32 %v2735_v3, %v2707_v59 }
 0x6f5   :  { %v7122_v62 = vpack.c.bf16 %v2736_v14, %v2734_v44  ;;  %v4644_v14 = vor.u32 %v5084_v22, %v4643_v54 }
 0x6f7   :  { %3036 = vmatmul.bf16.vlgmr.msrb.gmra.mxu0 %v7122_v62  ;;  %3060 = vmatmul.bf16.vlgmr.msrb.gmra.mxu1 %v7122_v62  ;;  %v2792_v23 = vshll.u32 %v7122_v62, 16  ;;  %v2790_v9 = vshrl.u32 %v7122_v62, 16  ;;  %v3097_v55 = vrot.slane %v7122_v62, 1 }
 0x6f8   :  { %3193 = vmatpush.bf16.msra.mxu2 %v4644_v14 }
 0x6f9   :  { %v2794_v61 = vrot.slane %v2792_v23, 1 }
 0x6fa   :  { %v2710_v43 = vpop.f32.mrf.mxu0  ;;  %v2738_v30 = vpop.f32.mrf.mxu1 }
 0x6fb   :  { %v2739_v25 = vadd.f32 %v2738_v30, %v2710_v43  ;;  %v2795_v19 = vor.u32 %v2794_v61, %v2790_v9  ;;  %v4648_v43 = vor.u32 %v5083_v7, %v4645_v60  ;;  %v4635_v30 = vld [vmem:[%s7547_s9 + $0x100] sm:$0xf] }
 0x6fc   :  { %v4636_v24 = vor.u32 %v5082_v42, %v4635_v30 }
 0x6fd   :  { %3217 = vmatpush.bf16.msra.mxu3 %v4648_v43 }
 0x6fe   :  { %3194 = vmatpush.bf16.msra.mxu2 %v4636_v24 }
 0x701   :  { %3218 = vmatpush.bf16.msra.mxu3 %v4640_v29 }
 0x702   :  { %v2712_v50 = vpop.f32.mrf.mxu0  ;;  %v2740_v4 = vpop.f32.mrf.mxu1 }
 0x703   :  { %v2741_v15 = vadd.f32 %v2740_v4, %v2712_v50 }
 0x705   :  { %v7163_v40 = vpack.c.bf16 %v2741_v15, %v2739_v25 }
 0x707   :  { %3041 = vmatmul.bf16.gmra.mxu0 %v7163_v40  ;;  %3065 = vmatmul.bf16.gmra.mxu1 %v7163_v40  ;;  %v2797_v57 = vshll.u32 %v7163_v40, 16  ;;  %v2801_v13 = vshrl.u32 %v7163_v40, 16  ;;  %v3098_v53 = vrot.slane %v7163_v40, 1 }
 0x709   :  { %v2799_v48 = vrot.slane %v2797_v57, 1  ;;  %v3099_v61 = vsel %vm532_vm2, %v3097_v55, %v3098_v53 }
 0x70a   :  { %v2715_v28 = vpop.f32.mrf.mxu0  ;;  %v2743_v33 = vpop.f32.mrf.mxu1 }
 0x70b   :  { %v2800_v46 = vsel %vm94_vm0, %v2795_v19, %v2799_v48  ;;  %v2744_v59 = vadd.f32 %v2743_v33, %v2715_v28  ;;  %v2803_v49 = vor.u32 %v2801_v13, %v2799_v48 }
 0x70c   :  { %2908 = vmatmul.bf16.vlgmr.msrb.gmra.mxu2 %v2800_v46  ;;  %2932 = vmatmul.bf16.vlgmr.msrb.gmra.mxu3 %v2800_v46 }
 0x712   :  { %v2717_v27 = vpop.f32.mrf.mxu0  ;;  %v2745_v2 = vpop.f32.mrf.mxu1 }
 0x713   :  { %v2746_v3 = vadd.f32 %v2745_v2, %v2717_v27  ;;  %v3250_v27 = vperm.slane %v3247_v16, 1 }
 0x715   :  { %v2754_v44 = vpack.c.bf16 %v2746_v3, %v2744_v59 }
 0x717   :  { %3046 = vmatmul.bf16.gmra.mxu0 %v2754_v44  ;;  %3070 = vmatmul.bf16.gmra.mxu1 %v2754_v44  ;;  %v2805_v63 = vshll.u32 %v2754_v44, 16  ;;  %v2809_v25 = vshrl.u32 %v2754_v44, 16  ;;  %v3100_v8 = vrot.slane %v2754_v44, 1 }
 0x719   :  { %v2807_v31 = vrot.slane %v2805_v63, 1  ;;  %v3101_v20 = vsel %vm532_vm2, %v3098_v53, %v3100_v8 }
 0x71a   :  { %v2720_v23 = vpop.f32.mrf.mxu0  ;;  %v2748_v0 = vpop.f32.mrf.mxu1 }
 0x71b   :  { %v2749_v47 = vadd.f32 %v2748_v0, %v2720_v23  ;;  %v2808_v50 = vsel %vm94_vm0, %v2803_v49, %v2807_v31  ;;  %v2811_v15 = vor.u32 %v2809_v25, %v2807_v31 }
 0x71c   :  { %2913 = vmatmul.bf16.gmra.mxu2 %v2808_v50  ;;  %2937 = vmatmul.bf16.gmra.mxu3 %v2808_v50 }
 0x71d   :  { %v2771_v4 = vpack.c.bf16 %v2749_v47, %v2749_v47 }
 0x71f   :  { %v2813_v11 = vshll.u32 %v2771_v4, 16  ;;  %v3102_v38 = vrot.slane %v2771_v4, 1 }
 0x721   :  { %v2815_v39 = vrot.slane %v2813_v11, 1  ;;  %v3103_v45 = vsel %vm532_vm2, %v3100_v8, %v3102_v38 }
 0x722   :  { %v2722_v12 = vpop.f32.mrf.mxu0  ;;  %v2750_v34 = vpop.f32.mrf.mxu1 }
 0x723   :  { %v2816_v58 = vsel %vm94_vm0, %v2811_v15, %v2815_v39 }
 0x72c   :  { %2918 = vmatmul.bf16.gmra.mxu2 %v2816_v58  ;;  %2942 = vmatmul.bf16.gmra.mxu3 %v2816_v58 }
 0x73c   :  { %3195 = vmatmul.bf16.vlgmr.msra.gmra.mxu2 %v3099_v61  ;;  %3219 = vmatmul.bf16.vlgmr.msra.gmra.mxu3 %v3099_v61 }
 0x74c   :  { %3200 = vmatmul.bf16.gmra.mxu2 %v3101_v20  ;;  %3224 = vmatmul.bf16.gmra.mxu3 %v3101_v20 }
 0x75c   :  { %3205 = vmatmul.bf16.gmra.mxu2 %v3103_v45  ;;  %3229 = vmatmul.bf16.gmra.mxu3 %v3103_v45 }
 0x774   :  { %v3037_v46 = vpop.f32.mrf.mxu0  ;;  %v3061_v56 = vpop.f32.mrf.mxu1 }
 0x77c   :  { %v3039_v41 = vpop.f32.mrf.mxu0  ;;  %v3063_v1 = vpop.f32.mrf.mxu1 }
 0x784   :  { %v3042_v2 = vpop.f32.mrf.mxu0  ;;  %v3066_v22 = vpop.f32.mrf.mxu1 }
 0x78c   :  { %v3044_v0 = vpop.f32.mrf.mxu0  ;;  %v3068_v47 = vpop.f32.mrf.mxu1 }
 0x78f   :  { %v2909_v9 = vpop.f32.mrf.mxu2  ;;  %v2933_v57 = vpop.f32.mrf.mxu3 }
 0x790   :  { %v3038_v21 = vadd.f32 %v3037_v46, %v2909_v9  ;;  %v3062_v5 = vadd.f32 %v3061_v56, %v2933_v57 }
 0x794   :  { %v3047_v38 = vpop.f32.mrf.mxu0  ;;  %v3071_v45 = vpop.f32.mrf.mxu1 }
 0x797   :  { %v2911_v19 = vpop.f32.mrf.mxu2  ;;  %v2935_v40 = vpop.f32.mrf.mxu3 }
 0x798   :  { %v3040_v7 = vadd.f32 %v3039_v41, %v2911_v19  ;;  %v3064_v60 = vadd.f32 %v3063_v1, %v2935_v40 }
 0x79f   :  { %v2914_v48 = vpop.f32.mrf.mxu2  ;;  %v2938_v62 = vpop.f32.mrf.mxu3 }
 0x7a0   :  { %v3043_v50 = vadd.f32 %v3042_v2, %v2914_v48  ;;  %v3067_v4 = vadd.f32 %v3066_v22, %v2938_v62 }
 0x7a7   :  { %v2916_v10 = vpop.f32.mrf.mxu2  ;;  %v2940_v52 = vpop.f32.mrf.mxu3 }
 0x7a8   :  { %v3045_v11 = vadd.f32 %v3044_v0, %v2916_v10  ;;  %v3069_v39 = vadd.f32 %v3068_v47, %v2940_v52  ;;  %v5110_v0 = vld [vmem:[%s7550_s12 + $0x58] sm:$0xff]  ;;  %v5101_v47 = vld [vmem:[%s7550_s12 + $0x10] sm:$0xff] }
 0x7af   :  { %v7238_v28 = vpop.f32.mrf.mxu2  ;;  %v7240_v33 = vpop.f32.mrf.mxu3 }
 0x7b0   :  { %v3048_v46 = vadd.f32 %v3047_v38, %v7238_v28  ;;  %v3072_v56 = vadd.f32 %v3071_v45, %v7240_v33  ;;  %v5107_v38 = vld [vmem:[%s7550_s12 + $0x40] sm:$0xff]  ;;  %v4913_v45 = vld [vmem:[%s7551_s13 + $0x70] sm:$0xf] }
 0x7b7   :  { %v7242_v32 = vpop.f32.mrf.mxu2  ;;  %v7244_v26 = vpop.f32.mrf.mxu3 }
 0x7bf   :  { %v3196_v51 = vpop.f32.mrf.mxu2  ;;  %v3220_v37 = vpop.f32.mrf.mxu3 }
 0x7c0   :  { %v3235_v36 = vadd.f32 %v3196_v51, %v3038_v21  ;;  %v3236_v54 = vadd.f32 %v3220_v37, %v3062_v5  ;;  %v3049_v51 = vpop.f32.mrf.mxu0  ;;  %v3073_v37 = vpop.f32.mrf.mxu1 }
 0x7c1   :  { %v3050_v16 = vadd.f32 %v3049_v51, %v7242_v32  ;;  %v3074_v21 = vadd.f32 %v3073_v37, %v7244_v26  ;;  %v5097_v32 = vld [vmem:[%s7549_s11] sm:$0xff]  ;;  %v5098_v26 = vld [vmem:[%s7549_s11 + $0x8] sm:$0xff]  ;;  %v5145_v51 = vld [vmem:[%s7551_s13 + $0xf4] sm:$0xf] }
 0x7c2   :  { %v3253_v44 = vadd.f32 %v7249_v35, %v3235_v36  ;;  %v3254_v14 = vadd.f32 %v3250_v27, %v3236_v54  ;;  %v4851_v37 = vld [vmem:[%s7551_s13 + $0xf8] sm:$0xf0] }
 0x7c4   :  { %v3265_v18 = vmax.f32 %v3253_v44, 0.0  ;;  %v3266_v13 = vmax.f32 %v3254_v14, 0.0 }
 0x7c7   :  { %v3198_v59 = vpop.f32.mrf.mxu2  ;;  %v3222_v3 = vpop.f32.mrf.mxu3 }
 0x7c8   :  { %v3237_v43 = vadd.f32 %v3198_v59, %v3040_v7  ;;  %v3238_v30 = vadd.f32 %v3222_v3, %v3064_v60 }
 0x7ca   :  { %v3255_v42 = vadd.f32 %v7249_v35, %v3237_v43  ;;  %v3256_v6 = vadd.f32 %v3250_v27, %v3238_v30  ;;  %v5105_v30 = vld [vmem:[%s7550_s12 + $0x30] sm:$0xff] }
 0x7cc   :  { %v3267_v63 = vmax.f32 %v3255_v42, 0.0  ;;  %v3268_v49 = vmax.f32 %v3256_v6, 0.0  ;;  %v5113_v42 = vld [vmem:[%s7550_s12 + $0x70] sm:$0xff] }
 0x7ce   :  { %v7253_v31 = vpack.c.bf16 %v3267_v63, %v3265_v18  ;;  %v7255_v24 = vpack.c.bf16 %v3268_v49, %v3266_v13  ;;  %v5104_v13 = vld [vmem:[%s7550_s12 + $0x28] sm:$0xff]  ;;  %v5103_v49 = vld [vmem:[%s7550_s12 + $0x20] sm:$0xff] }
 0x7cf   :  { %v3201_v29 = vpop.f32.mrf.mxu2  ;;  %v3225_v23 = vpop.f32.mrf.mxu3  ;;  %v5112_v63 = vld [vmem:[%s7550_s12 + $0x68] sm:$0xff] }
 0x7d0   :  { %v3239_v12 = vadd.f32 %v3201_v29, %v3043_v50  ;;  %v3240_v34 = vadd.f32 %v3225_v23, %v3067_v4  ;;  %v5102_v23 = vld [vmem:[%s7550_s12 + $0x18] sm:$0xff]  ;;  %v5109_v50 = vld [vmem:[%s7550_s12 + $0x50] sm:$0xff] }
 0x7d2   :  { %v3257_v58 = vadd.f32 %v7249_v35, %v3239_v12  ;;  %v3258_v53 = vadd.f32 %v3250_v27, %v3240_v34 }
 0x7d4   :  { %v3269_v9 = vmax.f32 %v3257_v58, 0.0  ;;  %v3270_v57 = vmax.f32 %v3258_v53, 0.0 }
 0x7d7   :  { %v3203_v25 = vpop.f32.mrf.mxu2  ;;  %v3227_v15 = vpop.f32.mrf.mxu3 }
 0x7d8   :  { %v3241_v55 = vadd.f32 %v3203_v25, %v3045_v11  ;;  %v3242_v61 = vadd.f32 %v3227_v15, %v3069_v39 }
 0x7da   :  { %v3259_v8 = vadd.f32 %v7249_v35, %v3241_v55  ;;  %v3260_v20 = vadd.f32 %v3250_v27, %v3242_v61  ;;  %v5100_v61 = vld [vmem:[%s7550_s12 + $0x8] sm:$0xff] }
 0x7dc   :  { %v3271_v19 = vmax.f32 %v3259_v8, 0.0  ;;  %v3272_v40 = vmax.f32 %v3260_v20, 0.0  ;;  %v5108_v8 = vld [vmem:[%s7550_s12 + $0x48] sm:$0xff]  ;;  %v5099_v20 = vld [vmem:[%s7550_s12] sm:$0xff] }
 0x7de   :  { %v3279_v48 = vpack.c.bf16 %v3271_v19, %v3269_v9  ;;  %v3280_v62 = vpack.c.bf16 %v3272_v40, %v3270_v57  ;;  %v5130_v9 = vld [vmem:[%s7551_s13 + $0x74] sm:$0xf0]  ;;  %v5129_v57 = vld [vmem:[%s7551_s13 + $0x74] sm:$0xf]  ;;  %v4915_v40 = vld [vmem:[%s7551_s13 + $0x78] sm:$0xf0] }
 0x7df   :  { %v3206_v10 = vpop.f32.mrf.mxu2  ;;  %v3230_v52 = vpop.f32.mrf.mxu3  ;;  %v4914_v19 = vor.u32 %v5130_v9, %v4913_v45  ;;  %v5120_v45 = vld [vmem:[%s7551_s13 + $0x24] sm:$0xf0]  ;;  %v5119_v9 = vld [vmem:[%s7551_s13 + $0x24] sm:$0xf] }
 0x7e0   :  { %v3243_v41 = vadd.f32 %v3206_v10, %v3048_v46  ;;  %v3244_v1 = vadd.f32 %v3230_v52, %v3072_v56  ;;  %v4918_v10 = vor.u32 %v5129_v57, %v4915_v40  ;;  %v5127_v52 = vld [vmem:[%s7551_s13 + $0x64] sm:$0xf]  ;;  %v4907_v46 = vld [vmem:[%s7551_s13 + $0x68] sm:$0xf0]  ;;  %v4849_v56 = vld [vmem:[%s7551_s13 + $0xf0] sm:$0xf] }
 0x7e1   :  { %v4875_v57 = vld [vmem:[%s7551_s13 + $0x28] sm:$0xf0] }
 0x7e2   :  { %v3261_v54 = vadd.f32 %v7249_v35, %v3243_v41  ;;  %v3262_v2 = vadd.f32 %v3250_v27, %v3244_v1  ;;  %v5146_v1 = vld [vmem:[%s7551_s13 + $0xf4] sm:$0xf0] }
 0x7e4   :  { %v3273_v59 = vmax.f32 %v3261_v54, 0.0  ;;  %v3274_v33 = vmax.f32 %v3262_v2, 0.0  ;;  %v5126_v54 = vld [vmem:[%s7551_s13 + $0x54] sm:$0xf0]  ;;  %v5125_v2 = vld [vmem:[%s7551_s13 + $0x54] sm:$0xf] }
 0x7e7   :  { %v3208_v5 = vpop.f32.mrf.mxu2  ;;  %v3232_v36 = vpop.f32.mrf.mxu3 }
 0x7e8   :  { %v3245_v22 = vadd.f32 %v3208_v5, %v3050_v16  ;;  %v3246_v7 = vadd.f32 %v3232_v36, %v3074_v21  ;;  %v4910_v16 = vor.u32 %v5127_v52, %v4907_v46  ;;  %v4850_v21 = vor.u32 %v5146_v1, %v4849_v56  ;;  %v4897_v36 = vld [vmem:[%s7551_s13 + $0x50] sm:$0xf]  ;;  %v5118_v52 = vld [vmem:[%s7551_s13 + $0x14] sm:$0xf0]  ;;  %v5117_v46 = vld [vmem:[%s7551_s13 + $0x14] sm:$0xf] }
 0x7e9   :  { %v4854_v5 = vor.u32 %v5145_v51, %v4851_v37  ;;  %v4867_v56 = vld [vmem:[%s7551_s13 + $0x18] sm:$0xf0] }
 0x7ea   :  { %v3263_v60 = vadd.f32 %v7249_v35, %v3245_v22  ;;  %v3264_v28 = vadd.f32 %v3250_v27, %v3246_v7  ;;  %v5106_v35 = vld [vmem:[%s7550_s12 + $0x38] sm:$0xff]  ;;  %v4841_v7 = vld [vmem:[%s7551_s13 + $0xe0] sm:$0xf]  ;;  %v4870_v37 = vor.u32 %v5117_v46, %v4867_v56 }
 0x7eb   :  { %v5114_v27 = vld [vmem:[%s7550_s12 + $0x78] sm:$0xff]  ;;  %3512 = vmatpush.bf16.msrb.mxu2 %v5106_v35 }
 0x7ec   :  { %v3275_v3 = vmax.f32 %v3263_v60, 0.0  ;;  %v3276_v44 = vmax.f32 %v3264_v28, 0.0  ;;  %3526 = vmatpush.bf16.msrb.mxu3 %v5114_v27  ;;  %v4899_v22 = vld [vmem:[%s7551_s13 + $0x58] sm:$0xf0]  ;;  %v5144_v60 = vld [vmem:[%s7551_s13 + $0xe4] sm:$0xf0] }
 0x7ed   :  { %v4842_v28 = vor.u32 %v5144_v60, %v4841_v7  ;;  %v5142_v35 = vld [vmem:[%s7551_s13 + $0xd4] sm:$0xf0]  ;;  %v5141_v27 = vld [vmem:[%s7551_s13 + $0xd4] sm:$0xf] }
 0x7ee   :  { %v3281_v14 = vpack.c.bf16 %v3275_v3, %v3273_v59  ;;  %v3282_v43 = vpack.c.bf16 %v3276_v44, %v3274_v33  ;;  %v5143_v59 = vld [vmem:[%s7551_s13 + $0xe4] sm:$0xf]  ;;  %v4843_v33 = vld [vmem:[%s7551_s13 + $0xe8] sm:$0xf0]  ;;  %v4898_v3 = vor.u32 %v5126_v54, %v4897_v36 }
 0x7ef   :  { %3513 = vmatpush.bf16.msrb.mxu2 %v5105_v30  ;;  %v4846_v44 = vor.u32 %v5143_v59, %v4843_v33  ;;  %v5123_v30 = vld [vmem:[%s7551_s13 + $0x44] sm:$0xf] }
 0x7f0   :  { %3299 = vmatpush.bf16.msra.mxu0 %v3281_v14  ;;  %3313 = vmatpush.bf16.msra.mxu1 %v3282_v43 }
 0x7f1   :  { %3527 = vmatpush.bf16.msrb.mxu3 %v5113_v42  ;;  %v4891_v42 = vld [vmem:[%s7551_s13 + $0x48] sm:$0xf0] }
 0x7f3   :  { %3514 = vmatpush.bf16.msrb.mxu2 %v5104_v13 }
 0x7f4   :  { %3300 = vmatpush.bf16.msra.mxu0 %v3279_v48  ;;  %3314 = vmatpush.bf16.msra.mxu1 %v3280_v62 }
 0x7f5   :  { %3528 = vmatpush.bf16.msrb.mxu3 %v5112_v63  ;;  %v4825_v63 = vld [vmem:[%s7551_s13 + $0xc0] sm:$0xf] }
 0x7f7   :  { %3515 = vmatpush.bf16.msrb.mxu2 %v5103_v49 }
 0x7f8   :  { %3301 = vmatpush.bf16.msra.mxu0 %v7253_v31  ;;  %3315 = vmatpush.bf16.msra.mxu1 %v7255_v24 }
 0x7fb   :  { %4701 = vmatmul.msk.bf16.vlgmr.msra.gmra.mxu0 %vm3290_vm7, %v5097_v32  ;;  %4702 = vmatmul.msk.bf16.vlgmr.msra.gmra.mxu1 %vm3290_vm7, %v5097_v32  ;;  %v4902_v32 = vor.u32 %v5125_v2, %v4899_v22 }
 0x7fc   :  { %3338 = vmatpush.bf16.msrb.mxu0 %v3281_v14  ;;  %3352 = vmatpush.bf16.msrb.mxu1 %v3282_v43  ;;  %v4889_v14 = vld [vmem:[%s7551_s13 + $0x40] sm:$0xf]  ;;  %v5124_v43 = vld [vmem:[%s7551_s13 + $0x44] sm:$0xf0] }
 0x7fd   :  { %3516 = vmatpush.bf16.msrb.mxu2 %v5102_v23  ;;  %v4890_v49 = vor.u32 %v5124_v43, %v4889_v14  ;;  %v4894_v23 = vor.u32 %v5123_v30, %v4891_v42  ;;  %v5136_v14 = vld [vmem:[%s7551_s13 + $0xa4] sm:$0xf0]  ;;  %v4801_v42 = vld [vmem:[%s7551_s13 + $0x90] sm:$0xf] }
 0x7fe   :  { %v5116_v43 = vld [vmem:[%s7551_s13 + $0x4] sm:$0xf0] }
 0x800   :  { %3339 = vmatpush.bf16.msrb.mxu0 %v3279_v48  ;;  %3353 = vmatpush.bf16.msrb.mxu1 %v3280_v62  ;;  %v4905_v48 = vld [vmem:[%s7551_s13 + $0x60] sm:$0xf]  ;;  %v5128_v62 = vld [vmem:[%s7551_s13 + $0x64] sm:$0xf0] }
 0x801   :  { %3517 = vmatpush.bf16.msrb.mxu2 %v5101_v47  ;;  %v4906_v41 = vor.u32 %v5128_v62, %v4905_v48  ;;  %v5122_v47 = vld [vmem:[%s7551_s13 + $0x34] sm:$0xf0]  ;;  %v4878_v62 = vor.u32 %v5119_v9, %v4875_v57 }
 0x804   :  { %3340 = vmatpush.bf16.msrb.mxu0 %v7253_v31  ;;  %3354 = vmatpush.bf16.msrb.mxu1 %v7255_v24  ;;  %v5111_v31 = vld [vmem:[%s7550_s12 + $0x60] sm:$0xff] }
 0x805   :  { %3529 = vmatpush.bf16.msrb.mxu3 %v5111_v31  ;;  %3518 = vmatpush.bf16.msrb.mxu2 %v5100_v61  ;;  %v5140_v31 = vld [vmem:[%s7551_s13 + $0xc4] sm:$0xf0]  ;;  %v5137_v61 = vld [vmem:[%s7551_s13 + $0xb4] sm:$0xf] }
 0x808   :  { %3655 = vmatpush.bf16.msra.mxu0 %v4850_v21  ;;  %3668 = vmatpush.bf16.msra.mxu1 %v4854_v5 }
 0x809   :  { %3530 = vmatpush.bf16.msrb.mxu3 %v5110_v0  ;;  %3519 = vmatpush.bf16.msrb.mxu2 %v5099_v20  ;;  %v4881_v0 = vld [vmem:[%s7551_s13 + $0x30] sm:$0xf] }
 0x80b   :  { %4709 = vmatmul.msk.bf16.vlgmr.msrb.gmra.mxu0 %vm3290_vm7, %v5098_v26  ;;  %4710 = vmatmul.msk.bf16.vlgmr.msrb.gmra.mxu1 %vm3290_vm7, %v5098_v26  ;;  %v4833_v26 = vld [vmem:[%s7551_s13 + $0xd0] sm:$0xf] }
 0x80c   :  { %3656 = vmatpush.bf16.msra.mxu0 %v4842_v28  ;;  %3669 = vmatpush.bf16.msra.mxu1 %v4846_v44  ;;  %v4809_v44 = vld [vmem:[%s7551_s13 + $0xa0] sm:$0xf] }
 0x80d   :  { %3531 = vmatpush.bf16.msrb.mxu3 %v5109_v50  ;;  %3761 = vmatpush.bf16.msra.mxu2 %v4914_v19  ;;  %v5121_v50 = vld [vmem:[%s7551_s13 + $0x34] sm:$0xf] }
 0x811   :  { %3532 = vmatpush.bf16.msrb.mxu3 %v5108_v8  ;;  %3762 = vmatpush.bf16.msra.mxu2 %v4906_v41  ;;  %v4819_v8 = vld [vmem:[%s7551_s13 + $0xb8] sm:$0xf0] }
 0x812   :  { %v4822_v40 = vor.u32 %v5137_v61, %v4819_v8 }
 0x815   :  { %3533 = vmatpush.bf16.msrb.mxu3 %v5107_v38  ;;  %3763 = vmatpush.bf16.msra.mxu2 %v4898_v3  ;;  %v4873_v38 = vld [vmem:[%s7551_s13 + $0x20] sm:$0xf] }
 0x816   :  { %v4874_v48 = vor.u32 %v5120_v45, %v4873_v38 }
 0x819   :  { %3774 = vmatpush.bf16.msra.mxu3 %v4918_v10  ;;  %3764 = vmatpush.bf16.msra.mxu2 %v4890_v49  ;;  %v4865_v10 = vld [vmem:[%s7551_s13 + $0x10] sm:$0xf] }
 0x81a   :  { %v4866_v41 = vor.u32 %v5118_v52, %v4865_v10 }
 0x81d   :  { %3775 = vmatpush.bf16.msra.mxu3 %v4910_v16 }
 0x821   :  { %3776 = vmatpush.bf16.msra.mxu3 %v4902_v32 }
 0x825   :  { %3777 = vmatpush.bf16.msra.mxu3 %v4894_v23 }
 0x878   :  { %v3303_v6 = vpop.f32.mrf.mxu0  ;;  %v3317_v18 = vpop.f32.mrf.mxu1 }
 0x880   :  { %v3305_v24 = vpop.f32.mrf.mxu0  ;;  %v3319_v29 = vpop.f32.mrf.mxu1 }
 0x888   :  { %v3342_v4 = vpop.f32.mrf.mxu0  ;;  %v3356_v12 = vpop.f32.mrf.mxu1 }
 0x889   :  { %v7311_v39 = vmax.f32 %v3303_v6, %v3342_v4  ;;  %v7313_v25 = vmax.f32 %v3317_v18, %v3356_v12  ;;  %v4835_v6 = vld [vmem:[%s7551_s13 + $0xd8] sm:$0xf0]  ;;  %v4834_v18 = vor.u32 %v5142_v35, %v4833_v26  ;;  %v4826_v12 = vor.u32 %v5140_v31, %v4825_v63  ;;  %v5115_v35 = vld [vmem:[%s7551_s13 + $0x4] sm:$0xf]  ;;  %v4793_v31 = vld [vmem:[%s7551_s13 + $0x80] sm:$0xf] }
 0x88a   :  { %v4838_v13 = vor.u32 %v5141_v27, %v4835_v6  ;;  %v4883_v4 = vld [vmem:[%s7551_s13 + $0x38] sm:$0xf0]  ;;  %v4859_v27 = vld [vmem:[%s7551_s13 + $0x8] sm:$0xf0]  ;;  %v5134_v6 = vld [vmem:[%s7551_s13 + $0x94] sm:$0xf0] }
 0x88b   :  { %3657 = vmatpush.bf16.msra.mxu0 %v4834_v18  ;;  %v4886_v20 = vor.u32 %v5121_v50, %v4883_v4  ;;  %v4862_v30 = vor.u32 %v5115_v35, %v4859_v27  ;;  %v5133_v18 = vld [vmem:[%s7551_s13 + $0x94] sm:$0xf]  ;;  %v4803_v63 = vld [vmem:[%s7551_s13 + $0x98] sm:$0xf0] }
 0x88c   :  { %3670 = vmatpush.bf16.msra.mxu1 %v4838_v13  ;;  %v4802_v13 = vor.u32 %v5134_v6, %v4801_v42  ;;  %v4806_v49 = vor.u32 %v5133_v18, %v4803_v63 }
 0x88d   :  { %3778 = vmatpush.bf16.msra.mxu3 %v4886_v20 }
 0x88f   :  { %3658 = vmatpush.bf16.msra.mxu0 %v4826_v12 }
 0x890   :  { %v3344_v34 = vpop.f32.mrf.mxu0  ;;  %v3358_v11 = vpop.f32.mrf.mxu1 }
 0x891   :  { %v7315_v15 = vmax.f32 %v3305_v24, %v3344_v34  ;;  %v7317_v58 = vmax.f32 %v3319_v29, %v3358_v11  ;;  %v5139_v24 = vld [vmem:[%s7551_s13 + $0xc4] sm:$0xf]  ;;  %v4827_v29 = vld [vmem:[%s7551_s13 + $0xc8] sm:$0xf0]  ;;  %v4817_v11 = vld [vmem:[%s7551_s13 + $0xb0] sm:$0xf]  ;;  %3779 = vmatpush.bf16.msra.mxu3 %v4878_v62 }
 0x892   :  { %v4830_v34 = vor.u32 %v5139_v24, %v4827_v29  ;;  %v5132_v24 = vld [vmem:[%s7551_s13 + $0x84] sm:$0xf0]  ;;  %v5131_v29 = vld [vmem:[%s7551_s13 + $0x84] sm:$0xf] }
 0x893   :  { %v5240_v53 = vpack.i.bf16 %v7315_v15, %v7311_v39  ;;  %v5245_v55 = vpack.i.bf16 %v7317_v58, %v7313_v25  ;;  %v4794_v23 = vor.u32 %v5132_v24, %v4793_v31 }
 0x894   :  { %3671 = vmatpush.bf16.msra.mxu1 %v4830_v34 }
 0x895   :  { %5246 = vrot.lane.b32.xlu1 %v5245_v55, %s5252_s10  ;;  %5241 = vrot.lane.b32.xlu0 %v5240_v53, %s5252_s10  ;;  %v4882_v53 = vor.u32 %v5122_v47, %v4881_v0  ;;  %v5138_v55 = vld [vmem:[%s7551_s13 + $0xb4] sm:$0xf0]  ;;  %v4795_v0 = vld [vmem:[%s7551_s13 + $0x88] sm:$0xf0] }
 0x896   :  { %v4818_v19 = vor.u32 %v5138_v55, %v4817_v11  ;;  %3780 = vmatpush.bf16.msra.mxu3 %v4870_v37  ;;  %v4798_v47 = vor.u32 %v5131_v29, %v4795_v0 }
 0x897   :  { %3765 = vmatpush.bf16.msra.mxu2 %v4882_v53 }
 0x898   :  { %3659 = vmatpush.bf16.msra.mxu0 %v4818_v19  ;;  %3672 = vmatpush.bf16.msra.mxu1 %v4822_v40 }
 0x89a   :  { %3781 = vmatpush.bf16.msra.mxu3 %v4862_v30 }
 0x89b   :  { %3766 = vmatpush.bf16.msra.mxu2 %v4874_v48 }
 0x89f   :  { %3767 = vmatpush.bf16.msra.mxu2 %v4866_v41 }
 0x907   :  { %v5247_v1 = vpop.permute.xlu1 %5246  ;;  %v5242_v51 = vpop.permute.xlu0 %5241 }
 0x908   :  { %v5249_v16 = vunpack.i.h.bf16 %v5247_v1  ;;  %v5248_v21 = vunpack.i.l.bf16 %v5247_v1  ;;  %v5244_v5 = vunpack.i.h.bf16 %v5242_v51  ;;  %v5243_v36 = vunpack.i.l.bf16 %v5242_v51 }
 0x90a   :  { %v3375_v54 = vsel %vm3373_vm8, %v5244_v5, %v5249_v16  ;;  %v3377_v2 = vsel %vm3373_vm8, %v5249_v16, %v5244_v5  ;;  %v3374_v22 = vsel %vm3373_vm8, %v5243_v36, %v5248_v21  ;;  %v3376_v7 = vsel %vm3373_vm8, %v5248_v21, %v5243_v36 }
 0x90b   :  { %v3380_v60 = vmax.f32 %v7315_v15, %v3375_v54  ;;  %v3381_v28 = vmax.f32 %v7317_v58, %v3377_v2  ;;  %v3378_v59 = vmax.f32 %v7311_v39, %v3374_v22  ;;  %v3379_v17 = vmax.f32 %v7313_v25, %v3376_v7  ;;  %v5135_v15 = vld [vmem:[%s7551_s13 + $0xa4] sm:$0xf]  ;;  %v4811_v25 = vld [vmem:[%s7551_s13 + $0xa8] sm:$0xf0]  ;;  %v4857_v58 = vld [vmem:[%s7551_s13] sm:$0xf] }
 0x90c   :  { %v4810_v39 = vor.u32 %v5136_v14, %v4809_v44  ;;  %v4814_v32 = vor.u32 %v5135_v15, %v4811_v25  ;;  %v4858_v26 = vor.u32 %v5116_v43, %v4857_v58 }
 0x90d   :  { %v3382_v33 = vpack.c.bf16 %v3380_v60, %v3378_v59  ;;  %v3383_v3 = vpack.c.bf16 %v3381_v28, %v3379_v17 }
 0x90e   :  { %3660 = vmatpush.bf16.msra.mxu0 %v4810_v39  ;;  %3673 = vmatpush.bf16.msra.mxu1 %v4814_v32 }
 0x90f   :  { %3520 = vmatmul.bf16.vlgmr.msrb.gmra.mxu2 %v3382_v33  ;;  %3534 = vmatmul.bf16.vlgmr.msrb.gmra.mxu3 %v3383_v3 }
 0x910   :  { %3768 = vmatpush.bf16.msra.mxu2 %v4858_v26 }
 0x912   :  { %3661 = vmatpush.bf16.msra.mxu0 %v4802_v13  ;;  %3674 = vmatpush.bf16.msra.mxu1 %v4806_v49 }
 0x916   :  { %3662 = vmatpush.bf16.msra.mxu0 %v4794_v23  ;;  %3675 = vmatpush.bf16.msra.mxu1 %v4798_v47 }
 0x992   :  { %v3521_v50 = vpop.f32.mrf.mxu2  ;;  %v3535_v4 = vpop.f32.mrf.mxu3 }
 0x993   :  { %v3536_v12 = vadd.f32 %v3535_v4, %v3521_v50 }
 0x995   :  { %v3540_v34 = vpack.c.bf16 %v3536_v12, %v3536_v12 }
 0x997   :  { %3769 = vmatmul.bf16.vlgmr.msra.gmra.mxu2 %v3540_v34  ;;  %3782 = vmatmul.bf16.vlgmr.msra.gmra.mxu3 %v3540_v34 }
 0x99a   :  { %v3523_v11 = vpop.f32.mrf.mxu2  ;;  %v3537_v53 = vpop.f32.mrf.mxu3 }
 0x99b   :  { %v3538_v55 = vadd.f32 %v3537_v53, %v3523_v11 }
 0x99d   :  { %v3557_v61 = vpack.c.bf16 %v3538_v55, %v3538_v55 }
 0x99f   :  { %3663 = vmatmul.bf16.vlgmr.msra.gmra.mxu0 %v3557_v61  ;;  %3676 = vmatmul.bf16.vlgmr.msra.gmra.mxu1 %v3557_v61 }
 0xa1a   :  { %v3770_v8 = vpop.f32.mrf.mxu2  ;;  %v3783_v20 = vpop.f32.mrf.mxu3 }
 0xa1c   :  { %v3664_v38 = vpop.f32.mrf.mxu0  ;;  %v3677_v45 = vpop.f32.mrf.mxu1 }
 0xa1d   :  { %v3771_v9 = vadd.f32 %v3770_v8, %v3664_v38  ;;  %v3784_v57 = vadd.f32 %v3783_v20, %v3677_v45 }
 0xa1f   :  { %3787 = vst [vmem:[%s7552_s14] sm:$0xff] %v3771_v9 }
 0xa20   :  { %3788 = vst [vmem:[%s7552_s14 + $0x8] sm:$0xff] %v3784_v57 }
 0xa22   :  { %v3772_v19 = vpop.f32.mrf.mxu2  ;;  %v3785_v40 = vpop.f32.mrf.mxu3 }
 0xa24   :  { %v3666_v48 = vpop.f32.mrf.mxu0  ;;  %v3679_v62 = vpop.f32.mrf.mxu1 }

</bundles_post_ra>
